<compile_context>
chip_gen: v6e
topology: v6e:2x2x1
jax: 0.10.0
libtpu: 0.0.40
codegen_flags: <defaults>
</compile_context>

<pallas_src>
import numpy as np

import jax
import jax.numpy as jnp
from jax.experimental import pallas as pl
from jax.experimental.pallas import tpu as pltpu

N_FEATURES = 200          # logical feature width of the PyTorch module
N_CLASSES = 7
HP = 256                  # feature width padded to the 128-lane grid
CLSP = 128                # class width padded to one full lane
MAXR = 8                  # speaker-memory rows padded to one sublane tile
R2 = 2 * MAXR             # two speakers' memories stacked
NEG_INF = -1e30
NCORES = 2                # leading "parallel" grid axis (v7x megacore split)
AUX_COS, AUX_UPD, AUX_MASK = 0, 1, 2
REASON_STEPS = (0, 1)


# ----------------------------------------------------------------------------
# The single fused Pallas kernel: one grid step == one (core-slab, utterance)
# ----------------------------------------------------------------------------
def _fused_forward_kernel(
    bank_ref, aux_ref, meminit_ref,                     # per-step tensor blocks
    wbank_ref, bbank_ref,                               # [fcw | wq] fused
    fcw_ref, fcb2_ref,                                  # fc alone (2*bias)
    wlstm_ref, blstm_ref,                               # [wx ; wh], gates [i|g|o]
    wfc1_ref, bfc1_ref,                                 # [fc1_x ; fc1_q]
    wcls_ref, bcls_ref,                                 # [wcs ; wcf]
    logp_ref,                                           # output: log-probs
    mem_ref,                                            # VMEM scratch [BH,R2,HP]
):
    j = pl.program_id(1)

    # (Re)load this core-slab's speaker memories at the first utterance.
    @pl.when(j == 0)
    def _():
        mem_ref[...] = meminit_ref[...]

    mem = mem_ref[...]                                  # [BH, R2, HP] f32
    bank = bank_ref[0].astype(jnp.bfloat16)             # [BH, HP]
    cosw = aux_ref[0, AUX_COS]                          # [BH, R2] f32
    onehot = aux_ref[0, AUX_UPD]                        # [BH, R2]
    attn_mask = aux_ref[0, AUX_MASK]                    # [BH, R2]

    # q_t = fc(bank)  and  feat = q_fc(bank)  in one fused MXU call.
    bank_out = (jnp.dot(bank, wbank_ref[...],
                        preferred_element_type=jnp.float32) + bbank_ref[...])
    q_t = bank_out[:, :HP]                              # [BH, HP]
    feat = bank_out[:, HP:]                             # [BH, 2*HP]

    # h0 = cos-weighted sum of memory rows; mem_row = row to be gated/updated.
    # (VPU broadcast-multiply + sublane reduce over the 16 rows.)
    h0 = jnp.sum(cosw[:, :, None] * mem, axis=1)        # [BH, HP]
    mem_row = jnp.sum(onehot[:, :, None] * mem, axis=1)  # [BH, HP]

    # Single-step LSTM (c0 == 0 -> forget gate is an exact no-op).
    lstm_in = jnp.concatenate([q_t, h0], axis=-1).astype(jnp.bfloat16)
    gates = (jnp.dot(lstm_in, wlstm_ref[...],
                     preferred_element_type=jnp.float32) + blstm_ref[...])
    i_g = jax.nn.sigmoid(gates[:, :HP])
    g_g = jnp.tanh(gates[:, HP:2 * HP])
    o_g = jax.nn.sigmoid(gates[:, 2 * HP:])
    h = o_g * jnp.tanh(i_g * g_g)                       # [BH, HP] f32

    # Attention over the selected speaker's memory rows (VPU/XLU, exact softmax).
    scores = jnp.sum(h[:, None, :] * mem, axis=-1) + attn_mask    # [BH, R2]
    scores = scores - jnp.max(scores, axis=-1, keepdims=True)
    e = jnp.exp(scores)
    attn = e / jnp.sum(e, axis=-1, keepdims=True)
    x = jnp.sum(attn[:, :, None] * mem, axis=1)         # [BH, HP]

    # out_put_reason = fc1(cat([x, q_t]))
    fc1_in = jnp.concatenate([x, q_t], axis=-1).astype(jnp.bfloat16)
    opr = (jnp.dot(fc1_in, wfc1_ref[...],
                   preferred_element_type=jnp.float32) + bfc1_ref[...])

    # Gated speaker-memory update: fc(opr) + fc(mem_row) == (opr+mem_row)@W + 2b.
    p12 = (jnp.dot((opr + mem_row).astype(jnp.bfloat16), fcw_ref[...],
                   preferred_element_type=jnp.float32) + fcb2_ref[...])
    qsu = jnp.tanh(p12) * mem_row                       # [BH, HP]
    oh = onehot[:, :, None]                             # 1.0 only at update row
    mem_ref[...] = mem * (1.0 - oh) + qsu[:, None, :] * oh

    # Classifier: ReLU -> smax_fc (rows stacked [speaker | feature]) ->
    # log_softmax (padded classes carry a -1e30 bias -> exp underflows to 0).
    cls_in = jnp.concatenate(
        [jnp.maximum(opr, 0.0), jnp.maximum(feat, 0.0)],
        axis=-1).astype(jnp.bfloat16)                   # [BH, 3*HP]
    logits = (jnp.dot(cls_in, wcls_ref[...],
                      preferred_element_type=jnp.float32) + bcls_ref[...])
    m = jnp.max(logits, axis=-1, keepdims=True)
    lse = jnp.log(jnp.sum(jnp.exp(logits - m), axis=-1, keepdims=True)) + m
    logp_ref[0] = logits - lse


def _fused_forward(bank, aux, mem_init, p, max_len, bh, ncores):
    def _const(shape):
        nd = len(shape)
        return pl.BlockSpec(shape, lambda c, j, _n=nd: (0,) * _n)

    grid_spec = pltpu.PrefetchScalarGridSpec(
        num_scalar_prefetch=0,
        grid=(ncores, max_len),
        in_specs=[
            pl.BlockSpec((1, bh, HP), lambda c, j: (j, c, 0)),        # bank
            pl.BlockSpec((1, 3, bh, R2), lambda c, j: (j, 0, c, 0)),  # aux pack
            pl.BlockSpec((bh, R2, HP), lambda c, j: (c, 0, 0)),       # mem init
            _const((HP, 3 * HP)), _const((1, 3 * HP)),                # [fcw|wq]
            _const((HP, HP)), _const((1, HP)),                        # fcw, 2*fcb
            _const((2 * HP, 3 * HP)), _const((1, 3 * HP)),            # LSTM
            _const((2 * HP, HP)), _const((1, HP)),                    # fc1
            _const((3 * HP, CLSP)), _const((1, CLSP)),                # smax_fc
        ],
        out_specs=pl.BlockSpec((1, bh, CLSP), lambda c, j: (j, c, 0)),
        # Constant-index weight blocks are double-buffered by default; the 2x
        # cost (~3.5 MiB bf16) is consciously accepted — far below VMEM limits.
        scratch_shapes=[pltpu.VMEM((bh, R2, HP), jnp.float32)],
    )
    return pl.pallas_call(
        _fused_forward_kernel,
        out_shape=jax.ShapeDtypeStruct((max_len, bh * ncores, CLSP), jnp.float32),
        grid_spec=grid_spec,
        compiler_params=pltpu.CompilerParams(
            dimension_semantics=("parallel", "arbitrary")),
    )(bank, aux, mem_init,
      p["w_bank"], p["b_bank"], p["fcw"], p["fcb2"],
      p["w_lstm"], p["b_lstm"], p["w_fc1"], p["b_fc1"],
      p["w_cls"], p["b_cls"])


# ----------------------------------------------------------------------------
# Host-side parameter fusion / lane padding (done once).  Weights -> bf16,
# biases stay f32 (added to f32 accumulators).
# ----------------------------------------------------------------------------
def prepare_params(params):
    f = N_FEATURES
    bf = jnp.bfloat16

    def pad_np(w, rows, cols):
        out = np.zeros((rows, cols), np.float32)
        a = np.asarray(w, np.float32)
        out[:a.shape[0], :a.shape[1]] = a
        return out

    # fused bank weight: columns [ fc | q_fc ]
    w_bank = np.zeros((HP, 3 * HP), np.float32)
    w_bank[:, :HP] = pad_np(params["fcw"], HP, HP)
    w_bank[:, HP:] = pad_np(params["wq"], HP, 2 * HP)
    b_bank = np.zeros((1, 3 * HP), np.float32)
    b_bank[:, :HP] = pad_np(params["fcb"], 1, HP)
    b_bank[:, HP:] = pad_np(params["bq"], 1, 2 * HP)

    # fused LSTM gates: rows [ q_t-part ; h0-part ], columns [ i | g | o ]
    w_lstm = np.zeros((2 * HP, 3 * HP), np.float32)
    b_lstm = np.zeros((1, 3 * HP), np.float32)
    for g, (kx, kh, kb) in enumerate((("wii", "whi", "bi"),
                                      ("wig", "whg", "bg"),
                                      ("wio", "who", "bo"))):
        w_lstm[:f, g * HP:g * HP + f] = np.asarray(params[kx], np.float32)
        w_lstm[HP:HP + f, g * HP:g * HP + f] = np.asarray(params[kh], np.float32)
        b_lstm[:, g * HP:g * HP + f] = np.asarray(params[kb], np.float32)

    # fused fc1: rows [ x-part ; q_t-part ]
    w_fc1 = np.zeros((2 * HP, HP), np.float32)
    w_fc1[:HP] = pad_np(params["fc1wx"], HP, HP)
    w_fc1[HP:] = pad_np(params["fc1wq"], HP, HP)

    # fused classifier: rows [ speaker(opr) ; feature(feat) ]
    wc = np.asarray(params["wc"], np.float32)          # [3f, 7]
    w_cls = np.zeros((3 * HP, CLSP), np.float32)
    w_cls[:f, :N_CLASSES] = wc[:f]
    w_cls[HP:HP + 2 * f, :N_CLASSES] = wc[f:]
    b_cls = np.full((1, CLSP), NEG_INF, np.float32)    # padded classes -> -inf
    b_cls[:, :N_CLASSES] = np.asarray(params["bc"], np.float32)

    return {
        "w_bank": jnp.asarray(w_bank, bf), "b_bank": jnp.asarray(b_bank),
        "fcw": jnp.asarray(pad_np(params["fcw"], HP, HP), bf),
        "fcb2": jnp.asarray(2.0 * pad_np(params["fcb"], 1, HP)),
        "w_lstm": jnp.asarray(w_lstm, bf), "b_lstm": jnp.asarray(b_lstm),
        "w_fc1": jnp.asarray(w_fc1, bf),
        "b_fc1": jnp.asarray(pad_np(params["fc1b"], 1, HP)),
        "w_cls": jnp.asarray(w_cls, bf), "b_cls": jnp.asarray(b_cls),
    }


# ----------------------------------------------------------------------------
# Forward pass: one-time host packing (plain numpy) + one pallas_call + gather
# ----------------------------------------------------------------------------
def cognition_network_forward(U_s, U_p, seq_lengths, speaker_cos_index,
                              speaker_local_index, params_p):
    del U_p  # bank_p_ only feeds m_fc2, which never reaches the output.
    U_s_np = np.asarray(U_s, np.float32)
    f = U_s_np.shape[2]
    batch = U_s_np.shape[1]
    max_len = int(max(seq_lengths))

    # Pad conversations to 8*NCORES rows so each core's slab is sublane-aligned.
    bh = 8 * max(1, -(-batch // (8 * NCORES)))
    bp = bh * NCORES

    bank_np = np.zeros((max_len, bp, HP), np.float32)
    aux_np = np.zeros((max_len, 3, bp, R2), np.float32)
    mem_init_np = np.zeros((bp, R2, HP), np.float32)

    # Host-side speaker bookkeeping replicates the reference torch.mean(...)
    # identity test (exact float equality on identical tensors); padded slots
    # get all-zero aux rows -> no memory update, finite (discarded) outputs.
    for i in range(batch):
        L = int(seq_lengths[i])
        bank_np[:L, i, :f] = U_s_np[:L, i, :]

        mem0 = np.asarray(speaker_local_index[i][0], np.float32)
        mean_a = float(mem0.mean())
        mem1 = None
        counts = [0, 0]
        n_utt = len(speaker_cos_index[i])
        for j in range(n_utt):
            slj = np.asarray(speaker_local_index[i][j], np.float32)
            spk = 0 if float(slj.mean()) == mean_a else 1
            if spk == 1 and mem1 is None:
                mem1 = slj                    # first appearance of speaker B
            upd = counts[spk]
            counts[spk] += 1
            nrows = mem0.shape[0] if spk == 0 else mem1.shape[0]
            assert nrows <= MAXR and upd < nrows
            cw = np.asarray(speaker_cos_index[i][j], np.float32).reshape(-1)
            base = spk * MAXR
            aux_np[j, AUX_COS, i, base:base + cw.shape[0]] = cw
            aux_np[j, AUX_UPD, i, base + upd] = 1.0
            aux_np[j, AUX_MASK, i, :] = NEG_INF
            aux_np[j, AUX_MASK, i, base:base + nrows] = 0.0

        mem_init_np[i, :mem0.shape[0], :f] = mem0
        if mem1 is not None:
            mem_init_np[i, MAXR:MAXR + mem1.shape[0], :f] = mem1

    logp = _fused_forward(jnp.asarray(bank_np), jnp.asarray(aux_np),
                          jnp.asarray(mem_init_np), params_p,
                          max_len, bh, NCORES)           # [max_len, bp, CLSP]

    # Ragged re-pack with a single gather (matches the reference concat order).
    idx = np.concatenate([np.arange(int(L)) * bp + i
                          for i, L in enumerate(seq_lengths)]).astype(np.int32)
    flat = logp.reshape(max_len * bp, CLSP)
    return jnp.take(flat, jnp.asarray(idx), axis=0)[:, :N_CLASSES]   # [sum(L), 7]


# ----------------------------------------------------------------------------
# Deterministic parameter / input construction + smoke test
# ----------------------------------------------------------------------------
def init_params(key):
    f = N_FEATURES
    ks = jax.random.split(key, 24)

    def init(k, shape, scale=0.05):
        return jax.random.normal(k, shape, dtype=jnp.float32) * scale

    return {
        # q_fc : 200 -> 400  (stored as [in, out])
        "wq": init(ks[0], (f, 2 * f)), "bq": init(ks[1], (1, 2 * f)),
        # smax_fc : 600 -> 7
        "wc": init(ks[2], (3 * f, N_CLASSES)), "bc": init(ks[3], (1, N_CLASSES)),
        # SpeakerReasonModule.fc : 200 -> 200
        "fcw": init(ks[4], (f, f)), "fcb": init(ks[5], (1, f)),
        # SpeakerReasonModule.fc1 : 400 -> 200  (pre-split into [x | q_t] halves)
        "fc1wx": init(ks[6], (f, f)), "fc1wq": init(ks[7], (f, f)),
        "fc1b": init(ks[8], (1, f)),
        # SpeakerReasonModule.lstm (input 200, hidden 200), per-gate weights;
        # forget-gate params omitted (c0 == 0, single step -> exact no-op).
        "wii": init(ks[9], (f, f)), "whi": init(ks[10], (f, f)), "bi": init(ks[11], (1, f)),
        "wig": init(ks[12], (f, f)), "whg": init(ks[13], (f, f)), "bg": init(ks[14], (1, f)),
        "wio": init(ks[15], (f, f)), "who": init(ks[16], (f, f)), "bo": init(ks[17], (1, f)),
    }


if __name__ == "__main__":
    f = N_FEATURES
    batch = 2
    seq_lengths = [4, 3]
    max_seq = max(seq_lengths)

    key = jax.random.PRNGKey(0)
    kp, kin = jax.random.split(key)
    params = prepare_params(init_params(kp))

    ks = jax.random.split(kin, 16)
    U_s = jax.random.normal(ks[0], (max_seq, batch, f), dtype=jnp.float32)
    U_p = jax.random.normal(ks[1], (max_seq, batch, f), dtype=jnp.float32)

    # conversation 0: speakers A,B,A,B ; conversation 1: speakers A,A,B
    mem_a0 = jax.random.normal(ks[2], (2, f), dtype=jnp.float32)
    mem_b0 = jax.random.normal(ks[3], (2, f), dtype=jnp.float32)
    mem_a1 = jax.random.normal(ks[4], (2, f), dtype=jnp.float32)
    mem_b1 = jax.random.normal(ks[5], (1, f), dtype=jnp.float32)
    speaker_local_index = [
        [mem_a0, mem_b0, mem_a0, mem_b0],
        [mem_a1, mem_a1, mem_b1],
    ]

    def cosv(k, m):
        return jax.nn.softmax(
            jax.random.normal(k, (1, m), dtype=jnp.float32), axis=-1)

    speaker_cos_index = [
        [cosv(ks[6], 2), cosv(ks[7], 2), cosv(ks[8], 2), cosv(ks[9], 2)],
        [cosv(ks[10], 2), cosv(ks[11], 2), cosv(ks[12], 1)],
    ]

    out = cognition_network_forward(
        U_s, U_p, seq_lengths, speaker_cos_index, speaker_local_index, params)
    out = jax.block_until_ready(out)
    assert out.shape == (sum(seq_lengths), N_CLASSES), out.shape
    assert bool(jnp.all(jnp.isfinite(out)))
    print("KERNEL_OK")
</pallas_src>

<mosaic_0001>
module attributes {stable_mosaic.version = 11 : i64} {
  func.func @_fused_forward_kernel(%arg0: i32, %arg1: i32, %arg2: memref<1x8x256xf32, #tpu.memory_space<vmem>>, %arg3: memref<1x3x8x16xf32, #tpu.memory_space<vmem>>, %arg4: memref<8x16x256xf32, #tpu.memory_space<vmem>>, %arg5: memref<256x768xbf16, #tpu.memory_space<vmem>>, %arg6: memref<1x768xf32, #tpu.memory_space<vmem>>, %arg7: memref<256x256xbf16, #tpu.memory_space<vmem>>, %arg8: memref<1x256xf32, #tpu.memory_space<vmem>>, %arg9: memref<512x768xbf16, #tpu.memory_space<vmem>>, %arg10: memref<1x768xf32, #tpu.memory_space<vmem>>, %arg11: memref<512x256xbf16, #tpu.memory_space<vmem>>, %arg12: memref<1x256xf32, #tpu.memory_space<vmem>>, %arg13: memref<768x128xbf16, #tpu.memory_space<vmem>>, %arg14: memref<1x128xf32, #tpu.memory_space<vmem>>, %arg15: memref<1x8x128xf32, #tpu.memory_space<vmem>>, %arg16: memref<8x16x256xf32, #tpu.memory_space<vmem>>) attributes {dimension_semantics = [#tpu.dimension_semantics<parallel>, #tpu.dimension_semantics<arbitrary>], iteration_bounds = array<i64: 2, 4>, scalar_prefetch = 0 : i64, scratch_operands = 1 : i64, tpu.core_type = #tpu.core_type<tc>, window_params = [{transform_indices = @transform_0, window_bounds = array<i64: 1, 8, 256>}, {transform_indices = @transform_1, window_bounds = array<i64: 1, 3, 8, 16>}, {transform_indices = @transform_2, window_bounds = array<i64: 8, 16, 256>}, {pipeline_mode = #tpu.pipeline_mode<synchronous>, transform_indices = @transform_3, window_bounds = array<i64: 256, 768>}, {pipeline_mode = #tpu.pipeline_mode<synchronous>, transform_indices = @transform_4, window_bounds = array<i64: 1, 768>}, {pipeline_mode = #tpu.pipeline_mode<synchronous>, transform_indices = @transform_5, window_bounds = array<i64: 256, 256>}, {pipeline_mode = #tpu.pipeline_mode<synchronous>, transform_indices = @transform_6, window_bounds = array<i64: 1, 256>}, {pipeline_mode = #tpu.pipeline_mode<synchronous>, transform_indices = @transform_7, window_bounds = array<i64: 512, 768>}, {pipeline_mode = #tpu.pipeline_mode<synchronous>, transform_indices = @transform_8, window_bounds = array<i64: 1, 768>}, {pipeline_mode = #tpu.pipeline_mode<synchronous>, transform_indices = @transform_9, window_bounds = array<i64: 512, 256>}, {pipeline_mode = #tpu.pipeline_mode<synchronous>, transform_indices = @transform_10, window_bounds = array<i64: 1, 256>}, {pipeline_mode = #tpu.pipeline_mode<synchronous>, transform_indices = @transform_11, window_bounds = array<i64: 768, 128>}, {pipeline_mode = #tpu.pipeline_mode<synchronous>, transform_indices = @transform_12, window_bounds = array<i64: 1, 128>}, {transform_indices = @transform_13, window_bounds = array<i64: 1, 8, 128>}]} {
    %c0_i32 = arith.constant 0 : i32
    %0 = arith.cmpi eq, %arg1, %c0_i32 : i32
    %1 = arith.extui %0 : i1 to i32
    %c0_i32_0 = arith.constant 0 : i32
    %2 = arith.cmpi ne, %1, %c0_i32_0 : i32
    scf.if %2 {
      %c0_59 = arith.constant 0 : index
      %c0_60 = arith.constant 0 : index
      %c0_61 = arith.constant 0 : index
      %122 = vector.load %arg4[%c0_59, %c0_60, %c0_61] : memref<8x16x256xf32, #tpu.memory_space<vmem>>, vector<8x16x256xf32>
      %c0_62 = arith.constant 0 : index
      %c0_63 = arith.constant 0 : index
      %c0_64 = arith.constant 0 : index
      %123 = vector.load %arg16[%c0_62, %c0_63, %c0_64] : memref<8x16x256xf32, #tpu.memory_space<vmem>>, vector<8x16x256xf32>
      tpu.vector_store %arg16[%c0_62, %c0_63, %c0_64], %122 {strides = array<i32>} : memref<8x16x256xf32, #tpu.memory_space<vmem>>, vector<8x16x256xf32>,
    } else {
    }
    %c0 = arith.constant 0 : index
    %c0_1 = arith.constant 0 : index
    %c0_2 = arith.constant 0 : index
    %3 = vector.load %arg16[%c0, %c0_1, %c0_2] : memref<8x16x256xf32, #tpu.memory_space<vmem>>, vector<8x16x256xf32>
    %c0_3 = arith.constant 0 : index
    %c0_4 = arith.constant 0 : index
    %c0_5 = arith.constant 0 : index
    %4 = vector.load %arg2[%c0_3, %c0_4, %c0_5] : memref<1x8x256xf32, #tpu.memory_space<vmem>>, vector<1x8x256xf32>
    %5 = vector.shape_cast %4 : vector<1x8x256xf32> to vector<8x256xf32>
    %6 = arith.truncf %5 : vector<8x256xf32> to vector<8x256xbf16>
    %c0_6 = arith.constant 0 : index
    %c0_7 = arith.constant 0 : index
    %c0_8 = arith.constant 0 : index
    %c0_9 = arith.constant 0 : index
    %7 = vector.load %arg3[%c0_6, %c0_7, %c0_8, %c0_9] : memref<1x3x8x16xf32, #tpu.memory_space<vmem>>, vector<1x1x8x16xf32>
    %8 = vector.shape_cast %7 : vector<1x1x8x16xf32> to vector<8x16xf32>
    %c0_10 = arith.constant 0 : index
    %c1 = arith.constant 1 : index
    %c0_11 = arith.constant 0 : index
    %c0_12 = arith.constant 0 : index
    %9 = vector.load %arg3[%c0_10, %c1, %c0_11, %c0_12] : memref<1x3x8x16xf32, #tpu.memory_space<vmem>>, vector<1x1x8x16xf32>
    %10 = vector.shape_cast %9 : vector<1x1x8x16xf32> to vector<8x16xf32>
    %c0_13 = arith.constant 0 : index
    %c2 = arith.constant 2 : index
    %c0_14 = arith.constant 0 : index
    %c0_15 = arith.constant 0 : index
    %11 = vector.load %arg3[%c0_13, %c2, %c0_14, %c0_15] : memref<1x3x8x16xf32, #tpu.memory_space<vmem>>, vector<1x1x8x16xf32>
    %12 = vector.shape_cast %11 : vector<1x1x8x16xf32> to vector<8x16xf32>
    %c0_16 = arith.constant 0 : index
    %c0_17 = arith.constant 0 : index
    %13 = vector.load %arg5[%c0_16, %c0_17] : memref<256x768xbf16, #tpu.memory_space<vmem>>, vector<256x768xbf16>
    %cst = arith.constant dense<0.000000e+00> : vector<8x768xf32>
    %14 = tpu.matmul %6, %13, %cst {dimension_numbers = #tpu.dot_dimension_numbers<[1], [0], [0], [1], [0, 0, 1, 1], [], []>} : vector<8x256xbf16>, vector<256x768xbf16>, vector<8x768xf32> -> vector<8x768xf32>
    %c0_18 = arith.constant 0 : index
    %c0_19 = arith.constant 0 : index
    %15 = vector.load %arg6[%c0_18, %c0_19] : memref<1x768xf32, #tpu.memory_space<vmem>>, vector<1x768xf32>
    %16 = vector.broadcast %15 : vector<1x768xf32> to vector<8x768xf32>
    %17 = arith.addf %14, %16 : vector<8x768xf32>
    %18 = vector.extract_strided_slice %17 {offsets = [0, 0], sizes = [8, 256], strides = [1, 1]} : vector<8x768xf32> to vector<8x256xf32>
    %19 = vector.extract_strided_slice %17 {offsets = [0, 256], sizes = [8, 512], strides = [1, 1]} : vector<8x768xf32> to vector<8x512xf32>
    %20 = vector.shape_cast %8 : vector<8x16xf32> to vector<8x16x1xf32>
    %21 = vector.broadcast %20 : vector<8x16x1xf32> to vector<8x16x256xf32>
    %22 = arith.mulf %21, %3 : vector<8x16x256xf32>
    %cst_20 = arith.constant dense<0.000000e+00> : vector<8x256xf32>
    %23 = vector.multi_reduction <add>, %22, %cst_20 [1] : vector<8x16x256xf32> to vector<8x256xf32>
    %24 = vector.shape_cast %10 : vector<8x16xf32> to vector<8x16x1xf32>
    %25 = vector.broadcast %24 : vector<8x16x1xf32> to vector<8x16x256xf32>
    %26 = arith.mulf %25, %3 : vector<8x16x256xf32>
    %cst_21 = arith.constant dense<0.000000e+00> : vector<8x256xf32>
    %27 = vector.multi_reduction <add>, %26, %cst_21 [1] : vector<8x16x256xf32> to vector<8x256xf32>
    %28 = tpu.concatenate %18, %23 in 1 : vector<8x256xf32>, vector<8x256xf32> -> vector<8x512xf32>
    %29 = arith.truncf %28 : vector<8x512xf32> to vector<8x512xbf16>
    %c0_22 = arith.constant 0 : index
    %c0_23 = arith.constant 0 : index
    %30 = vector.load %arg9[%c0_22, %c0_23] : memref<512x768xbf16, #tpu.memory_space<vmem>>, vector<512x768xbf16>
    %cst_24 = arith.constant dense<0.000000e+00> : vector<8x768xf32>
    %31 = tpu.matmul %29, %30, %cst_24 {dimension_numbers = #tpu.dot_dimension_numbers<[1], [0], [0], [1], [0, 0, 1, 1], [], []>} : vector<8x512xbf16>, vector<512x768xbf16>, vector<8x768xf32> -> vector<8x768xf32>
    %c0_25 = arith.constant 0 : index
    %c0_26 = arith.constant 0 : index
    %32 = vector.load %arg10[%c0_25, %c0_26] : memref<1x768xf32, #tpu.memory_space<vmem>>, vector<1x768xf32>
    %33 = vector.broadcast %32 : vector<1x768xf32> to vector<8x768xf32>
    %34 = arith.addf %31, %33 : vector<8x768xf32>
    %35 = vector.extract_strided_slice %34 {offsets = [0, 0], sizes = [8, 256], strides = [1, 1]} : vector<8x768xf32> to vector<8x256xf32>
    %36 = arith.negf %35 : vector<8x256xf32>
    %37 = math.exp %36 : vector<8x256xf32>
    %cst_27 = arith.constant 1.000000e+00 : f32
    %38 = vector.broadcast %cst_27 : f32 to vector<8x256xf32>
    %39 = arith.addf %38, %37 : vector<8x256xf32>
    %40 = arith.divf %38, %39 : vector<8x256xf32>
    %41 = vector.extract_strided_slice %34 {offsets = [0, 256], sizes = [8, 256], strides = [1, 1]} : vector<8x768xf32> to vector<8x256xf32>
    %42 = math.tanh %41 : vector<8x256xf32>
    %43 = vector.extract_strided_slice %34 {offsets = [0, 512], sizes = [8, 256], strides = [1, 1]} : vector<8x768xf32> to vector<8x256xf32>
    %44 = arith.negf %43 : vector<8x256xf32>
    %45 = math.exp %44 : vector<8x256xf32>
    %cst_28 = arith.constant 1.000000e+00 : f32
    %46 = vector.broadcast %cst_28 : f32 to vector<8x256xf32>
    %47 = arith.addf %46, %45 : vector<8x256xf32>
    %48 = arith.divf %46, %47 : vector<8x256xf32>
    %49 = arith.mulf %40, %42 : vector<8x256xf32>
    %50 = math.tanh %49 : vector<8x256xf32>
    %51 = arith.mulf %48, %50 : vector<8x256xf32>
    %52 = vector.shape_cast %51 : vector<8x256xf32> to vector<8x1x256xf32>
    %53 = vector.broadcast %52 : vector<8x1x256xf32> to vector<8x16x256xf32>
    %54 = arith.mulf %53, %3 : vector<8x16x256xf32>
    %cst_29 = arith.constant dense<0.000000e+00> : vector<8x16xf32>
    %55 = vector.multi_reduction <add>, %54, %cst_29 [2] : vector<8x16x256xf32> to vector<8x16xf32>
    %56 = arith.addf %55, %12 : vector<8x16xf32>
    %cst_30 = arith.constant dense<0xFF800000> : vector<8xf32>
    %57 = vector.multi_reduction <maximumf>, %56, %cst_30 [1] : vector<8x16xf32> to vector<8xf32>
    %58 = vector.shape_cast %57 : vector<8xf32> to vector<8x1xf32>
    %59 = vector.broadcast %58 : vector<8x1xf32> to vector<8x16xf32>
    %60 = arith.subf %56, %59 : vector<8x16xf32>
    %61 = math.exp %60 : vector<8x16xf32>
    %cst_31 = arith.constant dense<0.000000e+00> : vector<8xf32>
    %62 = vector.multi_reduction <add>, %61, %cst_31 [1] : vector<8x16xf32> to vector<8xf32>
    %63 = vector.shape_cast %62 : vector<8xf32> to vector<8x1xf32>
    %64 = vector.broadcast %63 : vector<8x1xf32> to vector<8x16xf32>
    %65 = arith.divf %61, %64 : vector<8x16xf32>
    %66 = vector.shape_cast %65 : vector<8x16xf32> to vector<8x16x1xf32>
    %67 = vector.broadcast %66 : vector<8x16x1xf32> to vector<8x16x256xf32>
    %68 = arith.mulf %67, %3 : vector<8x16x256xf32>
    %cst_32 = arith.constant dense<0.000000e+00> : vector<8x256xf32>
    %69 = vector.multi_reduction <add>, %68, %cst_32 [1] : vector<8x16x256xf32> to vector<8x256xf32>
    %70 = tpu.concatenate %69, %18 in 1 : vector<8x256xf32>, vector<8x256xf32> -> vector<8x512xf32>
    %71 = arith.truncf %70 : vector<8x512xf32> to vector<8x512xbf16>
    %c0_33 = arith.constant 0 : index
    %c0_34 = arith.constant 0 : index
    %72 = vector.load %arg11[%c0_33, %c0_34] : memref<512x256xbf16, #tpu.memory_space<vmem>>, vector<512x256xbf16>
    %cst_35 = arith.constant dense<0.000000e+00> : vector<8x256xf32>
    %73 = tpu.matmul %71, %72, %cst_35 {dimension_numbers = #tpu.dot_dimension_numbers<[1], [0], [0], [1], [0, 0, 1, 1], [], []>} : vector<8x512xbf16>, vector<512x256xbf16>, vector<8x256xf32> -> vector<8x256xf32>
    %c0_36 = arith.constant 0 : index
    %c0_37 = arith.constant 0 : index
    %74 = vector.load %arg12[%c0_36, %c0_37] : memref<1x256xf32, #tpu.memory_space<vmem>>, vector<1x256xf32>
    %75 = vector.broadcast %74 : vector<1x256xf32> to vector<8x256xf32>
    %76 = arith.addf %73, %75 : vector<8x256xf32>
    %77 = arith.addf %76, %27 : vector<8x256xf32>
    %78 = arith.truncf %77 : vector<8x256xf32> to vector<8x256xbf16>
    %c0_38 = arith.constant 0 : index
    %c0_39 = arith.constant 0 : index
    %79 = vector.load %arg7[%c0_38, %c0_39] : memref<256x256xbf16, #tpu.memory_space<vmem>>, vector<256x256xbf16>
    %cst_40 = arith.constant dense<0.000000e+00> : vector<8x256xf32>
    %80 = tpu.matmul %78, %79, %cst_40 {dimension_numbers = #tpu.dot_dimension_numbers<[1], [0], [0], [1], [0, 0, 1, 1], [], []>} : vector<8x256xbf16>, vector<256x256xbf16>, vector<8x256xf32> -> vector<8x256xf32>
    %c0_41 = arith.constant 0 : index
    %c0_42 = arith.constant 0 : index
    %81 = vector.load %arg8[%c0_41, %c0_42] : memref<1x256xf32, #tpu.memory_space<vmem>>, vector<1x256xf32>
    %82 = vector.broadcast %81 : vector<1x256xf32> to vector<8x256xf32>
    %83 = arith.addf %80, %82 : vector<8x256xf32>
    %84 = math.tanh %83 : vector<8x256xf32>
    %85 = arith.mulf %84, %27 : vector<8x256xf32>
    %86 = vector.shape_cast %10 : vector<8x16xf32> to vector<8x16x1xf32>
    %cst_43 = arith.constant 1.000000e+00 : f32
    %87 = vector.broadcast %cst_43 : f32 to vector<8x16x1xf32>
    %88 = arith.subf %87, %86 : vector<8x16x1xf32>
    %89 = vector.broadcast %88 : vector<8x16x1xf32> to vector<8x16x256xf32>
    %90 = arith.mulf %3, %89 : vector<8x16x256xf32>
    %91 = vector.shape_cast %85 : vector<8x256xf32> to vector<8x1x256xf32>
    %92 = vector.broadcast %91 : vector<8x1x256xf32> to vector<8x16x256xf32>
    %93 = vector.broadcast %86 : vector<8x16x1xf32> to vector<8x16x256xf32>
    %94 = arith.mulf %92, %93 : vector<8x16x256xf32>
    %95 = arith.addf %90, %94 : vector<8x16x256xf32>
    %c0_44 = arith.constant 0 : index
    %c0_45 = arith.constant 0 : index
    %c0_46 = arith.constant 0 : index
    %96 = vector.load %arg16[%c0_44, %c0_45, %c0_46] : memref<8x16x256xf32, #tpu.memory_space<vmem>>, vector<8x16x256xf32>
    tpu.vector_store %arg16[%c0_44, %c0_45, %c0_46], %95 {strides = array<i32>} : memref<8x16x256xf32, #tpu.memory_space<vmem>>, vector<8x16x256xf32>,
    %cst_47 = arith.constant 0.000000e+00 : f32
    %97 = vector.broadcast %cst_47 : f32 to vector<8x256xf32>
    %98 = arith.maximumf %76, %97 : vector<8x256xf32>
    %cst_48 = arith.constant 0.000000e+00 : f32
    %99 = vector.broadcast %cst_48 : f32 to vector<8x512xf32>
    %100 = arith.maximumf %19, %99 : vector<8x512xf32>
    %101 = tpu.concatenate %98, %100 in 1 : vector<8x256xf32>, vector<8x512xf32> -> vector<8x768xf32>
    %102 = arith.truncf %101 : vector<8x768xf32> to vector<8x768xbf16>
    %c0_49 = arith.constant 0 : index
    %c0_50 = arith.constant 0 : index
    %103 = vector.load %arg13[%c0_49, %c0_50] : memref<768x128xbf16, #tpu.memory_space<vmem>>, vector<768x128xbf16>
    %cst_51 = arith.constant dense<0.000000e+00> : vector<8x128xf32>
    %104 = tpu.matmul %102, %103, %cst_51 {dimension_numbers = #tpu.dot_dimension_numbers<[1], [0], [0], [1], [0, 0, 1, 1], [], []>} : vector<8x768xbf16>, vector<768x128xbf16>, vector<8x128xf32> -> vector<8x128xf32>
    %c0_52 = arith.constant 0 : index
    %c0_53 = arith.constant 0 : index
    %105 = vector.load %arg14[%c0_52, %c0_53] : memref<1x128xf32, #tpu.memory_space<vmem>>, vector<1x128xf32>
    %106 = vector.broadcast %105 : vector<1x128xf32> to vector<8x128xf32>
    %107 = arith.addf %104, %106 : vector<8x128xf32>
    %cst_54 = arith.constant dense<0xFF800000> : vector<8xf32>
    %108 = vector.multi_reduction <maximumf>, %107, %cst_54 [1] : vector<8x128xf32> to vector<8xf32>
    %109 = vector.shape_cast %108 : vector<8xf32> to vector<8x1xf32>
    %110 = vector.broadcast %109 : vector<8x1xf32> to vector<8x128xf32>
    %111 = arith.subf %107, %110 : vector<8x128xf32>
    %112 = math.exp %111 : vector<8x128xf32>
    %cst_55 = arith.constant dense<0.000000e+00> : vector<8xf32>
    %113 = vector.multi_reduction <add>, %112, %cst_55 [1] : vector<8x128xf32> to vector<8xf32>
    %114 = vector.shape_cast %113 : vector<8xf32> to vector<8x1xf32>
    %115 = math.log %114 : vector<8x1xf32>
    %116 = arith.addf %115, %109 : vector<8x1xf32>
    %117 = vector.broadcast %116 : vector<8x1xf32> to vector<8x128xf32>
    %118 = arith.subf %107, %117 : vector<8x128xf32>
    %c0_56 = arith.constant 0 : index
    %c0_57 = arith.constant 0 : index
    %c0_58 = arith.constant 0 : index
    %119 = vector.load %arg15[%c0_56, %c0_57, %c0_58] : memref<1x8x128xf32, #tpu.memory_space<vmem>>, vector<1x8x128xf32>
    %120 = vector.shape_cast %119 : vector<1x8x128xf32> to vector<8x128xf32>
    %121 = vector.shape_cast %118 : vector<8x128xf32> to vector<1x8x128xf32>
    tpu.vector_store %arg15[%c0_56, %c0_57, %c0_58], %121 {strides = array<i32>} : memref<1x8x128xf32, #tpu.memory_space<vmem>>, vector<1x8x128xf32>,
    return
  }
  func.func @transform_0(%arg0: i32, %arg1: i32) -> (i32, i32, i32) {
    %c0_i32 = arith.constant 0 : i32
    %c0_i32_0 = arith.constant 0 : i32
    return %arg1, %arg0, %c0_i32 : i32, i32, i32
  }
  func.func @transform_1(%arg0: i32, %arg1: i32) -> (i32, i32, i32, i32) {
    %c0_i32 = arith.constant 0 : i32
    %c0_i32_0 = arith.constant 0 : i32
    %c0_i32_1 = arith.constant 0 : i32
    return %arg1, %c0_i32, %arg0, %c0_i32_0 : i32, i32, i32, i32
  }
  func.func @transform_2(%arg0: i32, %arg1: i32) -> (i32, i32, i32) {
    %c0_i32 = arith.constant 0 : i32
    %c0_i32_0 = arith.constant 0 : i32
    %c0_i32_1 = arith.constant 0 : i32
    return %arg0, %c0_i32, %c0_i32_0 : i32, i32, i32
  }
  func.func @transform_3(%arg0: i32, %arg1: i32) -> (i32, i32) {
    %c0_i32 = arith.constant 0 : i32
    %c0_i32_0 = arith.constant 0 : i32
    %c0_i32_1 = arith.constant 0 : i32
    return %c0_i32, %c0_i32_0 : i32, i32
  }
  func.func @transform_4(%arg0: i32, %arg1: i32) -> (i32, i32) {
    %c0_i32 = arith.constant 0 : i32
    %c0_i32_0 = arith.constant 0 : i32
    %c0_i32_1 = arith.constant 0 : i32
    return %c0_i32, %c0_i32_0 : i32, i32
  }
  func.func @transform_5(%arg0: i32, %arg1: i32) -> (i32, i32) {
    %c0_i32 = arith.constant 0 : i32
    %c0_i32_0 = arith.constant 0 : i32
    %c0_i32_1 = arith.constant 0 : i32
    return %c0_i32, %c0_i32_0 : i32, i32
  }
  func.func @transform_6(%arg0: i32, %arg1: i32) -> (i32, i32) {
    %c0_i32 = arith.constant 0 : i32
    %c0_i32_0 = arith.constant 0 : i32
    %c0_i32_1 = arith.constant 0 : i32
    return %c0_i32, %c0_i32_0 : i32, i32
  }
  func.func @transform_7(%arg0: i32, %arg1: i32) -> (i32, i32) {
    %c0_i32 = arith.constant 0 : i32
    %c0_i32_0 = arith.constant 0 : i32
    %c0_i32_1 = arith.constant 0 : i32
    return %c0_i32, %c0_i32_0 : i32, i32
  }
  func.func @transform_8(%arg0: i32, %arg1: i32) -> (i32, i32) {
    %c0_i32 = arith.constant 0 : i32
    %c0_i32_0 = arith.constant 0 : i32
    %c0_i32_1 = arith.constant 0 : i32
    return %c0_i32, %c0_i32_0 : i32, i32
  }
  func.func @transform_9(%arg0: i32, %arg1: i32) -> (i32, i32) {
    %c0_i32 = arith.constant 0 : i32
    %c0_i32_0 = arith.constant 0 : i32
    %c0_i32_1 = arith.constant 0 : i32
    return %c0_i32, %c0_i32_0 : i32, i32
  }
  func.func @transform_10(%arg0: i32, %arg1: i32) -> (i32, i32) {
    %c0_i32 = arith.constant 0 : i32
    %c0_i32_0 = arith.constant 0 : i32
    %c0_i32_1 = arith.constant 0 : i32
    return %c0_i32, %c0_i32_0 : i32, i32
  }
  func.func @transform_11(%arg0: i32, %arg1: i32) -> (i32, i32) {
    %c0_i32 = arith.constant 0 : i32
    %c0_i32_0 = arith.constant 0 : i32
    %c0_i32_1 = arith.constant 0 : i32
    return %c0_i32, %c0_i32_0 : i32, i32
  }
  func.func @transform_12(%arg0: i32, %arg1: i32) -> (i32, i32) {
    %c0_i32 = arith.constant 0 : i32
    %c0_i32_0 = arith.constant 0 : i32
    %c0_i32_1 = arith.constant 0 : i32
    return %c0_i32, %c0_i32_0 : i32, i32
  }
  func.func @transform_13(%arg0: i32, %arg1: i32) -> (i32, i32, i32) {
    %c0_i32 = arith.constant 0 : i32
    %c0_i32_0 = arith.constant 0 : i32
    return %arg1, %arg0, %c0_i32 : i32, i32, i32
  }
}

</mosaic_0001>

<bundles_post_ra>
// kernel: tpu_custom_call.1
= control target key start
LH: loop header
LB: loop body
LE: loop exit
PB: predicated region body
PF: predicated region fallthrough
CT: control target
= control target key end

     0   :  { %s9565_s0 = inlined_call_operand.hbm [shape: f32[4,16,256], index: 0, kind: input, shape index: {}]   ;;  %s9566_s1 = inlined_call_operand.hbm [shape: f32[4,3,16,16], index: 1, kind: input, shape index: {}]   ;;  %s9567_s2 = inlined_call_operand.hbm [shape: f32[16,16,256], index: 2, kind: input, shape index: {}]   ;;  %s9568_s3 = inlined_call_operand.hbm [shape: bf16[256,768], index: 3, kind: input, shape index: {}]   ;;  %s9569_s4 = inlined_call_operand.vmem [shape: f32[1,768], index: 4, kind: input, shape index: {}]   ;;  %s9570_s5 = inlined_call_operand.hbm [shape: bf16[256,256], index: 5, kind: input, shape index: {}]   ;;  %s9571_s6 = inlined_call_operand.hbm [shape: f32[1,256], index: 6, kind: input, shape index: {}]   ;;  %s9572_s7 = inlined_call_operand.hbm [shape: bf16[512,768], index: 7, kind: input, shape index: {}]   ;;  %s9573_s8 = inlined_call_operand.vmem [shape: f32[1,768], index: 8, kind: input, shape index: {}]   ;;  %s9574_s9 = inlined_call_operand.hbm [shape: bf16[512,256], index: 9, kind: input, shape index: {}]   ;;  %s9575_s10 = inlined_call_operand.vmem [shape: f32[1,256], index: 10, kind: input, shape index: {}]   ;;  %s9576_s11 = inlined_call_operand.hbm [shape: bf16[768,128], index: 11, kind: input, shape index: {}]   ;;  %s9577_s12 = inlined_call_operand.vmem [shape: f32[1,128], index: 12, kind: input, shape index: {}]   ;;  %s9578_s13 = inlined_call_operand.hbm [shape: f32[4,16,128], index: 13, kind: output, shape index: {}]  }
   0x1   :  { %9638 = sst [smem:[#allocation66_spill]] %s9566_s1 }
   0x2   :  { %9639 = sst [smem:[#allocation67_spill]] %s9567_s2 }
   0x3   :  { %9640 = sst [smem:[#allocation68_spill]] %s9568_s3 }
   0x4   :  { %9641 = sst [smem:[#allocation69_spill]] %s9569_s4 }
   0x5   :  { %9642 = sst [smem:[#allocation70_spill]] %s9570_s5 }
   0x6   :  { %9643 = sst [smem:[#allocation71_spill]] %s9571_s6 }
   0x7   :  { %9644 = sst [smem:[#allocation72_spill]] %s9572_s7 }
   0x8   :  { %9645 = sst [smem:[#allocation73_spill]] %s9573_s8 }
   0x9   :  { %9646 = sst [smem:[#allocation74_spill]] %s9574_s9 }
   0xa   :  { %9647 = sst [smem:[#allocation75_spill]] %s9575_s10 }
   0xb   :  { %9648 = sst [smem:[#allocation76_spill]] %s9577_s12 }
   0xc   :  { %9649 = sst [smem:[#allocation77_spill]] %s9578_s13 }
   0xd   :  { %18 = vsyncpa [#allocation4], 0 }
   0xe   :  { %20 = vsyncpa [#allocation4 + $0x1], 0 }
   0xf   :  { %21 = vsyncpa [#allocation7], 0 }
  0x10   :  { %23 = vsyncpa [#allocation7 + $0x1], 0 }
  0x11   :  { %24 = vsyncpa [#allocation10], 0 }
  0x12   :  { %25 = vsyncpa [#allocation13], 0 }
  0x13   :  { %26 = vsyncpa [#allocation16], 0 }
  0x14   :  { %27 = vsyncpa [#allocation5], 0 }
  0x15   :  { %29 = vsyncpa [#allocation5 + $0x1], 0  ;;  %s8261_s25 = smov 0   ;;  %s8263_s26 = smov 0  }
  0x16   :  { %s8265_s27 = smov 0   ;;  %s8267_s28 = smov 0  }
  0x17   :  { %s8269_s29 = smov 0   ;;  %s8271_s30 = smov 0  }
  0x18   :  { %s8273_s14 = smov 0   ;;  %s8275_s15 = smov 0  }
  0x19   :  { %s8277_s16 = smov 0   ;;  %s8279_s17 = smov 0  }
  0x1a   :  { %s8281_s18 = smov 0  }
  0x1b LB: > { %9650 = sst [smem:[#allocation26_spill]] %s8129_s25  ;;  %s8317_s19 = sadd.s32 4294967295, %s8169_s18   ;;  %s8169_s18 = sphi %s8281_s18, %s35_s18   ;;  %s8165_s17 = sphi %s8279_s17, %s9818_s17   ;;  %s8161_s16 = sphi %s8277_s16, %s9817_s16   ;;  %s8157_s15 = sphi %s8275_s15, %s9816_s15   ;;  %s8153_s14 = sphi %s8273_s14, %s9815_s14   ;;  %s8149_s30 = sphi %s8271_s30, %s9814_s30   ;;  %s8145_s29 = sphi %s8269_s29, %s9813_s29   ;;  %s8141_s28 = sphi %s8267_s28, %s9807_s28   ;;  %s8137_s27 = sphi %s8265_s27, %s9812_s27   ;;  %s8133_s26 = sphi %s8263_s26, %s9811_s26   ;;  %s8129_s25 = sphi %s8261_s25, %s9810_s25  }
  0x1c   : > { %9651 = sst [smem:[#allocation27_spill]] %s8141_s28  ;;  %p6276_p0 = scmp.ge.s32.totalorder %s8169_s18, 1 }
  0x1d   : > { %9652 = sst [smem:[#allocation28_spill]] %s8145_s29  ;;  %p9589_p1 = scmp.eq.s32.totalorder %s8317_s19, 0 }
  0x1e   : > { %9653 = sst [smem:[#allocation29_spill]] %s8153_s14  ;;  %p372_p2 = scmp.lt.s32.totalorder %s8169_s18, 9 }
  0x1f   : > { %9654 = sst [smem:[#allocation30_spill]] %s8157_s15  ;;  %s8171_s21 = smov [#allocation9]  }
  0x20   : > { %9655 = sst [smem:[#allocation31_spill]] %s8317_s19  ;;  %p8322_p3 = pnand %p6276_p0, %p372_p2 }
  0x21   : > { %s384_s22 = sshll.u32 %s8171_s21, 4  ;;  %s8172_s24 = smov [#allocation12]   ;;  %s385_s22 = int_to_ptr.vmem [resolvable:$true] %s384_s22 }
  0x22   : > { %s9656_s20 = scalar_select %p8322_p3, 1, 0 }
  0x23   : > { %p6851_p4 = pneg %p8322_p3  ;;  %s414_s13 = sshll.u32 %s8172_s24, 4  ;;  %s415_s13 = int_to_ptr.vmem [resolvable:$true] %s414_s13 }
  0x24   : > { %9657 = sst [smem:[#allocation32_spill]] %s9656_s20  ;;  %s7800_s12 = scalar_lea.vmem %s385_s22, 12288 }
  0x25   : > { %p8330_p5 = pnand %p6851_p4, %p9589_p1  ;;  %p7801_p7 = scmp.ne.s32.totalorder %s385_s22, %s7800_s12 }
  0x26   : > { %p7808_p10 = scmp.lt.s32.totalorder %s385_s22, %s385_s22  ;;  %p7809_p11 = scmp.lt.s32.totalorder %s7800_s12, %s7800_s12 }
  0x27   : > { %p8336_p6 = pneg %p8330_p5 }
  0x28   : > { %p7810_p12 = por %p7809_p11, %p7808_p10 }
  0x29   : > { %p7803_p8 = pnand %p7801_p7, %p8336_p6 }
  0x2b   : > { %p7804_p9 = pneg %p7803_p8 }
  0x2d   : > { %p7811_p13 = pnand %p7810_p12, %p7804_p9 }
  0x2f   : > { %7814 = shalt.err (!%p7811_p13)
}
  0x30   : > { %s9582_s21 = smov 384   ;;  %s9583_s24 = smov 24  }
  0x31   : > { %s9660_s3 = sld [smem:[#allocation68_spill]]  ;;  %s7826_s4 = scalar_lea.vmem %s415_s13, 32 }
  0x32   : > { %p7827_p0 = scmp.ne.s32.totalorder %s415_s13, %s7826_s4  ;;  %p7834_p7 = scmp.lt.s32.totalorder %s415_s13, %s415_s13 }
  0x33   : > { %p7835_p8 = scmp.lt.s32.totalorder %s7826_s4, %s7826_s4 }
  0x34   : > { %p7829_p2 = pnand %p7827_p0, %p8336_p6 }
  0x35   : > { %p7836_p9 = por %p7835_p8, %p7834_p7 }
  0x36   : > { %p7830_p4 = pneg %p7829_p2 }
  0x37   : > { %6854 = dma.hbm_to_vmem [thread:$0]  (!%p8330_p5), %s9660_s3, 12288, %s385_s22, [#allocation10], %s9582_s21, %s9582_s21, %s9583_s24  }
  0x38   : > { %p7837_p10 = pnand %p7836_p9, %p7830_p4 }
  0x3a   : > { %7840 = shalt.err (!%p7837_p10)
}
  0x3b   : > { %s9661_s6 = sld [smem:[#allocation71_spill]]  ;;  %s8175_s20 = smov [#allocation15]  }
  0x3c   : > { %s440_s8 = sshll.u32 %s8175_s20, 4  ;;  %s441_s8 = int_to_ptr.vmem [resolvable:$true] %s440_s8 }
  0x3d   : > { %s7852_s10 = scalar_lea.vmem %s441_s8, 8192  ;;  %p7860_p0 = scmp.lt.s32.totalorder %s441_s8, %s441_s8 }
  0x3e   : > { %p7853_p11 = scmp.ne.s32.totalorder %s441_s8, %s7852_s10  ;;  %p7861_p2 = scmp.lt.s32.totalorder %s7852_s10, %s7852_s10 }
  0x40   : > { %p7855_p12 = pnand %p7853_p11, %p8336_p6  ;;  %p7862_p7 = por %p7861_p2, %p7860_p0 }
  0x41   : > { %6860 = dma.hbm_to_vmem [thread:$0]  (!%p8330_p5), %s9661_s6, 32, %s415_s13, [#allocation13]  }
  0x42   : > { %p7856_p13 = pneg %p7855_p12 }
  0x44   : > { %p7863_p4 = pnand %p7862_p7, %p7856_p13 }
  0x46   : > { %7866 = shalt.err (!%p7863_p4)
}
  0x47   : > { %s9584_s4 = smov 128   ;;  %s9586_s13 = smov 8  }
  0x48   : > { %s9662_s9 = sld [smem:[#allocation74_spill]]  ;;  %s6275_s22 = sadd.s32 4294967294, %s8169_s18  }
  0x49   : > { %s44_s12 = sadd.s32 1, %s8161_s16  ;;  %s47_s10 = sadd.s32 1, %s8165_s17 }
  0x4a   : > { %p45_p8 = scmp.ge.s32.totalorder %s44_s12, 4  ;;  %s56_s21 = sadd.s32 1, %s8149_s30 }
  0x4b   : > { %p63_p9 = scmp.ne.s32.totalorder %s8149_s30, %s8145_s29  ;;  %p9588_p10 = scmp.eq.s32.totalorder %s8169_s18, 0 }
  0x4c   : > { %s9820_s12 = smov (%p45_p8, %s44_s12), 0  ;;  %s9822_s10 = smov (!%p45_p8, %s47_s10), %s8165_s17 }
  0x4d   : > { %9663 = sst [smem:[#allocation33_spill]] %s9820_s12  ;;  %s51_s24 = ssub.s32 %s8161_s16, %s9820_s12 }
  0x4e   : > { %6866 = dma.hbm_to_vmem [thread:$0]  (!%p8330_p5), %s9662_s9, 8192, %s441_s8, [#allocation16], %s9584_s4, %s9584_s4, %s9586_s13  }
  0x4f   : > { %p8381_p11 = por %p9588_p10, %p63_p9  ;;  %p49_p12 = scmp.ge.s32.totalorder %s9822_s10, 2 }
  0x50   : > { %p69_p13 = scmp.ne.s32.totalorder %s8145_s29, %s8141_s28  ;;  %p359_p0 = scmp.eq.s32.totalorder %s8317_s19, 7 }
  0x51   : > { %p365_p2 = scmp.eq.s32.totalorder %s6275_s22, 7  ;;  %s9824_s10 = smov (%p49_p12, %s9822_s10), 0 }
  0x52   : > { %9665 = sst [smem:[#allocation34_spill]] %s9824_s10  ;;  %p8392_p7 = por %p9589_p1, %p69_p13 }
  0x53   : > { %p8396_p4 = por %p359_p0, %p63_p9  ;;  %s8402_s4 = ssub.s32 %s8165_s17, %s9824_s10 }
  0x54   : > { %s9666_s14 = scalar_select %p8392_p7, 1, 0 }
  0x55   : > { %s9668_s20 = scalar_select %p8396_p4, 1, 0 }
  0x56   : > { %9667 = sst [smem:[#allocation35_spill]] %s9666_s14  ;;  %p8404_p8 = por %p365_p2, %p69_p13 }
  0x57   : > { %9669 = sst [smem:[#allocation36_spill]] %s9668_s20  ;;  %s53_s22 = sor.u32 %s8402_s4, %s51_s24 }
  0x58   : > { %s9670_s13 = scalar_select %p8404_p8, 1, 0 }
  0x59   : > { %p9601_p12 = scmp.lt.s32.totalorder %s8169_s18, 8  ;;  %p54_p10 = scmp.eq.s32.totalorder %s53_s22, 0 }
  0x5a   : > { %9671 = sst [smem:[#allocation37_spill]] %s9670_s13  ;;  %s8411_s3 = sand.u32 1, %s8149_s30  }
  0x5b   : > { %p8417_p1 = pnand %p9601_p12, %p8381_p11  ;;  %s494_s9 = sand.u32 1, %s8169_s18  }
  0x5c   : > { %s8423_s10 = scalar_select %p54_p10, %s8149_s30, %s56_s21  }
  0x5d   : > { %s6816_s12 = smul.u32 24, %s8411_s3  ;;  %s8178_s13 = smov [#allocation11]  }
  0x5e   : > { %s6817_s28 = smul.u32 6, %s8161_s16  ;;  %s400_s24 = sshll.u32 %s8178_s13, 4  ;;  %s8431_s24 = int_to_ptr.vmem [resolvable:$true] %s400_s24 }
  0x5f   : > { %s498_s22 = scalar_lea.vmem [#allocation6], %s6816_s12  ;;  %s9673_s1 = sld [smem:[#allocation66_spill]] }
  0x60   : > { %s503_s20 = sadd.s32 %s8165_s17, %s6817_s28  ;;  %s506_s14 = sshll.u32 %s498_s22, 4  ;;  %s507_s14 = int_to_ptr.vmem [resolvable:$true] %s506_s14 }
  0x61   : > { %s6288_s29 = sshll.u32 %s503_s20, 7  ;;  %s8433_s25 = scalar_lea.sflag [#allocation7], %s494_s9 }
  0x62   : > { %p9602_p9 = pneg %p8417_p1  ;;  %s7880_s21 = scalar_lea.vmem %s507_s14, 384 }
  0x63   : > { %p7881_p10 = scmp.ne.s32.totalorder %s507_s14, %s7880_s21  ;;  %s8179_s28 = smov [#allocation6]  }
  0x64   : > { %s7885_s13 = sshll.u32 %s8179_s28, 4  ;;  %s7886_s13 = int_to_ptr.vmem [resolvable:$false] %s7885_s13 }
  0x65   : > { %s505_s19 = scalar_lea.hbm %s9673_s1, %s6288_s29  ;;  %p7883_p11 = pnand %p7881_p10, %p9602_p9 }
  0x66   : > { %s7887_s12 = scalar_lea.vmem %s7886_s13, 768  ;;  %p7888_p0 = scmp.lt.s32.totalorder %s507_s14, %s7886_s13 }
  0x67   : > { %p7884_p13 = pneg %p7883_p11  ;;  %p7889_p2 = scmp.lt.s32.totalorder %s7887_s12, %s7880_s21 }
  0x69   : > { %p7890_p12 = por %p7889_p2, %p7888_p0 }
  0x6b   : > { %p7891_p8 = pnand %p7890_p12, %p7884_p13 }
  0x6d   : > { %7894 = shalt.err (!%p7891_p8)
}
  0x6e   : > { %s9605_s2 = smov 256   ;;  %s9674_s9 = smov 8  }
  0x6f   : > { %s9675_s29 = smov 128   ;;  %s7906_s20 = scalar_lea.vmem %s8431_s24, 4096 }
  0x70   : > { %6876 = dma.hbm_to_vmem [thread:$0]  (!%p8417_p1), %s505_s19, 384, %s507_s14, %s8433_s25, %s9605_s2, %s9675_s29, %s9674_s9  }
  0x71   : > { %p7907_p10 = scmp.ne.s32.totalorder %s8431_s24, %s7906_s20  ;;  %p7914_p12 = scmp.lt.s32.totalorder %s8431_s24, %s8431_s24 }
  0x72   : > { %p7915_p8 = scmp.lt.s32.totalorder %s7906_s20, %s7906_s20 }
  0x73   : > { %p7909_p11 = pnand %p7907_p10, %p8336_p6 }
  0x74   : > { %p7916_p13 = por %p7915_p8, %p7914_p12 }
  0x75   : > { %p7910_p9 = pneg %p7909_p11 }
  0x77   : > { %p7917_p0 = pnand %p7916_p13, %p7910_p9 }
  0x79   : > { %7920 = shalt.err (!%p7917_p0)
}
  0x7a   : > { %s9676_s5 = sld [smem:[#allocation70_spill]]  ;;  %s8181_s19 = smov [#allocation14]  }
  0x7b   : > { %s424_s14 = sshll.u32 %s8181_s19, 4  ;;  %s8182_s21 = smov [#allocation17]   ;;  %s425_s14 = int_to_ptr.vmem [resolvable:$true] %s424_s14 }
  0x7c   : > { %s456_s28 = sshll.u32 %s8182_s21, 4  ;;  %s7932_s13 = scalar_lea.vmem %s425_s14, 24576  ;;  %s457_s28 = int_to_ptr.vmem [resolvable:$true] %s456_s28 }
  0x7d   : > { %p7933_p9 = scmp.ne.s32.totalorder %s425_s14, %s7932_s13  ;;  %p7940_p11 = scmp.lt.s32.totalorder %s425_s14, %s425_s14 }
  0x7e   : > { %p7941_p12 = scmp.lt.s32.totalorder %s7932_s13, %s7932_s13 }
  0x7f   : > { %p7935_p2 = pnand %p7933_p9, %p8336_p6 }
  0x80   : > { %6857 = dma.hbm_to_vmem [thread:$0]  (!%p8330_p5), %s9676_s5, 4096, %s8431_s24, [#allocation10], %s9675_s29, %s9675_s29, %s9674_s9  }
  0x81   : > { %p7936_p10 = pneg %p7935_p2  ;;  %p7942_p8 = por %p7941_p12, %p7940_p11 }
  0x83   : > { %p7943_p13 = pnand %p7942_p8, %p7936_p10 }
  0x85   : > { %7946 = shalt.err (!%p7943_p13)
}
  0x86   : > { %s9677_s12 = smov 24   ;;  %s9678_s24 = smov 384  }
  0x87   : > { %s9679_s7 = sld [smem:[#allocation72_spill]]  ;;  %s7958_s20 = scalar_lea.vmem %s457_s28, 6144 }
  0x88   : > { %p7959_p0 = scmp.ne.s32.totalorder %s457_s28, %s7958_s20  ;;  %p7966_p4 = scmp.lt.s32.totalorder %s457_s28, %s457_s28 }
  0x89   : > { %p7967_p7 = scmp.lt.s32.totalorder %s7958_s20, %s7958_s20 }
  0x8a   : > { %p7961_p9 = pnand %p7959_p0, %p8336_p6 }
  0x8b   : > { %p7968_p11 = por %p7967_p7, %p7966_p4 }
  0x8c   : > { %p7962_p2 = pneg %p7961_p9 }
  0x8d   : > { %6863 = dma.hbm_to_vmem [thread:$0]  (!%p8330_p5), %s9679_s7, 24576, %s425_s14, [#allocation13], %s9678_s24, %s9678_s24, %s9677_s12  }
  0x8e   : > { %p7969_p10 = pnand %p7968_p11, %p7962_p2 }
  0x90   : > { %7972 = shalt.err (!%p7969_p10)
}
  0x91   : > { %s8183_s22 = smov 64   ;;  %s8184_s8 = smov 4  }
  0x92   : > { %6869 = dma.hbm_to_vmem [thread:$0]  (!%p8330_p5), %s9576_s11, 6144, %s457_s28, [#allocation16], %s8183_s22, %s8183_s22, %s8184_s8  }
  0x93   : > { %s6284_s15 = sshll.u32 %s8411_s3, 4  ;;  %s6285_s21 = sshll.u32 %s8165_s17, 1 }
  0x94   : > { %s6286_s13 = sshll.u32 %s8161_s16, 2  ;;  %s477_s12 = scalar_lea.vmem [#allocation3], %s6284_s15 }
  0x95   : > { %s487_s24 = sshll.u32 %s477_s12, 4  ;;  %s483_s9 = sadd.s32 %s6286_s13, %s6285_s21  ;;  %s488_s24 = int_to_ptr.vmem [resolvable:$true] %s487_s24 }
  0x96   : > { %s6287_s29 = sshll.u32 %s483_s9, 7  ;;  %s474_s5 = scalar_lea.sflag [#allocation4], %s8411_s3 }
  0x97   : > { %s485_s1 = scalar_lea.hbm %s9565_s0, %s6287_s29  ;;  %s7986_s7 = scalar_lea.vmem %s488_s24, 256 }
  0x98   : > { %p7987_p6 = scmp.ne.s32.totalorder %s488_s24, %s7986_s7  ;;  %p9680_p7 = pneg %p8417_p1 }
  0x99   : > { %s8185_s23 = smov [#allocation3]  }
  0x9a   : > { %p7989_p4 = pnand %p7987_p6, %p9680_p7  ;;  %s7991_s28 = sshll.u32 %s8185_s23, 4  ;;  %s7992_s28 = int_to_ptr.vmem [resolvable:$false] %s7991_s28 }
  0x9b   : > { %s7993_s22 = scalar_lea.vmem %s7992_s28, 512  ;;  %p7994_p5 = scmp.lt.s32.totalorder %s488_s24, %s7992_s28 }
  0x9c   : > { %p7990_p12 = pneg %p7989_p4  ;;  %p7995_p8 = scmp.lt.s32.totalorder %s7993_s22, %s7986_s7 }
  0x9e   : > { %p7996_p13 = por %p7995_p8, %p7994_p5 }
  0xa0   : > { %p7997_p0 = pnand %p7996_p13, %p7990_p12 }
  0xa2   : > { %8000 = shalt.err (!%p7997_p0)
}
  0xa3   : > { %s9681_s3 = sld [smem:[#allocation26_spill]]  ;;  %p108_p9 = scmp.eq.s32.totalorder %s8402_s4, 0 }
  0xa4   : > { %s9682_s2 = sld [smem:[#allocation31_spill]]  ;;  %s110_s7 = sadd.s32 1, %s8137_s27 }
  0xa5   : > { %6873 = dma.hbm_to_vmem [thread:$0]  (!%p8417_p1), %s485_s1, 256, %s488_s24, %s474_s5  }
  0xa6   : > { %p117_p2 = scmp.ne.s32.totalorder %s8137_s27, %s8133_s26  ;;  %p9683_p10 = scmp.eq.s32.totalorder %s8169_s18, 0 }
  0xa7   : > { %s8497_s8 = scalar_select %p108_p9, %s8137_s27, %s110_s7  }
  0xa8   : > { %p119_p6 = por %p117_p2, %p9683_p10  ;;  %s518_s19 = sand.u32 1, %s8137_s27  }
  0xa9   : > { %p123_p11 = scmp.ne.s32.totalorder %s8133_s26, %s9681_s3  ;;  %s6749_s14 = sshll.u32 %s8165_s17, 12 }
  0xaa   : > { %p9684_p7 = scmp.eq.s32.totalorder %s9682_s2, 0  ;;  %s6289_s15 = sshll.u32 %s518_s19, 8 }
  0xab   : > { %s9686_s12 = sld [smem:[#allocation67_spill]]  ;;  %p9687_p1 = scmp.lt.s32.totalorder %s8169_s18, 8 }
  0xac   : > { %p8503_p4 = por %p123_p11, %p9684_p7  ;;  %s520_s4 = scalar_lea.vmem [#allocation8], %s6289_s15 }
  0xad   : > { %p8514_p12 = pnand %p9687_p1, %p119_p6  ;;  %s528_s24 = sshll.u32 %s520_s4, 4  ;;  %s529_s24 = int_to_ptr.vmem [resolvable:$true] %s528_s24 }
  0xae   : > { %s8014_s9 = scalar_lea.vmem %s529_s24, 4096  ;;  %s8186_s29 = smov [#allocation8]  }
  0xaf   : > { %p8003_p5 = pneg %p8514_p12  ;;  %p8015_p8 = scmp.ne.s32.totalorder %s529_s24, %s8014_s9 }
  0xb0   : > { %s8019_s20 = sshll.u32 %s8186_s29, 4  ;;  %s8020_s20 = int_to_ptr.vmem [resolvable:$false] %s8019_s20 }
  0xb1   : > { %s527_s1 = scalar_lea.hbm %s9686_s12, %s6749_s14  ;;  %p8017_p13 = pnand %p8015_p8, %p8003_p5 }
  0xb2   : > { %s8021_s23 = scalar_lea.vmem %s8020_s20, 8192  ;;  %p8022_p9 = scmp.lt.s32.totalorder %s529_s24, %s8020_s20 }
  0xb3   : > { %p8018_p0 = pneg %p8017_p13  ;;  %p8023_p2 = scmp.lt.s32.totalorder %s8021_s23, %s8014_s9 }
  0xb5   : > { %p8024_p11 = por %p8023_p2, %p8022_p9 }
  0xb7   : > { %p8025_p10 = pnand %p8024_p11, %p8018_p0 }
  0xb9   : > { %8028 = shalt.err (!%p8025_p10)
}
  0xba   : > { %s8187_s28 = smov 16   ;;  %s9689_s22 = smov 256  }
  0xbb   : > { %6879 = dma.hbm_to_vmem [thread:$0]  (!%p8514_p12), %s527_s1, 4096, %s529_s24, %s8433_s25, %s9689_s22, %s9689_s22, %s8187_s28  }
  0xbc   : > { %540 = sbr.rel (%p8322_p3) target bundleno = 2671 (0xa6f), region = 72 }
  0xc1   : > { %s9691_s2 = sld [smem:[#allocation28_spill]] }
  0xc2   : > { %s9692_s7 = sld [smem:[#allocation35_spill]] }
  0xc7   : > { %s8528_s19 = sand.u32 1, %s9691_s2  }
  0xc8   : > { %s6294_s14 = sshll.u32 %s8528_s19, 4  ;;  %s543_s15 = scalar_lea.sflag [#allocation4], %s8528_s19 }
  0xc9   : > { %s8532_s21 = scalar_lea.vmem [#allocation3], %s6294_s14  ;;  %p9693_p6 = scmp.ne.s32.totalorder %s9692_s7, 0 }
  0xcb   : > { %8100 = dma.done.wait (%p9693_p6), %s543_s15, 256  }
  0xcc   : > { %8102 = vsyncadd (%p9693_p6), %s543_s15, 4294967040  ;;  %s9694_s13 = sld [smem:[#allocation31_spill]]  ;;  %s6818_s12 = smul.u32 24, %s8528_s19 }
  0xce   : > { %s8540_s5 = scalar_lea.vmem [#allocation6], %s6818_s12 }
  0xd2   : > { %s551_s25 = sand.u32 1, %s9694_s13  }
  0xd3   : > { %s552_s1 = scalar_lea.sflag [#allocation7], %s551_s25 }
  0xd4   : > { %8104 = dma.done.wait (%p9693_p6), %s552_s1, 384  }
  0xd5   : > { %8106 = vsyncadd (%p9693_p6), %s552_s1, 4294966912  ;;  %s562_s4 = sand.u32 1, %s8133_s26  }
  0xd6   : > { %s6295_s24 = sshll.u32 %s562_s4, 8 }
  0xd7   : > { %s8547_s9 = scalar_lea.vmem [#allocation8], %s6295_s24 }
  0xd8   : > { %8108 = dma.done.wait (%p8503_p4), %s552_s1, 4096  }
  0xd9   : > { %8110 = vsyncadd (%p8503_p4), %s552_s1, 4294963200  ;;  %p9695_p3 = scmp.eq.s32.totalorder %s9694_s13, 0 }
  0xdb   : > { %8112 = dma.done.wait (%p9695_p3), [#allocation10], 16384   ;;  %p9696_p7 = pmov %p9695_p3 }
  0xdc   : > { %p9697_p1 = pmov %p9695_p3 }
  0xdd   : > { %8114 = vsyncadd (%p9696_p7), [#allocation10], 4294950912 }
  0xde   : > { %8116 = dma.done.wait (%p9697_p1), [#allocation13], 24608   ;;  %p9698_p12 = pmov %p9697_p1 }
  0xdf   : > { %p9699_p5 = pmov %p9697_p1 }
  0xe0   : > { %8118 = vsyncadd (%p9698_p12), [#allocation13], 4294942688 }
  0xe1   : > { %8120 = dma.done.wait (%p9699_p5), [#allocation16], 14336   ;;  %p9700_p8 = pmov %p9697_p1 }
  0xe2   : > { %s6302_s6 = sshll.u32 %s8528_s19, 3  ;;  %s9701_s20 = sld [smem:[#allocation29_spill]] }
  0xe3   : > { %8122 = vsyncadd (%p9700_p8), [#allocation16], 4294952960  ;;  %s8566_s29 = scalar_lea.vmem [#allocation18], %s6302_s6 }
  0xe8   : > { %p6303_p4 = scmp.ne.s32.totalorder %s9701_s20, 0 }
  0xea   : > { %646 = sbr.rel (%p6303_p4) target bundleno = 256 (0x100), region = 112 }
  0xef   : > { %v647_v0 = vld [vmem:[%s8547_s9] sm:$0xff]  ;;  %v648_v1 = vld [vmem:[%s8547_s9 + $0x8] sm:$0xff]  ;;  %v649_v2 = vld [vmem:[%s8547_s9 + $0x10] sm:$0xff] }
  0xf0   : > { %679 = vst [vmem:[#allocation2 + $0xb0] sm:$0xff] %v647_v0  ;;  %680 = vst [vmem:[#allocation2] sm:$0xff] %v648_v1  ;;  %v650_v3 = vld [vmem:[%s8547_s9 + $0x18] sm:$0xff]  ;;  %v651_v4 = vld [vmem:[%s8547_s9 + $0x20] sm:$0xff] }
  0xf1   : > { %681 = vst [vmem:[#allocation2 + $0xd8] sm:$0xff] %v649_v2  ;;  %v652_v5 = vld [vmem:[%s8547_s9 + $0x28] sm:$0xff]  ;;  %682 = vst [vmem:[#allocation2 + $0x18] sm:$0xff] %v650_v3  ;;  %v653_v6 = vld [vmem:[%s8547_s9 + $0x30] sm:$0xff] }
  0xf2   : > { %683 = vst [vmem:[#allocation2 + $0x50] sm:$0xff] %v651_v4  ;;  %684 = vst [vmem:[#allocation2 + $0x68] sm:$0xff] %v652_v5  ;;  %v654_v7 = vld [vmem:[%s8547_s9 + $0x38] sm:$0xff]  ;;  %v655_v8 = vld [vmem:[%s8547_s9 + $0x40] sm:$0xff] }
  0xf3   : > { %685 = vst [vmem:[#allocation2 + $0x30] sm:$0xff] %v653_v6  ;;  %686 = vst [vmem:[#allocation2 + $0x48] sm:$0xff] %v654_v7  ;;  %v656_v9 = vld [vmem:[%s8547_s9 + $0x48] sm:$0xff]  ;;  %v657_v10 = vld [vmem:[%s8547_s9 + $0x50] sm:$0xff] }
  0xf4   : > { %687 = vst [vmem:[#allocation2 + $0x80] sm:$0xff] %v655_v8  ;;  %v658_v11 = vld [vmem:[%s8547_s9 + $0x58] sm:$0xff]  ;;  %688 = vst [vmem:[#allocation2 + $0x88] sm:$0xff] %v656_v9  ;;  %v659_v12 = vld [vmem:[%s8547_s9 + $0x60] sm:$0xff] }
  0xf5   : > { %689 = vst [vmem:[#allocation2 + $0xe8] sm:$0xff] %v657_v10  ;;  %690 = vst [vmem:[#allocation2 + $0xb8] sm:$0xff] %v658_v11  ;;  %v660_v13 = vld [vmem:[%s8547_s9 + $0x68] sm:$0xff]  ;;  %v661_v14 = vld [vmem:[%s8547_s9 + $0x70] sm:$0xff] }
  0xf6   : > { %691 = vst [vmem:[#allocation2 + $0x60] sm:$0xff] %v659_v12  ;;  %692 = vst [vmem:[#allocation2 + $0xf0] sm:$0xff] %v660_v13  ;;  %v662_v15 = vld [vmem:[%s8547_s9 + $0x78] sm:$0xff]  ;;  %v663_v16 = vld [vmem:[%s8547_s9 + $0x80] sm:$0xff] }
  0xf7   : > { %693 = vst [vmem:[#allocation2 + $0x8] sm:$0xff] %v661_v14  ;;  %v664_v17 = vld [vmem:[%s8547_s9 + $0x88] sm:$0xff]  ;;  %694 = vst [vmem:[#allocation2 + $0x78] sm:$0xff] %v662_v15  ;;  %v665_v18 = vld [vmem:[%s8547_s9 + $0x90] sm:$0xff] }
  0xf8   : > { %695 = vst [vmem:[#allocation2 + $0x38] sm:$0xff] %v663_v16  ;;  %696 = vst [vmem:[#allocation2 + $0x58] sm:$0xff] %v664_v17  ;;  %v666_v19 = vld [vmem:[%s8547_s9 + $0x98] sm:$0xff]  ;;  %v667_v20 = vld [vmem:[%s8547_s9 + $0xa0] sm:$0xff] }
  0xf9   : > { %697 = vst [vmem:[#allocation2 + $0x40] sm:$0xff] %v665_v18  ;;  %698 = vst [vmem:[#allocation2 + $0xc8] sm:$0xff] %v666_v19  ;;  %v668_v21 = vld [vmem:[%s8547_s9 + $0xa8] sm:$0xff]  ;;  %v669_v22 = vld [vmem:[%s8547_s9 + $0xb0] sm:$0xff] }
  0xfa   : > { %699 = vst [vmem:[#allocation2 + $0xe0] sm:$0xff] %v667_v20  ;;  %v670_v23 = vld [vmem:[%s8547_s9 + $0xb8] sm:$0xff]  ;;  %700 = vst [vmem:[#allocation2 + $0x90] sm:$0xff] %v668_v21  ;;  %v671_v24 = vld [vmem:[%s8547_s9 + $0xc0] sm:$0xff] }
  0xfb   : > { %701 = vst [vmem:[#allocation2 + $0x70] sm:$0xff] %v669_v22  ;;  %702 = vst [vmem:[#allocation2 + $0xc0] sm:$0xff] %v670_v23  ;;  %v672_v25 = vld [vmem:[%s8547_s9 + $0xc8] sm:$0xff]  ;;  %v673_v26 = vld [vmem:[%s8547_s9 + $0xd0] sm:$0xff] }
  0xfc   : > { %703 = vst [vmem:[#allocation2 + $0xa8] sm:$0xff] %v671_v24  ;;  %704 = vst [vmem:[#allocation2 + $0xd0] sm:$0xff] %v672_v25  ;;  %v674_v27 = vld [vmem:[%s8547_s9 + $0xd8] sm:$0xff]  ;;  %v675_v28 = vld [vmem:[%s8547_s9 + $0xe0] sm:$0xff] }
  0xfd   : > { %705 = vst [vmem:[#allocation2 + $0x10] sm:$0xff] %v673_v26  ;;  %v676_v29 = vld [vmem:[%s8547_s9 + $0xe8] sm:$0xff]  ;;  %706 = vst [vmem:[#allocation2 + $0x28] sm:$0xff] %v674_v27  ;;  %v677_v30 = vld [vmem:[%s8547_s9 + $0xf0] sm:$0xff] }
  0xfe   : > { %707 = vst [vmem:[#allocation2 + $0xa0] sm:$0xff] %v675_v28  ;;  %708 = vst [vmem:[#allocation2 + $0xf8] sm:$0xff] %v676_v29  ;;  %v678_v31 = vld [vmem:[%s8547_s9 + $0xf8] sm:$0xff] }
  0xff   : > { %709 = vst [vmem:[#allocation2 + $0x20] sm:$0xff] %v677_v30  ;;  %710 = vst [vmem:[#allocation2 + $0x98] sm:$0xff] %v678_v31 }
 0x100 PF: > { %v7004_v32 = vld [vmem:[#allocation9 + $0x154] ss:$24 sps:$4 sm:$0xff]   ;;  %v850_v33 = vlaneseq  ;;  %v7006_v34 = vld [vmem:[#allocation9 + $0x150] ss:$24 sps:$4 sm:$0xff]   ;;  %v7007_v35 = vld [vmem:[#allocation9 + $0x124] ss:$24 sps:$4 sm:$0xff]  }
 0x101   : > { %1360 = vmatprep.subr.bf16.mxu0 %v7004_v32  ;;  %v7009_v36 = vld [vmem:[#allocation9 + $0x120] ss:$24 sps:$4 sm:$0xff]   ;;  %v7010_v38 = vld [vmem:[#allocation9 + $0xf4] ss:$24 sps:$4 sm:$0xff]   ;;  %v7012_v39 = vld [vmem:[#allocation9 + $0xf0] ss:$24 sps:$4 sm:$0xff]  }
 0x102   : > { %1361 = vmatpush1.bf16.msra.mxu0 %v7006_v34  ;;  %v8602_v37 = vshrl.u32 %v850_v33, 7  ;;  %v7013_v42 = vld [vmem:[#allocation9 + $0xc4] ss:$24 sps:$4 sm:$0xff]   ;;  %v747_v43 = vld [vmem:[%s8540_s5] sm:$0xff]  ;;  %v7015_v44 = vld [vmem:[#allocation9 + $0xc0] ss:$24 sps:$4 sm:$0xff]  }
 0x103   : > { %1362 = vmatprep.subr.bf16.mxu0 %v7007_v35  ;;  %v7016_v47 = vld [vmem:[#allocation9 + $0x94] ss:$24 sps:$4 sm:$0xff]   ;;  %v7018_v49 = vld [vmem:[#allocation9 + $0x90] ss:$24 sps:$4 sm:$0xff]   ;;  %v7019_v50 = vld [vmem:[#allocation9 + $0x64] ss:$24 sps:$4 sm:$0xff]  }
 0x104   : > { %v8605_v40 = vsub.s32 1, %v8602_v37  ;;  %v8608_v41 = vsub.s32 0, %v8602_v37  ;;  %v8614_v48 = vsub.s32 2, %v8602_v37  ;;  %v8618_v52 = vsub.s32 3, %v8602_v37  ;;  %v7021_v53 = vld [vmem:[#allocation9 + $0x60] ss:$24 sps:$4 sm:$0xff]  }
 0x105   : > { %v7022_v54 = vld [vmem:[#allocation9 + $0x34] ss:$24 sps:$4 sm:$0xff]   ;;  %v8622_v56 = vsub.s32 4, %v8602_v37  ;;  %v7024_v59 = vld [vmem:[#allocation9 + $0x30] ss:$24 sps:$4 sm:$0xff]   ;;  %v8630_v62 = vsub.s32 5, %v8602_v37 }
 0x106   : > { %1363 = vmatpush1.bf16.msra.mxu0 %v7009_v36  ;;  %9702 = vst [vmem:[#allocation38_spill] sm:$0xff] %v8605_v40  ;;  %9703 = vst [vmem:[#allocation39_spill] sm:$0xff] %v8608_v41  ;;  %v1497_v45 = vrot.slane %v747_v43, %v8605_v40  ;;  %v1486_v46 = vrot.slane %v747_v43, %v8608_v41  ;;  %v1508_v51 = vrot.slane %v747_v43, %v8614_v48  ;;  %v744_v57 = vld [vmem:[%s8532_s21 + $0x8] sm:$0xff]  ;;  %v743_v30 = vld [vmem:[%s8532_s21] sm:$0xff]  ;;  %vm1963_vm0 = vcmask 1041409   ;;  %s9708_s22 = sld [smem:[#allocation69_spill]] }
 0x107   : > { %1364 = vmatprep.subr.bf16.mxu0 %v7010_v38  ;;  %9704 = vst [vmem:[#allocation40_spill] sm:$0xff] %v8614_v48  ;;  %9705 = vst [vmem:[#allocation41_spill] sm:$0xff] %v8618_v52  ;;  %v1519_v55 = vrot.slane %v747_v43, %v8618_v52  ;;  %v8625_v58 = vpack.c.bf16 %v744_v57, %v744_v57  ;;  %v7025_v60 = vld [vmem:[#allocation9 + $0x4] ss:$24 sps:$4 sm:$0xff]   ;;  %v1530_v61 = vrot.slane %v747_v43, %v8622_v56  ;;  %v7027_v63 = vld [vmem:[#allocation9] ss:$24 sps:$4 sm:$0xff]  }
 0x108   : > { %1499 = vbcast.lane.b32.xlu1 %v1497_v45, 256  ;;  %1488 = vbcast.lane.b32.xlu0 %v1486_v46, 256  ;;  %9706 = vst [vmem:[#allocation42_spill] sm:$0xff] %v8622_v56  ;;  %9707 = vst [vmem:[#allocation43_spill] sm:$0xff] %v8630_v62  ;;  %v7028_v0 = vld [vmem:[#allocation9 + $0x2d4] ss:$24 sps:$4 sm:$0xff]   ;;  %v1541_v1 = vrot.slane %v747_v43, %v8630_v62  ;;  %v8643_v34 = vpack.c.bf16 %v743_v30, %v743_v30 }
 0x109   : > { %1392 = vmatprep.mubr.bf16.mxu0 %v8625_v58  ;;  %1433 = vmatprep.mubr.bf16.mxu1 %v8625_v58  ;;  %v8635_v2 = vsub.s32 6, %v8602_v37  ;;  %v7030_v3 = vld [vmem:[#allocation9 + $0x2d0] ss:$24 sps:$4 sm:$0xff]   ;;  %v7031_v4 = vld [vmem:[#allocation9 + $0x2a4] ss:$24 sps:$4 sm:$0xff]   ;;  %v8639_v6 = vsub.s32 7, %v8602_v37 }
 0x10a   : > { %1365 = vmatpush1.bf16.msra.mxu0 %v7012_v39  ;;  %v7033_v7 = vld [vmem:[#allocation9 + $0x2a0] ss:$24 sps:$4 sm:$0xff]   ;;  %v7034_v8 = vld [vmem:[#allocation9 + $0x274] ss:$24 sps:$4 sm:$0xff]   ;;  %v7036_v10 = vld [vmem:[#allocation9 + $0x270] ss:$24 sps:$4 sm:$0xff]  }
 0x10b   : > { %1366 = vmatprep.subr.bf16.mxu0 %v7013_v42  ;;  %v1552_v5 = vrot.slane %v747_v43, %v8635_v2  ;;  %v1563_v9 = vrot.slane %v747_v43, %v8639_v6  ;;  %v7037_v11 = vld [vmem:[#allocation9 + $0x244] ss:$24 sps:$4 sm:$0xff]   ;;  %v7039_v12 = vld [vmem:[#allocation9 + $0x240] ss:$24 sps:$4 sm:$0xff]   ;;  %v7040_v13 = vld [vmem:[#allocation9 + $0x214] ss:$24 sps:$4 sm:$0xff]  }
 0x10c   : > { %1503 = vbcast.lane.b32.xlu1 %v1497_v45, 264  ;;  %1492 = vbcast.lane.b32.xlu0 %v1486_v46, 264  ;;  %v7103_v14 = vld [vmem:[#allocation9 + $0x15c] ss:$24 sps:$4 sm:$0xff]   ;;  %v7105_v15 = vld [vmem:[#allocation9 + $0x158] ss:$24 sps:$4 sm:$0xff]  }
 0x10d   : > { %v7042_v16 = vld [vmem:[#allocation9 + $0x210] ss:$24 sps:$4 sm:$0xff]   ;;  %v7043_v17 = vld [vmem:[#allocation9 + $0x1e4] ss:$24 sps:$4 sm:$0xff]   ;;  %1401 = vmatprep.subr.bf16.mxu1 %v7103_v14  ;;  %v7045_v20 = vld [vmem:[#allocation9 + $0x1e0] ss:$24 sps:$4 sm:$0xff]  }
 0x10e   : > { %1367 = vmatpush1.bf16.msra.mxu0 %v7015_v44  ;;  %v7109_v18 = vld [vmem:[#allocation9 + $0x12c] ss:$24 sps:$4 sm:$0xff]   ;;  %1402 = vmatpush1.bf16.msra.mxu1 %v7105_v15  ;;  %v7111_v19 = vld [vmem:[#allocation9 + $0x128] ss:$24 sps:$4 sm:$0xff]   ;;  %v7115_v21 = vld [vmem:[#allocation9 + $0xfc] ss:$24 sps:$4 sm:$0xff]  }
 0x10f   : > { %1368 = vmatprep.subr.bf16.mxu0 %v7016_v47  ;;  %1403 = vmatprep.subr.bf16.mxu1 %v7109_v18  ;;  %v7046_v22 = vld [vmem:[#allocation9 + $0x1b4] ss:$24 sps:$4 sm:$0xff]   ;;  %v7117_v23 = vld [vmem:[#allocation9 + $0xf8] ss:$24 sps:$4 sm:$0xff]   ;;  %v7049_v26 = vld [vmem:[#allocation9 + $0x184] ss:$24 sps:$4 sm:$0xff]  }
 0x110   : > { %1514 = vbcast.lane.b32.xlu1 %v1508_v51, 264  ;;  %1510 = vbcast.lane.b32.xlu0 %v1508_v51, 256  ;;  %v7121_v24 = vld [vmem:[#allocation9 + $0xcc] ss:$24 sps:$4 sm:$0xff]   ;;  %v7048_v25 = vld [vmem:[#allocation9 + $0x1b0] ss:$24 sps:$4 sm:$0xff]  }
 0x111   : > { %v7123_v27 = vld [vmem:[#allocation9 + $0xc8] ss:$24 sps:$4 sm:$0xff]   ;;  %v7127_v28 = vld [vmem:[#allocation9 + $0x9c] ss:$24 sps:$4 sm:$0xff]   ;;  %v7129_v32 = vld [vmem:[#allocation9 + $0x98] ss:$24 sps:$4 sm:$0xff]  }
 0x112   : > { %1369 = vmatpush1.bf16.msra.mxu0 %v7018_v49  ;;  %1404 = vmatpush1.bf16.msra.mxu1 %v7111_v19  ;;  %v7051_v29 = vld [vmem:[#allocation9 + $0x180] ss:$24 sps:$4 sm:$0xff]   ;;  %v7054_v31 = vld [vmem:[#allocation9 + $0x164] ss:$24 sps:$4 sm:$0xff]   ;;  %v7057_v38 = vld [vmem:[#allocation9 + $0x134] ss:$24 sps:$4 sm:$0xff]  }
 0x113   : > { %1370 = vmatprep.subr.bf16.mxu0 %v7019_v50  ;;  %1405 = vmatprep.subr.bf16.mxu1 %v7115_v21  ;;  %v7133_v35 = vld [vmem:[#allocation9 + $0x6c] ss:$24 sps:$4 sm:$0xff]   ;;  %v7052_v36 = vld [vmem:[#allocation9 + $0x160] ss:$24 sps:$4 sm:$0xff]   ;;  %v7139_v42 = vld [vmem:[#allocation9 + $0x3c] ss:$24 sps:$4 sm:$0xff]  }
 0x114   : > { %1525 = vbcast.lane.b32.xlu1 %v1519_v55, 264  ;;  %1521 = vbcast.lane.b32.xlu0 %v1519_v55, 256  ;;  %v7135_v39 = vld [vmem:[#allocation9 + $0x68] ss:$24 sps:$4 sm:$0xff]   ;;  %v7060_v44 = vld [vmem:[#allocation9 + $0x104] ss:$24 sps:$4 sm:$0xff]  }
 0x115   : > { %v7055_v43 = vld [vmem:[#allocation9 + $0x130] ss:$24 sps:$4 sm:$0xff]   ;;  %v7145_v46 = vld [vmem:[#allocation9 + $0xc] ss:$24 sps:$4 sm:$0xff]   ;;  %v7058_v47 = vld [vmem:[#allocation9 + $0x100] ss:$24 sps:$4 sm:$0xff]  }
 0x116   : > { %1371 = vmatpush1.bf16.msra.mxu0 %v7021_v53  ;;  %1406 = vmatpush1.bf16.msra.mxu1 %v7117_v23  ;;  %v7141_v45 = vld [vmem:[#allocation9 + $0x38] ss:$24 sps:$4 sm:$0xff]   ;;  %v7063_v49 = vld [vmem:[#allocation9 + $0xd4] ss:$24 sps:$4 sm:$0xff]   ;;  %v7147_v50 = vld [vmem:[#allocation9 + $0x8] ss:$24 sps:$4 sm:$0xff]  }
 0x117   : > { %1372 = vmatprep.subr.bf16.mxu0 %v7022_v54  ;;  %1407 = vmatprep.subr.bf16.mxu1 %v7121_v24  ;;  %v7151_v51 = vld [vmem:[#allocation9 + $0x2dc] ss:$24 sps:$4 sm:$0xff]   ;;  %v7061_v53 = vld [vmem:[#allocation9 + $0xd0] ss:$24 sps:$4 sm:$0xff]   ;;  %v7157_v57 = vld [vmem:[#allocation9 + $0x2ac] ss:$24 sps:$4 sm:$0xff]  }
 0x118   : > { %1536 = vbcast.lane.b32.xlu1 %v1530_v61, 264  ;;  %1532 = vbcast.lane.b32.xlu0 %v1530_v61, 256  ;;  %v7066_v54 = vld [vmem:[#allocation9 + $0xa4] ss:$24 sps:$4 sm:$0xff]   ;;  %v7153_v55 = vld [vmem:[#allocation9 + $0x2d8] ss:$24 sps:$4 sm:$0xff]  }
 0x119   : > { %v7163_v61 = vld [vmem:[#allocation9 + $0x27c] ss:$24 sps:$4 sm:$0xff]   ;;  %v7183_v15 = vld [vmem:[#allocation9 + $0x1e8] ss:$24 sps:$4 sm:$0xff]   ;;  %v7189_v19 = vld [vmem:[#allocation9 + $0x1b8] ss:$24 sps:$4 sm:$0xff]  }
 0x11a   : > { %1373 = vmatpush1.bf16.msra.mxu0 %v7024_v59  ;;  %1408 = vmatpush1.bf16.msra.mxu1 %v7123_v27  ;;  %v7069_v59 = vld [vmem:[#allocation9 + $0x74] ss:$24 sps:$4 sm:$0xff]   ;;  %v7084_v18 = vld [vmem:[#allocation9 + $0x284] ss:$24 sps:$4 sm:$0xff]   ;;  %v7082_v21 = vld [vmem:[#allocation9 + $0x280] ss:$24 sps:$4 sm:$0xff]  }
 0x11b   : > { %1374 = vmatprep.subr.bf16.mxu0 %v7025_v60  ;;  %1409 = vmatprep.subr.bf16.mxu1 %v7127_v28  ;;  %v7159_v60 = vld [vmem:[#allocation9 + $0x2a8] ss:$24 sps:$4 sm:$0xff]   ;;  %v7081_v14 = vld [vmem:[#allocation9 + $0x2b4] ss:$24 sps:$4 sm:$0xff]   ;;  %vm1965_vm1 = vcmask 1042434   ;;  %vm1967_vm2 = vcmask 1043459  }
 0x11c   : > { %1547 = vbcast.lane.b32.xlu1 %v1541_v1, 264  ;;  %1543 = vbcast.lane.b32.xlu0 %v1541_v1, 256  ;;  %v7165_v1 = vld [vmem:[#allocation9 + $0x278] ss:$24 sps:$4 sm:$0xff]   ;;  %v7195_v23 = vld [vmem:[#allocation9 + $0x188] ss:$24 sps:$4 sm:$0xff]  }
 0x11d   : > { %v7204_v24 = vld [vmem:[#allocation14 + $0x154] ss:$24 sps:$4 sm:$0xff]   ;;  %v7202_v27 = vld [vmem:[#allocation14 + $0x150] ss:$24 sps:$4 sm:$0xff]   ;;  %v7210_v28 = vld [vmem:[#allocation14 + $0x124] ss:$24 sps:$4 sm:$0xff]  }
 0x11e   : > { %1375 = vmatpush1.bf16.msra.mxu0 %v7027_v63  ;;  %1410 = vmatpush1.bf16.msra.mxu1 %v7129_v32  ;;  %v7067_v63 = vld [vmem:[#allocation9 + $0x70] ss:$24 sps:$4 sm:$0xff]   ;;  %v7093_v30 = vld [vmem:[#allocation9 + $0x1f4] ss:$24 sps:$4 sm:$0xff]   ;;  %vm1969_vm3 = vcmask 1044484   ;;  %vm1971_vm4 = vcmask 1045509  }
 0x11f   : > { %1376 = vmatprep.subr.bf16.mxu0 %v7028_v0  ;;  %1411 = vmatprep.subr.bf16.mxu1 %v7133_v35  ;;  %v7072_v0 = vld [vmem:[#allocation9 + $0x44] ss:$24 sps:$4 sm:$0xff]   ;;  %v7216_v32 = vld [vmem:[#allocation14 + $0xf4] ss:$24 sps:$4 sm:$0xff]   ;;  %vm1973_vm5 = vcmask 1046534   ;;  %vm1975_vm6 = vcmask 1047559  }
 0x120   : > { %1558 = vbcast.lane.b32.xlu1 %v1552_v5, 264  ;;  %1554 = vbcast.lane.b32.xlu0 %v1552_v5, 256  ;;  %v7075_v5 = vld [vmem:[#allocation9 + $0x14] ss:$24 sps:$4 sm:$0xff]   ;;  %v7091_v35 = vld [vmem:[#allocation9 + $0x1f0] ss:$24 sps:$4 sm:$0xff]  }
 0x121   : > { %s9713_s7 = sld [smem:[#allocation73_spill]]  ;;  %vm3860_vm7 = vcmask 130112   ;;  %vm3933_vm8 = vcmask 130048   ;;  %s6086_s28 = sshll.u32 %s8566_s29, 4  ;;  %s6087_s28 = int_to_ptr.vmem [resolvable:$true] %s6086_s28 }
 0x122   : > { %1377 = vmatpush2.bf16.msra.mxu0 %v7030_v3  ;;  %1412 = vmatpush1.bf16.msra.mxu1 %v7135_v39  ;;  %v7169_v3 = vld [vmem:[#allocation9 + $0x24c] ss:$24 sps:$4 sm:$0xff]   ;;  %s9734_s21 = sld [smem:[#allocation75_spill]]  ;;  %s6071_s15 = scalar_lea.sflag [#allocation5], %s8528_s19 }
 0x123   : > { %1378 = vmatprep.subr.bf16.mxu0 %v7031_v4  ;;  %1413 = vmatprep.subr.bf16.mxu1 %v7139_v42  ;;  %v7070_v4 = vld [vmem:[#allocation9 + $0x40] ss:$24 sps:$4 sm:$0xff]   ;;  %s9797_s4 = sld [smem:[#allocation29_spill]]  ;;  %s8190_s13 = smov [#allocation18]  }
 0x124   : > { %1569 = vbcast.lane.b32.xlu1 %v1563_v9, 264  ;;  %1565 = vbcast.lane.b32.xlu0 %v1563_v9, 256  ;;  %v7073_v9 = vld [vmem:[#allocation9 + $0x10] ss:$24 sps:$4 sm:$0xff]   ;;  %v7094_v42 = vld [vmem:[#allocation9 + $0x1c0] ss:$24 sps:$4 sm:$0xff]  }
 0x125   : > { %v7222_v39 = vld [vmem:[#allocation14 + $0xc4] ss:$24 sps:$4 sm:$0xff]   ;;  %s9798_s24 = sld [smem:[#allocation30_spill]]  ;;  %s8033_s25 = sshll.u32 %s8190_s13, 4  ;;  %s8034_s25 = int_to_ptr.vmem [resolvable:$false] %s8033_s25 }
 0x126   : > { %1379 = vmatpush2.bf16.msra.mxu0 %v7033_v7  ;;  %1414 = vmatpush1.bf16.msra.mxu1 %v7141_v45  ;;  %v7171_v7 = vld [vmem:[#allocation9 + $0x248] ss:$24 sps:$4 sm:$0xff]   ;;  %v7228_v45 = vld [vmem:[#allocation14 + $0x94] ss:$24 sps:$4 sm:$0xff]   ;;  %s9801_s9 = sld [smem:[#allocation36_spill]]  ;;  %s8035_s12 = scalar_lea.vmem %s8034_s25, 256 }
 0x127   : > { %1380 = vmatprep.subr.bf16.mxu0 %v7034_v8  ;;  %1415 = vmatprep.subr.bf16.mxu1 %v7145_v46  ;;  %v7175_v8 = vld [vmem:[#allocation9 + $0x21c] ss:$24 sps:$4 sm:$0xff]   ;;  %v7097_v46 = vld [vmem:[#allocation9 + $0x190] ss:$24 sps:$4 sm:$0xff]   ;;  %p8036_p11 = scmp.lt.s32.totalorder %s6087_s28, %s8034_s25 }
 0x129   : > { %s6744_s6 = sshll.u32 %s9797_s4, 1 }
 0x12a   : > { %1381 = vmatpush2.bf16.msra.mxu0 %v7036_v10  ;;  %1416 = vmatpush1.bf16.msra.mxu1 %v7147_v50  ;;  %v7078_v10 = vld [vmem:[#allocation9 + $0x2e4] ss:$24 sps:$4 sm:$0xff]   ;;  %v7100_v50 = vld [vmem:[#allocation14 + $0x450] ss:$24 sps:$4 sm:$0xff]  }
 0x12b   : > { %1382 = vmatprep.subr.bf16.mxu0 %v7037_v11  ;;  %1417 = vmatprep.subr.bf16.mxu1 %v7151_v51  ;;  %v7177_v11 = vld [vmem:[#allocation9 + $0x218] ss:$24 sps:$4 sm:$0xff]   ;;  %s6082_s20 = sadd.s32 %s9798_s24, %s6744_s6 }
 0x12c   : > { %v716_v51 = vld [vmem:[#allocation2 + $0x68] sm:$0xff]  ;;  %s6745_s23 = sshll.u32 %s6082_s20, 7  ;;  %p9803_p0 = scmp.ne.s32.totalorder %s9801_s9, 0 }
 0x12e   : > { %1383 = vmatpush2.bf16.msra.mxu0 %v7039_v12  ;;  %1418 = vmatpush2.bf16.msra.mxu1 %v7153_v55  ;;  %v7181_v12 = vld [vmem:[#allocation9 + $0x1ec] ss:$24 sps:$4 sm:$0xff]  }
 0x12f   : > { %1384 = vmatprep.subr.bf16.mxu0 %v7040_v13  ;;  %1419 = vmatprep.subr.bf16.mxu1 %v7157_v57  ;;  %v7076_v13 = vld [vmem:[#allocation9 + $0x2e0] ss:$24 sps:$4 sm:$0xff]   ;;  %v712_v57 = vld [vmem:[#allocation2] sm:$0xff] }
 0x130   : > { %v7108_v55 = vld [vmem:[#allocation14 + $0x424] ss:$24 sps:$4 sm:$0xff]  }
 0x132   : > { %1385 = vmatpush2.bf16.msra.mxu0 %v7042_v16  ;;  %1420 = vmatpush2.bf16.msra.mxu1 %v7159_v60  ;;  %v7187_v16 = vld [vmem:[#allocation9 + $0x1bc] ss:$24 sps:$4 sm:$0xff]  }
 0x133   : > { %1386 = vmatprep.subr.bf16.mxu0 %v7043_v17  ;;  %1421 = vmatprep.subr.bf16.mxu1 %v7163_v61  ;;  %v7079_v17 = vld [vmem:[#allocation9 + $0x2b0] ss:$24 sps:$4 sm:$0xff]   ;;  %v717_v61 = vld [vmem:[#allocation2 + $0x30] sm:$0xff] }
 0x136   : > { %1387 = vmatpush2.bf16.msra.mxu0 %v7045_v20  ;;  %1422 = vmatpush2.bf16.msra.mxu1 %v7165_v1  ;;  %v7193_v20 = vld [vmem:[#allocation9 + $0x18c] ss:$24 sps:$4 sm:$0xff]  }
 0x137   : > { %1388 = vmatprep.subr.bf16.mxu0 %v7046_v22  ;;  %1423 = vmatprep.subr.bf16.mxu1 %v7169_v3  ;;  %v7087_v22 = vld [vmem:[#allocation9 + $0x254] ss:$24 sps:$4 sm:$0xff]  }
 0x138   : > { %v714_v1 = vld [vmem:[#allocation2 + $0x18] sm:$0xff] }
 0x13a   : > { %1389 = vmatpush2.bf16.msra.mxu0 %v7048_v25  ;;  %1424 = vmatpush2.bf16.msra.mxu1 %v7171_v7  ;;  %v7085_v25 = vld [vmem:[#allocation9 + $0x250] ss:$24 sps:$4 sm:$0xff]  }
 0x13b   : > { %1390 = vmatprep.subr.bf16.mxu0 %v7049_v26  ;;  %1425 = vmatprep.subr.bf16.mxu1 %v7175_v8  ;;  %v7090_v26 = vld [vmem:[#allocation9 + $0x224] ss:$24 sps:$4 sm:$0xff]  }
 0x13e   : > { %1391 = vmatpush2.bf16.msra.mxu0 %v7051_v29  ;;  %1426 = vmatpush2.bf16.msra.mxu1 %v7177_v11  ;;  %v7088_v29 = vld [vmem:[#allocation9 + $0x220] ss:$24 sps:$4 sm:$0xff]  }
 0x13f   : > { %1442 = vmatprep.subr.bf16.mxu0 %v7054_v31  ;;  %1427 = vmatprep.subr.bf16.mxu1 %v7181_v12  ;;  %v7208_v31 = vld [vmem:[#allocation14 + $0x120] ss:$24 sps:$4 sm:$0xff]   ;;  %v7114_v11 = vld [vmem:[#allocation14 + $0x3f4] ss:$24 sps:$4 sm:$0xff]  }
 0x141   : > { %1393 = vmatmul.mubr.bf16.vlgmr.msra.gmra.mxu0 %v8643_v34 }
 0x142   : > { %1443 = vmatpush1.bf16.msra.mxu0 %v7052_v36  ;;  %1474 = vmatprep.mubr.bf16.mxu0 %v8625_v58  ;;  %v7064_v58 = vld [vmem:[#allocation9 + $0xa0] ss:$24 sps:$4 sm:$0xff]   ;;  %v7096_v36 = vld [vmem:[#allocation9 + $0x1c4] ss:$24 sps:$4 sm:$0xff]  }
 0x143   : > { %1444 = vmatprep.subr.bf16.mxu0 %v7057_v38  ;;  %1428 = vmatpush2.bf16.msra.mxu1 %v7183_v15  ;;  %v7214_v38 = vld [vmem:[#allocation14 + $0xf0] ss:$24 sps:$4 sm:$0xff]  }
 0x144   : > { %1429 = vmatprep.subr.bf16.mxu1 %v7187_v16 }
 0x146   : > { %1445 = vmatpush1.bf16.msra.mxu0 %v7055_v43  ;;  %v7099_v43 = vld [vmem:[#allocation9 + $0x194] ss:$24 sps:$4 sm:$0xff]  }
 0x147   : > { %1446 = vmatprep.subr.bf16.mxu0 %v7060_v44  ;;  %1430 = vmatpush2.bf16.msra.mxu1 %v7189_v19  ;;  %v7220_v44 = vld [vmem:[#allocation14 + $0xc0] ss:$24 sps:$4 sm:$0xff]   ;;  %v722_v19 = vld [vmem:[#allocation2 + $0xb8] sm:$0xff] }
 0x148   : > { %1431 = vmatprep.subr.bf16.mxu1 %v7193_v20  ;;  %v719_v20 = vld [vmem:[#allocation2 + $0x80] sm:$0xff] }
 0x14a   : > { %1447 = vmatpush1.bf16.msra.mxu0 %v7058_v47  ;;  %v7102_v47 = vld [vmem:[#allocation14 + $0x454] ss:$24 sps:$4 sm:$0xff]  }
 0x14b   : > { %1448 = vmatprep.subr.bf16.mxu0 %v7063_v49  ;;  %1432 = vmatpush2.bf16.msra.mxu1 %v7195_v23  ;;  %v715_v49 = vld [vmem:[#allocation2 + $0x50] sm:$0xff] }
 0x14c   : > { %3174 = vmatprep.subr.bf16.mxu1 %v7204_v24 }
 0x14e   : > { %1449 = vmatpush1.bf16.msra.mxu0 %v7061_v53  ;;  %1434 = vmatmul.mubr.bf16.vlgmr.msra.gmra.mxu1 %v8643_v34  ;;  %v711_v53 = vld [vmem:[#allocation2 + $0xb0] sm:$0xff] }
 0x14f   : > { %1450 = vmatprep.subr.bf16.mxu0 %v7066_v54  ;;  %3175 = vmatpush1.bf16.msra.mxu1 %v7202_v27  ;;  %v7226_v54 = vld [vmem:[#allocation14 + $0x90] ss:$24 sps:$4 sm:$0xff]  }
 0x150   : > { %3176 = vmatprep.subr.bf16.mxu1 %v7210_v28  ;;  %v7112_v27 = vld [vmem:[#allocation14 + $0x3f0] ss:$24 sps:$4 sm:$0xff]   ;;  %v7120_v28 = vld [vmem:[#allocation14 + $0x3c4] ss:$24 sps:$4 sm:$0xff]  }
 0x152   : > { %1451 = vmatpush1.bf16.msra.mxu0 %v7064_v58  ;;  %v7234_v58 = vld [vmem:[#allocation14 + $0x64] ss:$24 sps:$4 sm:$0xff]  }
 0x153   : > { %1452 = vmatprep.subr.bf16.mxu0 %v7069_v59  ;;  %3177 = vmatpush1.bf16.msra.mxu1 %v7208_v31 }
 0x154   : > { %3178 = vmatprep.subr.bf16.mxu1 %v7216_v32 }
 0x156   : > { %1453 = vmatpush1.bf16.msra.mxu0 %v7067_v63  ;;  %v718_v63 = vld [vmem:[#allocation2 + $0x48] sm:$0xff] }
 0x157   : > { %1454 = vmatprep.subr.bf16.mxu0 %v7072_v0  ;;  %3179 = vmatpush1.bf16.msra.mxu1 %v7214_v38  ;;  %v713_v0 = vld [vmem:[#allocation2 + $0xd8] sm:$0xff]  ;;  %v7118_v38 = vld [vmem:[#allocation14 + $0x3c0] ss:$24 sps:$4 sm:$0xff]  }
 0x158   : > { %3180 = vmatprep.subr.bf16.mxu1 %v7222_v39 }
 0x15a   : > { %1455 = vmatpush1.bf16.msra.mxu0 %v7070_v4  ;;  %v7232_v4 = vld [vmem:[#allocation14 + $0x60] ss:$24 sps:$4 sm:$0xff]  }
 0x15b   : > { %1456 = vmatprep.subr.bf16.mxu0 %v7075_v5  ;;  %3181 = vmatpush1.bf16.msra.mxu1 %v7220_v44 }
 0x15c   : > { %3182 = vmatprep.subr.bf16.mxu1 %v7228_v45  ;;  %v7244_v45 = vld [vmem:[#allocation14] ss:$24 sps:$4 sm:$0xff]  }
 0x15e   : > { %1457 = vmatpush1.bf16.msra.mxu0 %v7073_v9  ;;  %v7240_v9 = vld [vmem:[#allocation14 + $0x34] ss:$24 sps:$4 sm:$0xff]  }
 0x15f   : > { %1458 = vmatprep.subr.bf16.mxu0 %v7078_v10  ;;  %3183 = vmatpush1.bf16.msra.mxu1 %v7226_v54  ;;  %v7106_v10 = vld [vmem:[#allocation14 + $0x420] ss:$24 sps:$4 sm:$0xff]   ;;  %v7252_v54 = vld [vmem:[#allocation14 + $0x2d4] ss:$24 sps:$4 sm:$0xff]  }
 0x160   : > { %3184 = vmatprep.subr.bf16.mxu1 %v7234_v58 }
 0x162   : > { %1459 = vmatpush2.bf16.msra.mxu0 %v7076_v13 }
 0x163   : > { %1460 = vmatprep.subr.bf16.mxu0 %v7081_v14  ;;  %3185 = vmatpush1.bf16.msra.mxu1 %v7232_v4 }
 0x164   : > { %3186 = vmatprep.subr.bf16.mxu1 %v7240_v9 }
 0x166   : > { %1461 = vmatpush2.bf16.msra.mxu0 %v7079_v17 }
 0x167   : > { %1462 = vmatprep.subr.bf16.mxu0 %v7084_v18  ;;  %v721_v18 = vld [vmem:[#allocation2 + $0xe8] sm:$0xff] }
 0x16a   : > { %1463 = vmatpush2.bf16.msra.mxu0 %v7082_v21 }
 0x16b   : > { %1464 = vmatprep.subr.bf16.mxu0 %v7087_v22 }
 0x16e   : > { %1465 = vmatpush2.bf16.msra.mxu0 %v7085_v25  ;;  %v720_v25 = vld [vmem:[#allocation2 + $0x88] sm:$0xff] }
 0x16f   : > { %1466 = vmatprep.subr.bf16.mxu0 %v7090_v26  ;;  %v7246_v26 = vld [vmem:[#allocation14 + $0x4] ss:$24 sps:$4 sm:$0xff]  }
 0x172   : > { %1467 = vmatpush2.bf16.msra.mxu0 %v7088_v29 }
 0x173   : > { %1468 = vmatprep.subr.bf16.mxu0 %v7093_v30 }
 0x176   : > { %1469 = vmatpush2.bf16.msra.mxu0 %v7091_v35 }
 0x177   : > { %1470 = vmatprep.subr.bf16.mxu0 %v7096_v36 }
 0x17a   : > { %1471 = vmatpush2.bf16.msra.mxu0 %v7094_v42  ;;  %v1500_v59 = vpop.permute.xlu1 %1499  ;;  %v1489_v60 = vpop.permute.xlu0 %1488 }
 0x17b   : > { %1472 = vmatprep.subr.bf16.mxu0 %v7099_v43  ;;  %v1575_v3 = vmul.f32 %v1500_v59, %v715_v49  ;;  %v1576_v5 = vmul.f32 %v1500_v59, %v716_v51  ;;  %v1571_v7 = vmul.f32 %v1489_v60, %v711_v53  ;;  %v1572_v8 = vmul.f32 %v1489_v60, %v712_v57  ;;  %v726_v53 = vld [vmem:[#allocation2 + $0x78] sm:$0xff]  ;;  %v725_v59 = vld [vmem:[#allocation2 + $0x8] sm:$0xff] }
 0x17e   : > { %1473 = vmatpush2.bf16.msra.mxu0 %v7097_v46  ;;  %v1504_v12 = vpop.permute.xlu1 %1503  ;;  %v1493_v13 = vpop.permute.xlu0 %1492  ;;  %v7126_v46 = vld [vmem:[#allocation14 + $0x394] ss:$24 sps:$4 sm:$0xff]  }
 0x17f   : > { %3215 = vmatprep.subr.bf16.mxu0 %v7102_v47  ;;  %v1577_v14 = vmul.f32 %v1504_v12, %v717_v61  ;;  %v1578_v15 = vmul.f32 %v1504_v12, %v718_v63  ;;  %v1573_v16 = vmul.f32 %v1493_v13, %v713_v0  ;;  %v1574_v17 = vmul.f32 %v1493_v13, %v714_v1  ;;  %v723_v63 = vld [vmem:[#allocation2 + $0x60] sm:$0xff]  ;;  %v724_v0 = vld [vmem:[#allocation2 + $0xf0] sm:$0xff] }
 0x180   : > { %v7250_v1 = vld [vmem:[#allocation14 + $0x2d0] ss:$24 sps:$4 sm:$0xff]  }
 0x181   : > { %1475 = vmatmul.mubr.bf16.vlgmr.msra.gmra.mxu0 %v8643_v34  ;;  %v7238_v34 = vld [vmem:[#allocation14 + $0x30] ss:$24 sps:$4 sm:$0xff]   ;;  %v1617_v21 = vadd.f32 %v1577_v14, %v1575_v3  ;;  %v1624_v22 = vadd.f32 %v1578_v15, %v1576_v5  ;;  %v1603_v23 = vadd.f32 %v1573_v16, %v1571_v7  ;;  %v1610_v24 = vadd.f32 %v1574_v17, %v1572_v8 }
 0x182   : > { %3216 = vmatpush1.bf16.msra.mxu0 %v7100_v50  ;;  %v1515_v29 = vpop.permute.xlu1 %1514  ;;  %v1511_v30 = vpop.permute.xlu0 %1510  ;;  %3187 = vmatpush1.bf16.msra.mxu1 %v7238_v34  ;;  %v7124_v8 = vld [vmem:[#allocation14 + $0x390] ss:$24 sps:$4 sm:$0xff]  }
 0x183   : > { %3217 = vmatprep.subr.bf16.mxu0 %v7108_v55  ;;  %v1618_v31 = vrot.slane %v1617_v21, 4  ;;  %v1625_v32 = vrot.slane %v1624_v22, 4  ;;  %v1604_v35 = vrot.slane %v1603_v23, 4  ;;  %v1611_v36 = vrot.slane %v1610_v24, 4  ;;  %3188 = vmatprep.subr.bf16.mxu1 %v7246_v26  ;;  %v729_v17 = vld [vmem:[#allocation2 + $0x40] sm:$0xff]  ;;  %v728_v26 = vld [vmem:[#allocation2 + $0x58] sm:$0xff] }
 0x184   : > { %v1581_v39 = vmul.f32 %v1515_v29, %v721_v18  ;;  %v1582_v42 = vmul.f32 %v1515_v29, %v722_v19  ;;  %v1579_v43 = vmul.f32 %v1511_v30, %v719_v20  ;;  %v1580_v44 = vmul.f32 %v1511_v30, %v720_v25  ;;  %v730_v20 = vld [vmem:[#allocation2 + $0xc8] sm:$0xff]  ;;  %v727_v25 = vld [vmem:[#allocation2 + $0x38] sm:$0xff] }
 0x185   : > { %v1619_v47 = vadd.f32 %v1618_v31, %v1617_v21  ;;  %v1626_v49 = vadd.f32 %v1625_v32, %v1624_v22  ;;  %v1605_v50 = vadd.f32 %v1604_v35, %v1603_v23  ;;  %v1612_v51 = vadd.f32 %v1611_v36, %v1610_v24  ;;  %v7130_v22 = vld [vmem:[#allocation14 + $0x360] ss:$24 sps:$4 sm:$0xff]   ;;  %v7138_v29 = vld [vmem:[#allocation14 + $0x334] ss:$24 sps:$4 sm:$0xff]  }
 0x186   : > { %3218 = vmatpush1.bf16.msra.mxu0 %v7106_v10  ;;  %v1631_v55 = vadd.f32 %v1581_v39, %v1579_v43  ;;  %v1638_v57 = vadd.f32 %v1582_v42, %v1580_v44  ;;  %v1526_v58 = vpop.permute.xlu1 %1525  ;;  %v1522_v60 = vpop.permute.xlu0 %1521  ;;  %3189 = vmatpush1.bf16.msra.mxu1 %v7244_v45  ;;  %v7258_v10 = vld [vmem:[#allocation14 + $0x2a4] ss:$24 sps:$4 sm:$0xff]   ;;  %v7264_v30 = vld [vmem:[#allocation14 + $0x274] ss:$24 sps:$4 sm:$0xff]  }
 0x187   : > { %3219 = vmatprep.subr.bf16.mxu0 %v7114_v11  ;;  %v1620_v61 = vrot.slane %v1619_v47, 2  ;;  %v1627_v3 = vrot.slane %v1626_v49, 2  ;;  %v1606_v4 = vrot.slane %v1605_v50, 2  ;;  %v1586_v7 = vmul.f32 %v1526_v58, %v726_v53  ;;  %3190 = vmatprep.subr.bf16.mxu1 %v7252_v54  ;;  %v7132_v11 = vld [vmem:[#allocation14 + $0x364] ss:$24 sps:$4 sm:$0xff]   ;;  %v734_v39 = vld [vmem:[#allocation2 + $0xc0] sm:$0xff] }
 0x188   : > { %v1639_v5 = vrot.slane %v1638_v57, 4  ;;  %v1613_v9 = vrot.slane %v1612_v51, 2  ;;  %v1632_v12 = vrot.slane %v1631_v55, 4  ;;  %v1585_v13 = vmul.f32 %v1526_v58, %v725_v59  ;;  %v7136_v54 = vld [vmem:[#allocation14 + $0x330] ss:$24 sps:$4 sm:$0xff]  }
 0x189   : > { %v1583_v14 = vmul.f32 %v1522_v60, %v723_v63  ;;  %v1584_v15 = vmul.f32 %v1522_v60, %v724_v0  ;;  %v1621_v19 = vadd.f32 %v1620_v61, %v1619_v47  ;;  %v1628_v34 = vadd.f32 %v1627_v3, %v1626_v49  ;;  %v7262_v47 = vld [vmem:[#allocation14 + $0x270] ss:$24 sps:$4 sm:$0xff]   ;;  %v737_v63 = vld [vmem:[#allocation2 + $0x10] sm:$0xff] }
 0x18a   : > { %3220 = vmatpush1.bf16.msra.mxu0 %v7112_v27  ;;  %v1537_v16 = vpop.permute.xlu1 %1536  ;;  %v1533_v18 = vpop.permute.xlu0 %1532  ;;  %v8649_v21 = vadd.f32 %v1606_v4, %v1605_v50  ;;  %v1640_v23 = vadd.f32 %v1639_v5, %v1638_v57  ;;  %v733_v27 = vld [vmem:[#allocation2 + $0x70] sm:$0xff]  ;;  %3191 = vmatpush2.bf16.msra.mxu1 %v7250_v1  ;;  %v8651_v31 = vadd.f32 %v1613_v9, %v1612_v51 }
 0x18b   : > { %3221 = vmatprep.subr.bf16.mxu0 %v7120_v28  ;;  %v1652_v24 = vadd.f32 %v1586_v7, %v1584_v15  ;;  %v7256_v28 = vld [vmem:[#allocation14 + $0x2a0] ss:$24 sps:$4 sm:$0xff]   ;;  %3192 = vmatprep.subr.bf16.mxu1 %v7258_v10  ;;  %v8653_v32 = vadd.f32 %v1632_v12, %v1631_v55  ;;  %v1645_v35 = vadd.f32 %v1585_v13, %v1583_v14  ;;  %v1622_v43 = vrot.slane %v1621_v19, 1  ;;  %v7144_v55 = vld [vmem:[#allocation14 + $0x304] ss:$24 sps:$4 sm:$0xff]  }
 0x18c   : > { %v1589_v44 = vmul.f32 %v1537_v16, %v729_v17  ;;  %v1590_v45 = vmul.f32 %v1537_v16, %v730_v20  ;;  %v1629_v49 = vrot.slane %v1628_v34, 1  ;;  %v1608_v50 = vrot.slane %v8649_v21, 1  ;;  %v732_v57 = vld [vmem:[#allocation2 + $0x90] sm:$0xff]  ;;  %v738_v12 = vld [vmem:[#allocation2 + $0x28] sm:$0xff] }
 0x18d   : > { %v1653_v36 = vrot.slane %v1652_v24, 4  ;;  %v1641_v53 = vrot.slane %v1640_v23, 2  ;;  %v1587_v58 = vmul.f32 %v1533_v18, %v727_v25  ;;  %v1588_v59 = vmul.f32 %v1533_v18, %v728_v26  ;;  %v7270_v0 = vld [vmem:[#allocation14 + $0x244] ss:$24 sps:$4 sm:$0xff]   ;;  %v7142_v18 = vld [vmem:[#allocation14 + $0x300] ss:$24 sps:$4 sm:$0xff]  }
 0x18e   : > { %3222 = vmatpush1.bf16.msra.mxu0 %v7118_v38  ;;  %v1548_v38 = vpop.permute.xlu1 %1547  ;;  %v1544_v42 = vpop.permute.xlu0 %1543  ;;  %3193 = vmatpush2.bf16.msra.mxu1 %v7256_v28  ;;  %v1615_v1 = vrot.slane %v8651_v31, 1  ;;  %v1634_v3 = vrot.slane %v8653_v32, 2  ;;  %v1646_v4 = vrot.slane %v1645_v35, 4  ;;  %v735_v14 = vld [vmem:[#allocation2 + $0xa8] sm:$0xff]  ;;  %v8658_v15 = vadd.f32 %v1622_v43, %v1621_v19 }
 0x18f   : > { %3223 = vmatprep.subr.bf16.mxu0 %v7126_v46  ;;  %v731_v46 = vld [vmem:[#allocation2 + $0xe0] sm:$0xff]  ;;  %v1654_v51 = vadd.f32 %v1653_v36, %v1652_v24  ;;  %v1593_v60 = vmul.f32 %v1548_v38, %v733_v27  ;;  %v1594_v61 = vmul.f32 %v1548_v38, %v734_v39  ;;  %3194 = vmatprep.subr.bf16.mxu1 %v7264_v30  ;;  %v7268_v24 = vld [vmem:[#allocation14 + $0x240] ss:$24 sps:$4 sm:$0xff]  }
 0x190   : > { %v1666_v9 = vadd.f32 %v1590_v45, %v1588_v59  ;;  %v1591_v10 = vmul.f32 %v1544_v42, %v731_v46  ;;  %v1630_v16 = vadd.f32 %v1629_v49, %v1628_v34  ;;  %v1642_v17 = vadd.f32 %v1641_v53, %v1640_v23  ;;  %v7150_v38 = vld [vmem:[#allocation14 + $0x5d4] ss:$24 sps:$4 sm:$0xff]  }
 0x191   : > { %v1655_v5 = vrot.slane %v1654_v51, 2  ;;  %v1647_v30 = vadd.f32 %v1646_v4, %v1645_v35  ;;  %v8661_v34 = vadd.f32 %v1608_v50, %v8649_v21  ;;  %v741_v45 = vld [vmem:[#allocation2 + $0x20] sm:$0xff]  ;;  %v742_v46 = vld [vmem:[#allocation2 + $0x98] sm:$0xff]  ;;  %v1616_v49 = vadd.f32 %v1615_v1, %v8651_v31 }
 0x192   : > { %3224 = vmatpush1.bf16.msra.mxu0 %v7124_v8  ;;  %v1559_v7 = vpop.permute.xlu1 %1558  ;;  %v1659_v8 = vadd.f32 %v1589_v44, %v1587_v58  ;;  %v1555_v13 = vpop.permute.xlu0 %1554  ;;  %3195 = vmatpush2.bf16.msra.mxu1 %v7262_v47  ;;  %v1667_v26 = vrot.slane %v1666_v9, 4  ;;  %v1673_v27 = vadd.f32 %v1593_v60, %v1591_v10  ;;  %v739_v47 = vld [vmem:[#allocation2 + $0xa0] sm:$0xff]  ;;  %v8665_v53 = vadd.f32 %v1634_v3, %v8653_v32  ;;  %v7282_v60 = vld [vmem:[#allocation14 + $0x1e4] ss:$24 sps:$4 sm:$0xff]  }
 0x193   : > { %3225 = vmatprep.subr.bf16.mxu0 %v7132_v11  ;;  %v1592_v11 = vmul.f32 %v1544_v42, %v732_v57  ;;  %v1597_v20 = vmul.f32 %v1559_v7, %v737_v63  ;;  %3196 = vmatprep.subr.bf16.mxu1 %v7270_v0  ;;  %v1656_v36 = vadd.f32 %v1655_v5, %v1654_v51  ;;  %v7148_v35 = vld [vmem:[#allocation14 + $0x5d0] ss:$24 sps:$4 sm:$0xff]   ;;  %v1643_v50 = vrot.slane %v1642_v17, 1  ;;  %v7156_v31 = vld [vmem:[#allocation14 + $0x5a4] ss:$24 sps:$4 sm:$0xff]  }
 0x194   : > { %v1660_v25 = vrot.slane %v1659_v8, 4  ;;  %v1598_v19 = vmul.f32 %v1559_v7, %v738_v12  ;;  %v1595_v39 = vmul.f32 %v1555_v13, %v735_v14  ;;  %v1668_v23 = vadd.f32 %v1667_v26, %v1666_v9  ;;  %v7274_v21 = vld [vmem:[#allocation14 + $0x210] ss:$24 sps:$4 sm:$0xff]   ;;  %v7280_v12 = vld [vmem:[#allocation14 + $0x1e0] ss:$24 sps:$4 sm:$0xff]  }
 0x195   : > { %v1680_v28 = vadd.f32 %v1594_v61, %v1592_v11  ;;  %v1674_v42 = vrot.slane %v1673_v27, 4  ;;  %v1648_v61 = vrot.slane %v1647_v30, 2  ;;  %v1657_v63 = vrot.slane %v1656_v36, 1  ;;  %v740_v7 = vld [vmem:[#allocation2 + $0xf8] sm:$0xff] }
 0x196   : > { %3226 = vmatpush1.bf16.msra.mxu0 %v7130_v22  ;;  %v736_v22 = vld [vmem:[#allocation2 + $0xd0] sm:$0xff]  ;;  %v1570_v44 = vpop.permute.xlu1 %1569  ;;  %v1687_v51 = vadd.f32 %v1597_v20, %v1595_v39  ;;  %3197 = vmatpush2.bf16.msra.mxu1 %v7268_v24  ;;  %v1661_v57 = vadd.f32 %v1660_v25, %v1659_v8  ;;  %v1566_v59 = vpop.permute.xlu0 %1565  ;;  %v1977_v9 = vsel %vm1963_vm0, %v1630_v16, %v1616_v49  ;;  %v1636_v16 = vrot.slane %v8665_v53, 1 }
 0x197   : > { %3227 = vmatprep.subr.bf16.mxu0 %v7138_v29  ;;  %v7276_v29 = vld [vmem:[#allocation14 + $0x214] ss:$24 sps:$4 sm:$0xff]   ;;  %v1681_v43 = vrot.slane %v1680_v28, 4  ;;  %v1601_v32 = vmul.f32 %v1570_v44, %v741_v45  ;;  %v1675_v3 = vadd.f32 %v1674_v42, %v1673_v27  ;;  %v1602_v10 = vmul.f32 %v1570_v44, %v742_v46  ;;  %v7154_v25 = vld [vmem:[#allocation14 + $0x5a0] ss:$24 sps:$4 sm:$0xff]  }
 0x198   : > { %3198 = vmatprep.subr.bf16.mxu1 %v7276_v29  ;;  %v1688_v5 = vrot.slane %v1687_v51, 4  ;;  %v1599_v11 = vmul.f32 %v1566_v59, %v739_v47  ;;  %v1662_v14 = vrot.slane %v1661_v57, 2  ;;  %v1649_v24 = vadd.f32 %v1648_v61, %v1647_v30  ;;  %v7162_v27 = vld [vmem:[#allocation14 + $0x574] ss:$24 sps:$4 sm:$0xff]   ;;  %v7160_v46 = vld [vmem:[#allocation14 + $0x570] ss:$24 sps:$4 sm:$0xff]  }
 0x199   : > { %v1682_v58 = vadd.f32 %v1681_v43, %v1680_v28  ;;  %v1600_v28 = vmul.f32 %v1566_v59, %v740_v7  ;;  %v7294_v49 = vld [vmem:[#allocation14 + $0x184] ss:$24 sps:$4 sm:$0xff]  }
 0x19a   : > { %3228 = vmatpush1.bf16.msra.mxu0 %v7136_v54  ;;  %v1596_v54 = vmul.f32 %v1555_v13, %v736_v22  ;;  %3199 = vmatpush2.bf16.msra.mxu1 %v7274_v21  ;;  %v1644_v13 = vadd.f32 %v1643_v50, %v1642_v17  ;;  %v7288_v22 = vld [vmem:[#allocation14 + $0x1b4] ss:$24 sps:$4 sm:$0xff]   ;;  %v1701_v29 = vadd.f32 %v1601_v32, %v1599_v11 }
 0x19b   : > { %3229 = vmatprep.subr.bf16.mxu0 %v7144_v55  ;;  %v1669_v55 = vrot.slane %v1668_v23, 2  ;;  %v1683_v4 = vrot.slane %v1682_v58, 2  ;;  %3200 = vmatprep.subr.bf16.mxu1 %v7282_v60  ;;  %v1689_v39 = vadd.f32 %v1688_v5, %v1687_v51  ;;  %v1708_v44 = vadd.f32 %v1602_v10, %v1600_v28  ;;  %v7178_v28 = vld [vmem:[#allocation14 + $0x4e0] ss:$24 sps:$4 sm:$0xff]  }
 0x19c   : > { %v1694_v0 = vadd.f32 %v1598_v19, %v1596_v54  ;;  %v1676_v19 = vrot.slane %v1675_v3, 2  ;;  %v1702_v43 = vrot.slane %v1701_v29, 4  ;;  %v1663_v45 = vadd.f32 %v1662_v14, %v1661_v57  ;;  %v7168_v57 = vld [vmem:[#allocation14 + $0x544] ss:$24 sps:$4 sm:$0xff]  }
 0x19d   : > { %v1670_v1 = vadd.f32 %v1669_v55, %v1668_v23  ;;  %v7286_v23 = vld [vmem:[#allocation14 + $0x1b0] ss:$24 sps:$4 sm:$0xff]   ;;  %v1978_v47 = vsel %vm1965_vm1, %v1644_v13, %v1977_v9  ;;  %v1709_v21 = vrot.slane %v1708_v44, 4  ;;  %v1964_v51 = vsel %vm1963_vm0, %v8658_v15, %v8661_v34  ;;  %v7300_v15 = vld [vmem:[#allocation14 + $0x15c] ss:$24 sps:$4 sm:$0xff]  }
 0x19e   : > { %3230 = vmatpush1.bf16.msra.mxu0 %v7142_v18  ;;  %v1695_v8 = vrot.slane %v1694_v0, 4  ;;  %v1684_v18 = vadd.f32 %v1683_v4, %v1682_v58  ;;  %3201 = vmatpush2.bf16.msra.mxu1 %v7280_v12  ;;  %v1703_v54 = vadd.f32 %v1702_v43, %v1701_v29  ;;  %v1637_v50 = vadd.f32 %v1636_v16, %v8665_v53  ;;  %v7172_v13 = vld [vmem:[#allocation14 + $0x510] ss:$24 sps:$4 sm:$0xff]  }
 0x19f   : > { %3231 = vmatprep.subr.bf16.mxu0 %v7150_v38  ;;  %v1671_v20 = vrot.slane %v1670_v1, 1  ;;  %v1658_v38 = vadd.f32 %v1657_v63, %v1656_v36  ;;  %3202 = vmatprep.subr.bf16.mxu1 %v7288_v22  ;;  %v1690_v55 = vrot.slane %v1689_v39, 2  ;;  %v1677_v59 = vadd.f32 %v1676_v19, %v1675_v3  ;;  %v7174_v3 = vld [vmem:[#allocation14 + $0x514] ss:$24 sps:$4 sm:$0xff]  }
 0x1a0   : > { %v1696_v26 = vadd.f32 %v1695_v8, %v1694_v0  ;;  %v1685_v17 = vrot.slane %v1684_v18, 1  ;;  %v1710_v63 = vadd.f32 %v1709_v21, %v1708_v44  ;;  %v7292_v0 = vld [vmem:[#allocation14 + $0x180] ss:$24 sps:$4 sm:$0xff]   ;;  %v1664_v32 = vrot.slane %v1663_v45, 1  ;;  %v7192_v44 = vld [vmem:[#allocation14 + $0x484] ss:$24 sps:$4 sm:$0xff]  }
 0x1a1   : > { %v1672_v30 = vadd.f32 %v1671_v20, %v1670_v1  ;;  %v1979_v58 = vsel %vm1967_vm2, %v1658_v38, %v1978_v47  ;;  %v1704_v53 = vrot.slane %v1703_v54, 2  ;;  %v1966_v5 = vsel %vm1965_vm1, %v1637_v50, %v1964_v51  ;;  %v7198_v47 = vld [vmem:[#allocation14 + $0x45c] ss:$24 sps:$4 sm:$0xff]   ;;  %v7205_v51 = vld [vmem:[#allocation14 + $0x3f8] ss:$24 sps:$4 sm:$0xff]  }
 0x1a2   : > { %3232 = vmatpush2.bf16.msra.mxu0 %v7148_v35  ;;  %v1697_v42 = vrot.slane %v1696_v26, 2  ;;  %v1650_v35 = vrot.slane %v1649_v24, 1  ;;  %v1686_v60 = vadd.f32 %v1685_v17, %v1684_v18  ;;  %3203 = vmatpush2.bf16.msra.mxu1 %v7286_v23  ;;  %v1711_v4 = vrot.slane %v1710_v63, 2  ;;  %v7207_v21 = vld [vmem:[#allocation14 + $0x3fc] ss:$24 sps:$4 sm:$0xff]  }
 0x1a3   : > { %3233 = vmatprep.subr.bf16.mxu0 %v7156_v31  ;;  %v7166_v31 = vld [vmem:[#allocation14 + $0x540] ss:$24 sps:$4 sm:$0xff]   ;;  %v1980_v1 = vsel %vm1969_vm3, %v1672_v30, %v1979_v58  ;;  %3204 = vmatprep.subr.bf16.mxu1 %v7294_v49  ;;  %v1691_v7 = vadd.f32 %v1690_v55, %v1689_v39  ;;  %v1678_v8 = vrot.slane %v1677_v59, 1  ;;  %v1665_v12 = vadd.f32 %v1664_v32, %v1663_v45  ;;  %v7186_v39 = vld [vmem:[#allocation14 + $0x4b4] ss:$24 sps:$4 sm:$0xff]  }
 0x1a4   : > { %v1698_v36 = vadd.f32 %v1697_v42, %v1696_v26  ;;  %v1651_v34 = vadd.f32 %v1650_v35, %v1649_v24  ;;  %v1712_v10 = vadd.f32 %v1711_v4, %v1710_v63  ;;  %v1981_v11 = vsel %vm1971_vm4, %v1686_v60, %v1980_v1  ;;  %v7180_v24 = vld [vmem:[#allocation14 + $0x4e4] ss:$24 sps:$4 sm:$0xff]   ;;  %v7184_v42 = vld [vmem:[#allocation14 + $0x4b0] ss:$24 sps:$4 sm:$0xff]   ;;  %v7190_v30 = vld [vmem:[#allocation14 + $0x480] ss:$24 sps:$4 sm:$0xff]  }
 0x1a5   : > { %v1705_v20 = vadd.f32 %v1704_v53, %v1703_v54  ;;  %v1692_v22 = vrot.slane %v1691_v7, 1  ;;  %v1679_v26 = vadd.f32 %v1678_v8, %v1677_v59  ;;  %v7196_v49 = vld [vmem:[#allocation14 + $0x458] ss:$24 sps:$4 sm:$0xff]   ;;  %v7199_v54 = vld [vmem:[#allocation14 + $0x428] ss:$24 sps:$4 sm:$0xff]  }
 0x1a6   : > { %3234 = vmatpush2.bf16.msra.mxu0 %v7154_v25  ;;  %v1699_v61 = vrot.slane %v1698_v36, 1  ;;  %3205 = vmatpush2.bf16.msra.mxu1 %v7292_v0  ;;  %v1968_v14 = vsel %vm1967_vm2, %v1651_v34, %v1966_v5  ;;  %v1713_v18 = vrot.slane %v1712_v10, 1  ;;  %v7213_v50 = vld [vmem:[#allocation14 + $0x3cc] ss:$24 sps:$4 sm:$0xff]   ;;  %v7211_v55 = vld [vmem:[#allocation14 + $0x3c8] ss:$24 sps:$4 sm:$0xff]  }
 0x1a7   : > { %3235 = vmatprep.subr.bf16.mxu0 %v7162_v27  ;;  %3256 = vmatprep.subr.bf16.mxu1 %v7300_v15  ;;  %v1970_v29 = vsel %vm1969_vm3, %v1665_v12, %v1968_v14  ;;  %v1706_v16 = vrot.slane %v1705_v20, 1  ;;  %v1693_v19 = vadd.f32 %v1692_v22, %v1691_v7  ;;  %v7217_v58 = vld [vmem:[#allocation14 + $0x398] ss:$24 sps:$4 sm:$0xff]   ;;  %v7225_v59 = vld [vmem:[#allocation14 + $0x36c] ss:$24 sps:$4 sm:$0xff]  }
 0x1a8   : > { %v1700_v9 = vadd.f32 %v1699_v61, %v1698_v36  ;;  %v1714_v27 = vadd.f32 %v1713_v18, %v1712_v10  ;;  %v1972_v17 = vsel %vm1971_vm4, %v1679_v26, %v1970_v29  ;;  %v7201_v36 = vld [vmem:[#allocation14 + $0x42c] ss:$24 sps:$4 sm:$0xff]   ;;  %v7223_v60 = vld [vmem:[#allocation14 + $0x368] ss:$24 sps:$4 sm:$0xff]   ;;  %v7231_v61 = vld [vmem:[#allocation14 + $0x33c] ss:$24 sps:$4 sm:$0xff]  }
 0x1a9   : > { %v1707_v43 = vadd.f32 %v1706_v16, %v1705_v20  ;;  %v1974_v45 = vsel %vm1973_vm5, %v1693_v19, %v1972_v17  ;;  %v7229_v63 = vld [vmem:[#allocation14 + $0x338] ss:$24 sps:$4 sm:$0xff]   ;;  %v7235_v0 = vld [vmem:[#allocation14 + $0x308] ss:$24 sps:$4 sm:$0xff]   ;;  %v7243_v32 = vld [vmem:[#allocation14 + $0x5dc] ss:$24 sps:$4 sm:$0xff]  }
 0x1aa   : > { %3236 = vmatpush2.bf16.msra.mxu0 %v7160_v46  ;;  %v1982_v25 = vsel %vm1973_vm5, %v1700_v9, %v1981_v11  ;;  %v7241_v1 = vld [vmem:[#allocation14 + $0x5d8] ss:$24 sps:$4 sm:$0xff]   ;;  %v7249_v15 = vld [vmem:[#allocation14 + $0x5ac] ss:$24 sps:$4 sm:$0xff]   ;;  %v7247_v34 = vld [vmem:[#allocation14 + $0x5a8] ss:$24 sps:$4 sm:$0xff]  }
 0x1ab   : > { %3237 = vmatprep.subr.bf16.mxu0 %v7168_v57  ;;  %v1983_v38 = vsel %vm1975_vm6, %v1714_v27, %v1982_v25  ;;  %v1976_v46 = vsel %vm1975_vm6, %v1707_v43, %v1974_v45  ;;  %v7219_v57 = vld [vmem:[#allocation14 + $0x39c] ss:$24 sps:$4 sm:$0xff]   ;;  %v7253_v4 = vld [vmem:[#allocation14 + $0x578] ss:$24 sps:$4 sm:$0xff]   ;;  %v7261_v5 = vld [vmem:[#allocation14 + $0x54c] ss:$24 sps:$4 sm:$0xff]  }
 0x1ac   : > { %v8682_v23 = vpack.c.bf16 %v1983_v38, %v1983_v38  ;;  %v8688_v35 = vpack.c.bf16 %v1976_v46, %v1976_v46  ;;  %v7255_v53 = vld [vmem:[#allocation14 + $0x57c] ss:$24 sps:$4 sm:$0xff]   ;;  %v7259_v7 = vld [vmem:[#allocation14 + $0x548] ss:$24 sps:$4 sm:$0xff]   ;;  %v7265_v9 = vld [vmem:[#allocation14 + $0x518] ss:$24 sps:$4 sm:$0xff]  }
 0x1ad   : > { %v7273_v8 = vld [vmem:[#allocation14 + $0x4ec] ss:$24 sps:$4 sm:$0xff]   ;;  %v7271_v10 = vld [vmem:[#allocation14 + $0x4e8] ss:$24 sps:$4 sm:$0xff]   ;;  %v7279_v11 = vld [vmem:[#allocation14 + $0x4bc] ss:$24 sps:$4 sm:$0xff]  }
 0x1ae   : > { %3238 = vmatpush2.bf16.msra.mxu0 %v7166_v31  ;;  %3247 = vmatprep.mubr.bf16.mxu0 %v8682_v23  ;;  %v7237_v31 = vld [vmem:[#allocation14 + $0x30c] ss:$24 sps:$4 sm:$0xff]   ;;  %v7277_v12 = vld [vmem:[#allocation14 + $0x4b8] ss:$24 sps:$4 sm:$0xff]   ;;  %v7283_v14 = vld [vmem:[#allocation14 + $0x488] ss:$24 sps:$4 sm:$0xff]  }
 0x1af   : > { %3239 = vmatprep.subr.bf16.mxu0 %v7174_v3  ;;  %v7267_v3 = vld [vmem:[#allocation14 + $0x51c] ss:$24 sps:$4 sm:$0xff]   ;;  %v848_v18 = vld [vmem:[%s9708_s22] sm:$0x3f]  ;;  %v7289_v22 = vld [vmem:[#allocation14 + $0x460] ss:$24 sps:$4 sm:$0xff]  }
 0x1b0   : > { %v7291_v20 = vld [vmem:[#allocation14 + $0x464] ss:$24 sps:$4 sm:$0xff]   ;;  %v7297_v25 = vld [vmem:[#allocation14 + $0x434] ss:$24 sps:$4 sm:$0xff]   ;;  %v857_v26 = vrot.slane %v848_v18, %v8605_v40 }
 0x1b1   : > { %v7303_v29 = vld [vmem:[#allocation14 + $0x404] ss:$24 sps:$4 sm:$0xff]   ;;  %v7309_v45 = vld [vmem:[#allocation14 + $0x3d4] ss:$24 sps:$4 sm:$0xff]  }
 0x1b2   : > { %3240 = vmatpush2.bf16.msra.mxu0 %v7172_v13  ;;  %v7285_v13 = vld [vmem:[#allocation14 + $0x48c] ss:$24 sps:$4 sm:$0xff]  }
 0x1b3   : > { %3241 = vmatprep.subr.bf16.mxu0 %v7180_v24  ;;  %v853_v24 = vrot.slane %v848_v18, %v8608_v41  ;;  %v7306_v43 = vld [vmem:[#allocation14 + $0x12c] ss:$24 sps:$4 sm:$0xff]   ;;  %v7360_v18 = vld [vmem:[#allocation14 + $0x27c] ss:$24 sps:$4 sm:$0xff]  }
 0x1b6   : > { %3242 = vmatpush2.bf16.msra.mxu0 %v7178_v28  ;;  %v7295_v28 = vld [vmem:[#allocation14 + $0x430] ss:$24 sps:$4 sm:$0xff]  }
 0x1b7   : > { %3243 = vmatprep.subr.bf16.mxu0 %v7186_v39  ;;  %v7298_v39 = vld [vmem:[#allocation14 + $0x158] ss:$24 sps:$4 sm:$0xff]  }
 0x1ba   : > { %3244 = vmatpush2.bf16.msra.mxu0 %v7184_v42  ;;  %v7301_v42 = vld [vmem:[#allocation14 + $0x400] ss:$24 sps:$4 sm:$0xff]  }
 0x1bb   : > { %3245 = vmatprep.subr.bf16.mxu0 %v7192_v44 }
 0x1be   : > { %3246 = vmatpush2.bf16.msra.mxu0 %v7190_v30 }
 0x1bf   : > { %3297 = vmatprep.subr.bf16.mxu0 %v7198_v47  ;;  %v7307_v47 = vld [vmem:[#allocation14 + $0x3d0] ss:$24 sps:$4 sm:$0xff]  }
 0x1c1   : > { %3248 = vmatmul.mubr.bf16.vlgmr.msra.gmra.mxu0 %v8688_v35 }
 0x1c2   : > { %3298 = vmatpush1.bf16.msra.mxu0 %v7196_v49  ;;  %3329 = vmatprep.mubr.bf16.mxu0 %v8682_v23  ;;  %v7312_v49 = vld [vmem:[#allocation14 + $0xfc] ss:$24 sps:$4 sm:$0xff]  }
 0x1c3   : > { %3299 = vmatprep.subr.bf16.mxu0 %v7201_v36  ;;  %v7315_v36 = vld [vmem:[#allocation14 + $0x3a4] ss:$24 sps:$4 sm:$0xff]  }
 0x1c6   : > { %3300 = vmatpush1.bf16.msra.mxu0 %v7199_v54  ;;  %v7310_v54 = vld [vmem:[#allocation14 + $0xf8] ss:$24 sps:$4 sm:$0xff]  }
 0x1c7   : > { %3301 = vmatprep.subr.bf16.mxu0 %v7207_v21  ;;  %v7313_v21 = vld [vmem:[#allocation14 + $0x3a0] ss:$24 sps:$4 sm:$0xff]  }
 0x1ca   : > { %3302 = vmatpush1.bf16.msra.mxu0 %v7205_v51  ;;  %v7318_v51 = vld [vmem:[#allocation14 + $0xcc] ss:$24 sps:$4 sm:$0xff]  }
 0x1cb   : > { %3303 = vmatprep.subr.bf16.mxu0 %v7213_v50  ;;  %v7321_v50 = vld [vmem:[#allocation14 + $0x374] ss:$24 sps:$4 sm:$0xff]  }
 0x1ce   : > { %3304 = vmatpush1.bf16.msra.mxu0 %v7211_v55  ;;  %v7316_v55 = vld [vmem:[#allocation14 + $0xc8] ss:$24 sps:$4 sm:$0xff]  }
 0x1cf   : > { %3305 = vmatprep.subr.bf16.mxu0 %v7219_v57  ;;  %v7319_v57 = vld [vmem:[#allocation14 + $0x370] ss:$24 sps:$4 sm:$0xff]  }
 0x1d2   : > { %3306 = vmatpush1.bf16.msra.mxu0 %v7217_v58  ;;  %v7324_v58 = vld [vmem:[#allocation14 + $0x9c] ss:$24 sps:$4 sm:$0xff]  }
 0x1d3   : > { %3307 = vmatprep.subr.bf16.mxu0 %v7225_v59  ;;  %v7327_v59 = vld [vmem:[#allocation14 + $0x344] ss:$24 sps:$4 sm:$0xff]  }
 0x1d6   : > { %3308 = vmatpush1.bf16.msra.mxu0 %v7223_v60  ;;  %v7322_v60 = vld [vmem:[#allocation14 + $0x98] ss:$24 sps:$4 sm:$0xff]  }
 0x1d7   : > { %3309 = vmatprep.subr.bf16.mxu0 %v7231_v61  ;;  %v7325_v61 = vld [vmem:[#allocation14 + $0x340] ss:$24 sps:$4 sm:$0xff]  }
 0x1da   : > { %3310 = vmatpush1.bf16.msra.mxu0 %v7229_v63  ;;  %v7330_v63 = vld [vmem:[#allocation14 + $0x6c] ss:$24 sps:$4 sm:$0xff]  }
 0x1db   : > { %3311 = vmatprep.subr.bf16.mxu0 %v7237_v31  ;;  %v7333_v31 = vld [vmem:[#allocation14 + $0x314] ss:$24 sps:$4 sm:$0xff]  }
 0x1de   : > { %3312 = vmatpush1.bf16.msra.mxu0 %v7235_v0  ;;  %v7328_v0 = vld [vmem:[#allocation14 + $0x68] ss:$24 sps:$4 sm:$0xff]  }
 0x1df   : > { %3313 = vmatprep.subr.bf16.mxu0 %v7243_v32  ;;  %v7331_v32 = vld [vmem:[#allocation14 + $0x310] ss:$24 sps:$4 sm:$0xff]  }
 0x1e2   : > { %3314 = vmatpush2.bf16.msra.mxu0 %v7241_v1  ;;  %v7336_v1 = vld [vmem:[#allocation14 + $0x3c] ss:$24 sps:$4 sm:$0xff]  }
 0x1e3   : > { %3315 = vmatprep.subr.bf16.mxu0 %v7249_v15  ;;  %v7339_v15 = vld [vmem:[#allocation14 + $0x5e4] ss:$24 sps:$4 sm:$0xff]  }
 0x1e6   : > { %3316 = vmatpush2.bf16.msra.mxu0 %v7247_v34  ;;  %v7334_v34 = vld [vmem:[#allocation14 + $0x38] ss:$24 sps:$4 sm:$0xff]  }
 0x1e7   : > { %3317 = vmatprep.subr.bf16.mxu0 %v7255_v53  ;;  %v7337_v53 = vld [vmem:[#allocation14 + $0x5e0] ss:$24 sps:$4 sm:$0xff]  }
 0x1ea   : > { %3318 = vmatpush2.bf16.msra.mxu0 %v7253_v4  ;;  %v7342_v4 = vld [vmem:[#allocation14 + $0xc] ss:$24 sps:$4 sm:$0xff]  }
 0x1eb   : > { %3319 = vmatprep.subr.bf16.mxu0 %v7261_v5  ;;  %v7345_v5 = vld [vmem:[#allocation14 + $0x5b4] ss:$24 sps:$4 sm:$0xff]  }
 0x1ee   : > { %3320 = vmatpush2.bf16.msra.mxu0 %v7259_v7  ;;  %v7340_v7 = vld [vmem:[#allocation14 + $0x8] ss:$24 sps:$4 sm:$0xff]  }
 0x1ef   : > { %3321 = vmatprep.subr.bf16.mxu0 %v7267_v3  ;;  %v7343_v3 = vld [vmem:[#allocation14 + $0x5b0] ss:$24 sps:$4 sm:$0xff]  }
 0x1f2   : > { %3322 = vmatpush2.bf16.msra.mxu0 %v7265_v9  ;;  %v7348_v9 = vld [vmem:[#allocation14 + $0x2dc] ss:$24 sps:$4 sm:$0xff]  }
 0x1f3   : > { %3323 = vmatprep.subr.bf16.mxu0 %v7273_v8  ;;  %v7351_v8 = vld [vmem:[#allocation14 + $0x584] ss:$24 sps:$4 sm:$0xff]  }
 0x1f6   : > { %3324 = vmatpush2.bf16.msra.mxu0 %v7271_v10  ;;  %v7346_v10 = vld [vmem:[#allocation14 + $0x2d8] ss:$24 sps:$4 sm:$0xff]  }
 0x1f7   : > { %3325 = vmatprep.subr.bf16.mxu0 %v7279_v11  ;;  %v7349_v11 = vld [vmem:[#allocation14 + $0x580] ss:$24 sps:$4 sm:$0xff]  }
 0x1fa   : > { %3326 = vmatpush2.bf16.msra.mxu0 %v7277_v12  ;;  %v7354_v12 = vld [vmem:[#allocation14 + $0x2ac] ss:$24 sps:$4 sm:$0xff]  }
 0x1fb   : > { %3327 = vmatprep.subr.bf16.mxu0 %v7285_v13  ;;  %v7357_v13 = vld [vmem:[#allocation14 + $0x554] ss:$24 sps:$4 sm:$0xff]  }
 0x1fe   : > { %3328 = vmatpush2.bf16.msra.mxu0 %v7283_v14  ;;  %v7352_v14 = vld [vmem:[#allocation14 + $0x2a8] ss:$24 sps:$4 sm:$0xff]  }
 0x1ff   : > { %3379 = vmatprep.subr.bf16.mxu0 %v7291_v20  ;;  %v7355_v20 = vld [vmem:[#allocation14 + $0x550] ss:$24 sps:$4 sm:$0xff]  }
 0x201   : > { %v1394_v27 = vpop.f32.mrf.mxu0  ;;  %3330 = vmatmul.mubr.bf16.vlgmr.msra.gmra.mxu0 %v8688_v35 }
 0x202   : > { %3380 = vmatpush1.bf16.msra.mxu0 %v7289_v22  ;;  %3411 = vmatprep.mubr.bf16.mxu0 %v8682_v23  ;;  %v1395_v16 = vadd.f32 %v1394_v27, %v853_v24  ;;  %v7304_v23 = vld [vmem:[#allocation14 + $0x128] ss:$24 sps:$4 sm:$0xff]   ;;  %v7363_v22 = vld [vmem:[#allocation14 + $0x524] ss:$24 sps:$4 sm:$0xff]   ;;  %v7358_v24 = vld [vmem:[#allocation14 + $0x278] ss:$24 sps:$4 sm:$0xff]  }
 0x203   : > { %v1396_v38 = vpop.f32.mrf.mxu0  ;;  %3381 = vmatprep.subr.bf16.mxu0 %v7297_v25  ;;  %v7361_v25 = vld [vmem:[#allocation14 + $0x520] ss:$24 sps:$4 sm:$0xff]  }
 0x204   : > { %v1397_v19 = vadd.f32 %v1396_v38, %v857_v26  ;;  %v8701_v30 = vpack.c.bf16 %v1395_v16, %v1395_v16  ;;  %v7366_v26 = vld [vmem:[#allocation14 + $0x24c] ss:$24 sps:$4 sm:$0xff]   ;;  %v7364_v16 = vld [vmem:[#allocation14 + $0x248] ss:$24 sps:$4 sm:$0xff]  }
 0x205   : > { %v1398_v17 = vpop.f32.mrf.mxu0  ;;  %v7367_v38 = vld [vmem:[#allocation14 + $0x4f0] ss:$24 sps:$4 sm:$0xff]  }
 0x206   : > { %v8699_v44 = vpack.c.bf16 %v1397_v19, %v1397_v19  ;;  %3382 = vmatpush1.bf16.msra.mxu0 %v7295_v28  ;;  %v7369_v28 = vld [vmem:[#allocation14 + $0x4f4] ss:$24 sps:$4 sm:$0xff]   ;;  %v7375_v17 = vld [vmem:[#allocation14 + $0x4c4] ss:$24 sps:$4 sm:$0xff]  }
 0x207   : > { %v1399_v46 = vpop.f32.mrf.mxu0  ;;  %3383 = vmatprep.subr.bf16.mxu0 %v7303_v29  ;;  %v7372_v19 = vld [vmem:[#allocation14 + $0x21c] ss:$24 sps:$4 sm:$0xff]  }
 0x208   : > { %3206 = vmatprep.mubr.bf16.mxu1 %v8699_v44  ;;  %v7378_v46 = vld [vmem:[#allocation14 + $0x1ec] ss:$24 sps:$4 sm:$0xff]  }
 0x209   : > { %3207 = vmatmul.mubr.bf16.vlgmr.msra.gmra.mxu1 %v8701_v30 }
 0x20a   : > { %3257 = vmatpush1.bf16.msra.mxu1 %v7298_v39  ;;  %3288 = vmatprep.mubr.bf16.mxu1 %v8699_v44 }
 0x20b   : > { %3384 = vmatpush1.bf16.msra.mxu0 %v7301_v42  ;;  %3258 = vmatprep.subr.bf16.mxu1 %v7306_v43  ;;  %v7370_v43 = vld [vmem:[#allocation14 + $0x218] ss:$24 sps:$4 sm:$0xff]  }
 0x20c   : > { %3385 = vmatprep.subr.bf16.mxu0 %v7309_v45  ;;  %v7373_v45 = vld [vmem:[#allocation14 + $0x4c0] ss:$24 sps:$4 sm:$0xff]  }
 0x20e   : > { %3259 = vmatpush1.bf16.msra.mxu1 %v7304_v23  ;;  %v8706_v27 = vpop.f32.mrf.mxu1  ;;  %v7381_v23 = vld [vmem:[#allocation14 + $0x494] ss:$24 sps:$4 sm:$0xff]  }
 0x20f   : > { %3386 = vmatpush1.bf16.msra.mxu0 %v7307_v47  ;;  %3260 = vmatprep.subr.bf16.mxu1 %v7312_v49  ;;  %9709 = vst [vmem:[#allocation44_spill] sm:$0xff] %v8706_v27  ;;  %v7376_v47 = vld [vmem:[#allocation14 + $0x1e8] ss:$24 sps:$4 sm:$0xff]  }
 0x210   : > { %3387 = vmatprep.subr.bf16.mxu0 %v7315_v36  ;;  %v8708_v29 = vpop.f32.mrf.mxu1  ;;  %v7379_v49 = vld [vmem:[#allocation14 + $0x490] ss:$24 sps:$4 sm:$0xff]   ;;  %v7384_v36 = vld [vmem:[#allocation14 + $0x1bc] ss:$24 sps:$4 sm:$0xff]  }
 0x211   : > { %9710 = vst [vmem:[#allocation45_spill] sm:$0xff] %v8708_v29  ;;  %v9118_v29 = vld [vmem:[#allocation2 + $0x20] sm:$0xff] }
 0x212   : > { %3261 = vmatpush1.bf16.msra.mxu1 %v7310_v54  ;;  %v1439_v39 = vpop.f32.mrf.mxu1  ;;  %v7387_v54 = vld [vmem:[#allocation15 + $0x174] ss:$8 sps:$4 sm:$0xff]   ;;  %9722 = vst [vmem:[#allocation56_spill] sm:$0xff] %v9118_v29 }
 0x213   : > { %3388 = vmatpush1.bf16.msra.mxu0 %v7313_v21  ;;  %3262 = vmatprep.subr.bf16.mxu1 %v7318_v51  ;;  %v7382_v21 = vld [vmem:[#allocation14 + $0x1b8] ss:$24 sps:$4 sm:$0xff]  }
 0x214   : > { %3389 = vmatprep.subr.bf16.mxu0 %v7321_v50  ;;  %v1440_v42 = vpop.f32.mrf.mxu1  ;;  %v7385_v51 = vld [vmem:[#allocation15 + $0x170] ss:$8 sps:$4 sm:$0xff]   ;;  %v7390_v50 = vld [vmem:[#allocation14 + $0x18c] ss:$24 sps:$4 sm:$0xff]  }
 0x215   : > { %v7436_v39 = vld [vmem:[#allocation14 + $0x10] ss:$24 sps:$4 sm:$0xff]   ;;  %v7444_v42 = vld [vmem:[#allocation14 + $0x2e4] ss:$24 sps:$4 sm:$0xff]  }
 0x216   : > { %3263 = vmatpush1.bf16.msra.mxu1 %v7316_v55  ;;  %v7393_v55 = vld [vmem:[#allocation15 + $0x164] ss:$8 sps:$4 sm:$0xff]  }
 0x217   : > { %3390 = vmatpush1.bf16.msra.mxu0 %v7319_v57  ;;  %3264 = vmatprep.subr.bf16.mxu1 %v7324_v58  ;;  %v7388_v58 = vld [vmem:[#allocation14 + $0x188] ss:$24 sps:$4 sm:$0xff]  }
 0x218   : > { %3391 = vmatprep.subr.bf16.mxu0 %v7327_v59  ;;  %v7391_v59 = vld [vmem:[#allocation15 + $0x160] ss:$8 sps:$4 sm:$0xff]  }
 0x21a   : > { %3265 = vmatpush1.bf16.msra.mxu1 %v7322_v60  ;;  %v7396_v60 = vld [vmem:[#allocation14 + $0x164] ss:$24 sps:$4 sm:$0xff]  }
 0x21b   : > { %3392 = vmatpush1.bf16.msra.mxu0 %v7325_v61  ;;  %3266 = vmatprep.subr.bf16.mxu1 %v7330_v63  ;;  %v7399_v63 = vld [vmem:[#allocation15 + $0x154] ss:$8 sps:$4 sm:$0xff]  }
 0x21c   : > { %3393 = vmatprep.subr.bf16.mxu0 %v7333_v31 }
 0x21e   : > { %3267 = vmatpush1.bf16.msra.mxu1 %v7328_v0  ;;  %v7394_v0 = vld [vmem:[#allocation14 + $0x160] ss:$24 sps:$4 sm:$0xff]  }
 0x21f   : > { %3394 = vmatpush1.bf16.msra.mxu0 %v7331_v32  ;;  %3268 = vmatprep.subr.bf16.mxu1 %v7336_v1  ;;  %v7397_v32 = vld [vmem:[#allocation15 + $0x150] ss:$8 sps:$4 sm:$0xff]   ;;  %v7402_v1 = vld [vmem:[#allocation14 + $0x134] ss:$24 sps:$4 sm:$0xff]  }
 0x220   : > { %3395 = vmatprep.subr.bf16.mxu0 %v7339_v15 }
 0x222   : > { %3269 = vmatpush1.bf16.msra.mxu1 %v7334_v34  ;;  %v7400_v34 = vld [vmem:[#allocation14 + $0x130] ss:$24 sps:$4 sm:$0xff]  }
 0x223   : > { %3396 = vmatpush2.bf16.msra.mxu0 %v7337_v53  ;;  %3270 = vmatprep.subr.bf16.mxu1 %v7342_v4  ;;  %v7403_v53 = vld [vmem:[#allocation15 + $0x140] ss:$8 sps:$4 sm:$0xff]   ;;  %v7408_v4 = vld [vmem:[#allocation14 + $0x104] ss:$24 sps:$4 sm:$0xff]  }
 0x224   : > { %3397 = vmatprep.subr.bf16.mxu0 %v7345_v5  ;;  %v7411_v5 = vld [vmem:[#allocation15 + $0x134] ss:$8 sps:$4 sm:$0xff]  }
 0x226   : > { %3271 = vmatpush1.bf16.msra.mxu1 %v7340_v7  ;;  %v7406_v7 = vld [vmem:[#allocation14 + $0x100] ss:$24 sps:$4 sm:$0xff]  }
 0x227   : > { %3398 = vmatpush2.bf16.msra.mxu0 %v7343_v3  ;;  %3272 = vmatprep.subr.bf16.mxu1 %v7348_v9  ;;  %v7409_v3 = vld [vmem:[#allocation15 + $0x130] ss:$8 sps:$4 sm:$0xff]   ;;  %v7414_v9 = vld [vmem:[#allocation14 + $0xd4] ss:$24 sps:$4 sm:$0xff]  }
 0x228   : > { %3399 = vmatprep.subr.bf16.mxu0 %v7351_v8  ;;  %v7417_v8 = vld [vmem:[#allocation15 + $0x124] ss:$8 sps:$4 sm:$0xff]  }
 0x22a   : > { %3273 = vmatpush2.bf16.msra.mxu1 %v7346_v10  ;;  %v7412_v10 = vld [vmem:[#allocation14 + $0xd0] ss:$24 sps:$4 sm:$0xff]  }
 0x22b   : > { %3400 = vmatpush2.bf16.msra.mxu0 %v7349_v11  ;;  %3274 = vmatprep.subr.bf16.mxu1 %v7354_v12  ;;  %v7420_v11 = vld [vmem:[#allocation14 + $0xa4] ss:$24 sps:$4 sm:$0xff]  }
 0x22c   : > { %3401 = vmatprep.subr.bf16.mxu0 %v7357_v13  ;;  %v7423_v12 = vld [vmem:[#allocation15 + $0x114] ss:$8 sps:$4 sm:$0xff]   ;;  %v7418_v13 = vld [vmem:[#allocation14 + $0xa0] ss:$24 sps:$4 sm:$0xff]  }
 0x22e   : > { %3275 = vmatpush2.bf16.msra.mxu1 %v7352_v14  ;;  %v7421_v14 = vld [vmem:[#allocation15 + $0x110] ss:$8 sps:$4 sm:$0xff]  }
 0x22f   : > { %3402 = vmatpush2.bf16.msra.mxu0 %v7355_v20  ;;  %3276 = vmatprep.subr.bf16.mxu1 %v7360_v18  ;;  %v7426_v20 = vld [vmem:[#allocation14 + $0x74] ss:$24 sps:$4 sm:$0xff]  }
 0x230   : > { %3403 = vmatprep.subr.bf16.mxu0 %v7363_v22  ;;  %v7429_v18 = vld [vmem:[#allocation15 + $0x104] ss:$8 sps:$4 sm:$0xff]   ;;  %v7424_v22 = vld [vmem:[#allocation14 + $0x70] ss:$24 sps:$4 sm:$0xff]  }
 0x232   : > { %3277 = vmatpush2.bf16.msra.mxu1 %v7358_v24  ;;  %v7427_v24 = vld [vmem:[#allocation15 + $0x100] ss:$8 sps:$4 sm:$0xff]  }
 0x233   : > { %3404 = vmatpush2.bf16.msra.mxu0 %v7361_v25  ;;  %3278 = vmatprep.subr.bf16.mxu1 %v7366_v26  ;;  %v7432_v25 = vld [vmem:[#allocation14 + $0x44] ss:$24 sps:$4 sm:$0xff]  }
 0x234   : > { %3405 = vmatprep.subr.bf16.mxu0 %v7369_v28  ;;  %v7435_v26 = vld [vmem:[#allocation15 + $0x1f4] ss:$8 sps:$4 sm:$0xff]   ;;  %v7430_v28 = vld [vmem:[#allocation14 + $0x40] ss:$24 sps:$4 sm:$0xff]  }
 0x236   : > { %3279 = vmatpush2.bf16.msra.mxu1 %v7364_v16  ;;  %v7433_v16 = vld [vmem:[#allocation15 + $0x1f0] ss:$8 sps:$4 sm:$0xff]  }
 0x237   : > { %3406 = vmatpush2.bf16.msra.mxu0 %v7367_v38  ;;  %3280 = vmatprep.subr.bf16.mxu1 %v7372_v19  ;;  %v7438_v38 = vld [vmem:[#allocation14 + $0x14] ss:$24 sps:$4 sm:$0xff]  }
 0x238   : > { %3407 = vmatprep.subr.bf16.mxu0 %v7375_v17  ;;  %v7441_v19 = vld [vmem:[#allocation15 + $0x1e4] ss:$8 sps:$4 sm:$0xff]   ;;  %v7439_v17 = vld [vmem:[#allocation15 + $0x1e0] ss:$8 sps:$4 sm:$0xff]  }
 0x23a   : > { %3281 = vmatpush2.bf16.msra.mxu1 %v7370_v43  ;;  %v7447_v43 = vld [vmem:[#allocation15 + $0x1d4] ss:$8 sps:$4 sm:$0xff]  }
 0x23b   : > { %3408 = vmatpush2.bf16.msra.mxu0 %v7373_v45  ;;  %3282 = vmatprep.subr.bf16.mxu1 %v7378_v46  ;;  %v7442_v45 = vld [vmem:[#allocation14 + $0x2e0] ss:$24 sps:$4 sm:$0xff]  }
 0x23c   : > { %3409 = vmatprep.subr.bf16.mxu0 %v7381_v23  ;;  %v7445_v46 = vld [vmem:[#allocation15 + $0x1d0] ss:$8 sps:$4 sm:$0xff]   ;;  %v7450_v23 = vld [vmem:[#allocation14 + $0x2b4] ss:$24 sps:$4 sm:$0xff]  }
 0x23e   : > { %3283 = vmatpush2.bf16.msra.mxu1 %v7376_v47  ;;  %v7453_v47 = vld [vmem:[#allocation15 + $0x1c4] ss:$8 sps:$4 sm:$0xff]  }
 0x23f   : > { %3410 = vmatpush2.bf16.msra.mxu0 %v7379_v49  ;;  %3284 = vmatprep.subr.bf16.mxu1 %v7384_v36  ;;  %v7448_v49 = vld [vmem:[#allocation14 + $0x2b0] ss:$24 sps:$4 sm:$0xff]  }
 0x240   : > { %4933 = vmatprep.subr.bf16.mxu0 %v7387_v54  ;;  %v7451_v36 = vld [vmem:[#allocation15 + $0x1c0] ss:$8 sps:$4 sm:$0xff]   ;;  %v7456_v54 = vld [vmem:[#allocation14 + $0x284] ss:$24 sps:$4 sm:$0xff]  }
 0x241   : > { %v8710_v57 = vpop.f32.mrf.mxu0 }
 0x242   : > { %9711 = vst [vmem:[#allocation46_spill] sm:$0xff] %v8710_v57  ;;  %3285 = vmatpush2.bf16.msra.mxu1 %v7382_v21  ;;  %3412 = vmatmul.mubr.bf16.vlgmr.msra.gmra.mxu0 %v8688_v35  ;;  %v7405_v35 = vld [vmem:[#allocation15 + $0x144] ss:$8 sps:$4 sm:$0xff]   ;;  %v7459_v21 = vld [vmem:[#allocation15 + $0x1b4] ss:$8 sps:$4 sm:$0xff]  }
 0x243   : > { %4934 = vmatpush1.bf16.msra.mxu0 %v7385_v51  ;;  %4965 = vmatprep.mubr.bf16.mxu0 %v8699_v44  ;;  %v8714_v61 = vpop.f32.mrf.mxu0  ;;  %v7454_v51 = vld [vmem:[#allocation14 + $0x280] ss:$24 sps:$4 sm:$0xff]  }
 0x244   : > { %9712 = vst [vmem:[#allocation47_spill] sm:$0xff] %v8714_v61  ;;  %3286 = vmatprep.subr.bf16.mxu1 %v7390_v50  ;;  %4935 = vmatprep.subr.bf16.mxu0 %v7393_v55  ;;  %v7457_v50 = vld [vmem:[#allocation15 + $0x1b0] ss:$8 sps:$4 sm:$0xff]   ;;  %v7462_v55 = vld [vmem:[#allocation14 + $0x254] ss:$24 sps:$4 sm:$0xff]  }
 0x245   : > { %v1480_v31 = vpop.f32.mrf.mxu0 }
 0x246   : > { %3287 = vmatpush2.bf16.msra.mxu1 %v7388_v58  ;;  %v7465_v58 = vld [vmem:[#allocation15 + $0x1a4] ss:$8 sps:$4 sm:$0xff]   ;;  %v7471_v31 = vld [vmem:[#allocation15 + $0x194] ss:$8 sps:$4 sm:$0xff]  }
 0x247   : > { %4936 = vmatpush1.bf16.msra.mxu0 %v7391_v59  ;;  %3338 = vmatprep.subr.bf16.mxu1 %v7396_v60  ;;  %v1481_v15 = vpop.f32.mrf.mxu0  ;;  %v7460_v59 = vld [vmem:[#allocation14 + $0x250] ss:$24 sps:$4 sm:$0xff]  }
 0x248   : > { %4937 = vmatprep.subr.bf16.mxu0 %v7399_v63  ;;  %v7463_v60 = vld [vmem:[#allocation15 + $0x1a0] ss:$8 sps:$4 sm:$0xff]   ;;  %v7468_v63 = vld [vmem:[#allocation14 + $0x224] ss:$24 sps:$4 sm:$0xff]  }
 0x249   : > { %3289 = vmatmul.mubr.bf16.vlgmr.msra.gmra.mxu1 %v8701_v30  ;;  %v7477_v15 = vld [vmem:[#allocation15 + $0x184] ss:$8 sps:$4 sm:$0xff]  }
 0x24a   : > { %3339 = vmatpush1.bf16.msra.mxu1 %v7394_v0  ;;  %3370 = vmatprep.mubr.bf16.mxu1 %v8699_v44  ;;  %v7415_v44 = vld [vmem:[#allocation15 + $0x120] ss:$8 sps:$4 sm:$0xff]  }
 0x24b   : > { %4938 = vmatpush1.bf16.msra.mxu0 %v7397_v32  ;;  %3340 = vmatprep.subr.bf16.mxu1 %v7402_v1  ;;  %v7466_v0 = vld [vmem:[#allocation14 + $0x220] ss:$24 sps:$4 sm:$0xff]   ;;  %v7474_v1 = vld [vmem:[#allocation14 + $0x1f4] ss:$24 sps:$4 sm:$0xff]  }
 0x24c   : > { %4939 = vmatprep.subr.bf16.mxu0 %v7405_v35  ;;  %v7469_v32 = vld [vmem:[#allocation15 + $0x190] ss:$8 sps:$4 sm:$0xff]  }
 0x24d   : > { %v7472_v35 = vld [vmem:[#allocation14 + $0x1f0] ss:$24 sps:$4 sm:$0xff]  }
 0x24e   : > { %3341 = vmatpush1.bf16.msra.mxu1 %v7400_v34  ;;  %v7475_v34 = vld [vmem:[#allocation15 + $0x180] ss:$8 sps:$4 sm:$0xff]  }
 0x24f   : > { %4940 = vmatpush1.bf16.msra.mxu0 %v7403_v53  ;;  %3342 = vmatprep.subr.bf16.mxu1 %v7408_v4  ;;  %v7480_v53 = vld [vmem:[#allocation14 + $0x1c4] ss:$24 sps:$4 sm:$0xff]   ;;  %v7478_v4 = vld [vmem:[#allocation14 + $0x1c0] ss:$24 sps:$4 sm:$0xff]  }
 0x250   : > { %4941 = vmatprep.subr.bf16.mxu0 %v7411_v5  ;;  %v7483_v5 = vld [vmem:[#allocation14 + $0x194] ss:$24 sps:$4 sm:$0xff]  }
 0x252   : > { %3343 = vmatpush1.bf16.msra.mxu1 %v7406_v7 }
 0x253   : > { %4942 = vmatpush1.bf16.msra.mxu0 %v7409_v3  ;;  %3344 = vmatprep.subr.bf16.mxu1 %v7414_v9  ;;  %v7481_v3 = vld [vmem:[#allocation14 + $0x190] ss:$24 sps:$4 sm:$0xff]  }
 0x254   : > { %4943 = vmatprep.subr.bf16.mxu0 %v7417_v8 }
 0x256   : > { %3345 = vmatpush1.bf16.msra.mxu1 %v7412_v10 }
 0x257   : > { %4944 = vmatpush1.bf16.msra.mxu0 %v7415_v44  ;;  %3346 = vmatprep.subr.bf16.mxu1 %v7420_v11  ;;  %v8721_v44 = vld [vmem:[%s8540_s5 + $0x10] sm:$0xff] }
 0x258   : > { %4945 = vmatprep.subr.bf16.mxu0 %v7423_v12  ;;  %v3668_v11 = vrot.slane %v8721_v44, %v8608_v41  ;;  %v3679_v12 = vrot.slane %v8721_v44, %v8605_v40 }
 0x25a   : > { %3347 = vmatpush1.bf16.msra.mxu1 %v7418_v13  ;;  %3670 = vbcast.lane.b32.xlu1 %v3668_v11, 256 }
 0x25b   : > { %4946 = vmatpush1.bf16.msra.mxu0 %v7421_v14  ;;  %3348 = vmatprep.subr.bf16.mxu1 %v7426_v20 }
 0x25c   : > { %4947 = vmatprep.subr.bf16.mxu0 %v7429_v18  ;;  %3674 = vbcast.lane.b32.xlu0 %v3668_v11, 264 }
 0x25e   : > { %3349 = vmatpush1.bf16.msra.mxu1 %v7424_v22  ;;  %3681 = vbcast.lane.b32.xlu1 %v3679_v12, 256  ;;  %v3690_v22 = vrot.slane %v8721_v44, %v8614_v48 }
 0x25f   : > { %4948 = vmatpush1.bf16.msra.mxu0 %v7427_v24  ;;  %3350 = vmatprep.subr.bf16.mxu1 %v7432_v25  ;;  %v3701_v25 = vrot.slane %v8721_v44, %v8618_v52 }
 0x260   : > { %4949 = vmatprep.subr.bf16.mxu0 %v7435_v26  ;;  %3692 = vbcast.lane.b32.xlu0 %v3690_v22, 256 }
 0x262   : > { %3351 = vmatpush1.bf16.msra.mxu1 %v7430_v28  ;;  %3685 = vbcast.lane.b32.xlu1 %v3679_v12, 264 }
 0x263   : > { %4950 = vmatpush2.bf16.msra.mxu0 %v7433_v16  ;;  %3352 = vmatprep.subr.bf16.mxu1 %v7438_v38  ;;  %v3712_v16 = vrot.slane %v8721_v44, %v8622_v56  ;;  %v3723_v38 = vrot.slane %v8721_v44, %v8630_v62 }
 0x264   : > { %4951 = vmatprep.subr.bf16.mxu0 %v7441_v19  ;;  %3703 = vbcast.lane.b32.xlu0 %v3701_v25, 256  ;;  %v3734_v19 = vrot.slane %v8721_v44, %v8635_v2 }
 0x266   : > { %3353 = vmatpush1.bf16.msra.mxu1 %v7436_v39  ;;  %3696 = vbcast.lane.b32.xlu1 %v3690_v22, 264  ;;  %v2182_v39 = vld [vmem:[%s9713_s7] sm:$0x3f]  ;;  %s9802_s7 = sld [smem:[#allocation77_spill]] }
 0x267   : > { %4952 = vmatpush2.bf16.msra.mxu0 %v7439_v17  ;;  %3354 = vmatprep.subr.bf16.mxu1 %v7444_v42  ;;  %v2187_v17 = vrot.slane %v2182_v39, %v8608_v41  ;;  %v2191_v42 = vrot.slane %v2182_v39, %v8605_v40 }
 0x268   : > { %4953 = vmatprep.subr.bf16.mxu0 %v7447_v43  ;;  %3714 = vbcast.lane.b32.xlu0 %v3712_v16, 256 }
 0x26a   : > { %3355 = vmatpush2.bf16.msra.mxu1 %v7442_v45  ;;  %3707 = vbcast.lane.b32.xlu1 %v3701_v25, 264 }
 0x26b   : > { %4954 = vmatpush2.bf16.msra.mxu0 %v7445_v46  ;;  %3356 = vmatprep.subr.bf16.mxu1 %v7450_v23 }
 0x26c   : > { %4955 = vmatprep.subr.bf16.mxu0 %v7453_v47  ;;  %3725 = vbcast.lane.b32.xlu0 %v3723_v38, 256  ;;  %s6084_s14 = scalar_lea.hbm %s9802_s7, %s6745_s23 }
 0x26e   : > { %3357 = vmatpush2.bf16.msra.mxu1 %v7448_v49  ;;  %3718 = vbcast.lane.b32.xlu1 %v3712_v16, 264 }
 0x26f   : > { %4956 = vmatpush2.bf16.msra.mxu0 %v7451_v36  ;;  %3358 = vmatprep.subr.bf16.mxu1 %v7456_v54 }
 0x270   : > { %4957 = vmatprep.subr.bf16.mxu0 %v7459_v21  ;;  %3736 = vbcast.lane.b32.xlu0 %v3734_v19, 256 }
 0x272   : > { %3359 = vmatpush2.bf16.msra.mxu1 %v7454_v51  ;;  %3729 = vbcast.lane.b32.xlu1 %v3723_v38, 264 }
 0x273   : > { %4958 = vmatpush2.bf16.msra.mxu0 %v7457_v50  ;;  %3360 = vmatprep.subr.bf16.mxu1 %v7462_v55  ;;  %v2195_v50 = vrot.slane %v2182_v39, %v8614_v48 }
 0x274   : > { %4959 = vmatprep.subr.bf16.mxu0 %v7465_v58 }
 0x276   : > { %3361 = vmatpush2.bf16.msra.mxu1 %v7460_v59  ;;  %3740 = vbcast.lane.b32.xlu1 %v3734_v19, 264  ;;  %v2199_v59 = vrot.slane %v2182_v39, %v8618_v52 }
 0x277   : > { %4960 = vmatpush2.bf16.msra.mxu0 %v7463_v60  ;;  %3362 = vmatprep.subr.bf16.mxu1 %v7468_v63 }
 0x278   : > { %4961 = vmatprep.subr.bf16.mxu0 %v7471_v31 }
 0x27a   : > { %3363 = vmatpush2.bf16.msra.mxu1 %v7466_v0 }
 0x27b   : > { %4962 = vmatpush2.bf16.msra.mxu0 %v7469_v32  ;;  %3364 = vmatprep.subr.bf16.mxu1 %v7474_v1 }
 0x27c   : > { %4963 = vmatprep.subr.bf16.mxu0 %v7477_v15 }
 0x27e   : > { %3365 = vmatpush2.bf16.msra.mxu1 %v7472_v35 }
 0x27f   : > { %4964 = vmatpush2.bf16.msra.mxu0 %v7475_v34  ;;  %3366 = vmatprep.subr.bf16.mxu1 %v7480_v53 }
 0x281   : > { %v3249_v7 = vpop.f32.mrf.mxu0 }
 0x282   : > { %3367 = vmatpush2.bf16.msra.mxu1 %v7478_v4  ;;  %4966 = vmatmul.mubr.bf16.vlgmr.msra.gmra.mxu0 %v8701_v30 }
 0x283   : > { %3368 = vmatprep.subr.bf16.mxu1 %v7483_v5  ;;  %v3251_v9 = vpop.f32.mrf.mxu0 }
 0x285   : > { %v3253_v8 = vpop.f32.mrf.mxu0 }
 0x286   : > { %3369 = vmatpush2.bf16.msra.mxu1 %v7481_v3 }
 0x287   : > { %v3254_v10 = vpop.f32.mrf.mxu0 }
 0x289   : > { %3371 = vmatmul.mubr.bf16.vlgmr.msra.gmra.mxu1 %v8701_v30 }
 0x2c1   : > { %v3331_v13 = vpop.f32.mrf.mxu0 }
 0x2c3   : > { %v3333_v14 = vpop.f32.mrf.mxu0 }
 0x2c5   : > { %v3335_v20 = vpop.f32.mrf.mxu0 }
 0x2c7   : > { %v3336_v18 = vpop.f32.mrf.mxu0 }
 0x2c8   : > { %v2207_v18 = vrot.slane %v2182_v39, %v8630_v62 }
 0x2c9   : > { %v3208_v30 = vpop.f32.mrf.mxu1 }
 0x2ca   : > { %v3209_v43 = vadd.f32 %v3208_v30, %v2187_v17 }
 0x2cb   : > { %v3210_v24 = vpop.f32.mrf.mxu1 }
 0x2cc   : > { %v3211_v45 = vadd.f32 %v3210_v24, %v2191_v42  ;;  %v3250_v46 = vadd.f32 %v3249_v7, %v3209_v43 }
 0x2cd   : > { %v3212_v26 = vpop.f32.mrf.mxu1 }
 0x2ce   : > { %v3252_v23 = vadd.f32 %v3251_v9, %v3211_v45  ;;  %v6594_v47 = vmul.f32 -1.442695, %v3250_v46 }
 0x2cf   : > { %v3213_v28 = vpop.f32.mrf.mxu1 }
 0x2d0   : > { %v6595_v49 = vmul.f32 -1.442695, %v3252_v23  ;;  %7628 = vpow2.f32 %v6594_v47 }
 0x2d2   : > { %7630 = vpow2.f32 %v6595_v49 }
 0x2dd   : > { %v7629_v21 = vpop.eup %7628 }
 0x2de   : > { %v3426_v60 = vadd.f32 1.0, %v7629_v21 }
 0x2df   : > { %v7631_v55 = vpop.eup %7630 }
 0x2e0   : > { %v3427_v0 = vadd.f32 1.0, %v7631_v55  ;;  %7632 = vrcp.f32 %v3426_v60 }
 0x2ed   : > { %v7633_v4 = vpop.eup %7632 }
 0x302   : > { %v3413_v36 = vpop.f32.mrf.mxu0 }
 0x304   : > { %v3415_v54 = vpop.f32.mrf.mxu0 }
 0x306   : > { %v3417_v51 = vpop.f32.mrf.mxu0 }
 0x308   : > { %v3418_v58 = vpop.f32.mrf.mxu0 }
 0x309   : > { %v3290_v63 = vpop.f32.mrf.mxu1 }
 0x30a   : > { %v3291_v31 = vadd.f32 %v3290_v63, %v2195_v50 }
 0x30b   : > { %v3292_v32 = vpop.f32.mrf.mxu1 }
 0x30c   : > { %v3332_v1 = vadd.f32 %v3331_v13, %v3291_v31  ;;  %v3293_v15 = vadd.f32 %v3292_v32, %v2199_v59  ;;  %v2203_v13 = vrot.slane %v2182_v39, %v8622_v56  ;;  %v8188_v39 = vmov 1966171168  }
 0x30d   : > { %v3294_v35 = vpop.f32.mrf.mxu1  ;;  %v3457_v46 = vunpack.c.l.s4 %v8188_v39 }
 0x30e   : > { %7634 = vtanh.f32 %v3332_v1  ;;  %v3334_v34 = vadd.f32 %v3333_v14, %v3293_v15 }
 0x30f   : > { %7636 = vrcp.f32 %v3427_v0  ;;  %v3295_v53 = vpop.f32.mrf.mxu1  ;;  %v3458_v47 = vunpack.c.0.s8 %v3457_v46 }
 0x310   : > { %7638 = vtanh.f32 %v3334_v34 }
 0x311   : > { %v8751_v50 = vsub.s32 %v3458_v47, %v8602_v37  ;;  %v7716_v47 = vld [vmem:[#allocation2 + $0x80] sm:$0xff] }
 0x313   : > { %9716 = vst [vmem:[#allocation50_spill] sm:$0xff] %v8751_v50 }
 0x31b   : > { %v7635_v5 = vpop.eup %7634 }
 0x31c   : > { %v7637_v7 = vpop.eup %7636  ;;  %v3446_v3 = vmul.f32 %v7635_v5, %v7633_v4 }
 0x31d   : > { %v7639_v9 = vpop.eup %7638 }
 0x31e   : > { %v3447_v8 = vmul.f32 %v7639_v9, %v7637_v7  ;;  %v7708_v7 = vld [vmem:[#allocation2 + $0xd8] sm:$0xff] }
 0x31f   : > { %v7709_v9 = vld [vmem:[#allocation2 + $0x18] sm:$0xff] }
 0x342   : > { %v8744_v10 = vpop.f32.mrf.mxu0 }
 0x343   : > { %9714 = vst [vmem:[#allocation48_spill] sm:$0xff] %v8744_v10 }
 0x344   : > { %v8746_v11 = vpop.f32.mrf.mxu0 }
 0x345   : > { %9715 = vst [vmem:[#allocation49_spill] sm:$0xff] %v8746_v11 }
 0x346   : > { %v4971_v12 = vpop.f32.mrf.mxu0 }
 0x347   : > { %v7710_v12 = vld [vmem:[#allocation2 + $0xb0] sm:$0xff] }
 0x348   : > { %v4972_v20 = vpop.f32.mrf.mxu0 }
 0x349   : > { %v3372_v14 = vpop.f32.mrf.mxu1  ;;  %v7711_v20 = vld [vmem:[#allocation2] sm:$0xff] }
 0x34a   : > { %v3373_v22 = vadd.f32 %v3372_v14, %v2203_v13  ;;  %v7712_v14 = vld [vmem:[#allocation2 + $0x38] sm:$0xff] }
 0x34b   : > { %v3374_v30 = vpop.f32.mrf.mxu1 }
 0x34c   : > { %v3414_v24 = vadd.f32 %v3413_v36, %v3373_v22  ;;  %v3375_v25 = vadd.f32 %v3374_v30, %v2207_v18  ;;  %v7713_v30 = vld [vmem:[#allocation2 + $0x58] sm:$0xff] }
 0x34d   : > { %v3376_v26 = vpop.f32.mrf.mxu1 }
 0x34e   : > { %v6596_v28 = vmul.f32 -1.442695, %v3414_v24  ;;  %v3416_v16 = vadd.f32 %v3415_v54, %v3375_v25  ;;  %v7714_v25 = vld [vmem:[#allocation2 + $0x40] sm:$0xff] }
 0x34f   : > { %v3377_v38 = vpop.f32.mrf.mxu1 }
 0x350   : > { %7640 = vpow2.f32 %v6596_v28  ;;  %v6597_v19 = vmul.f32 -1.442695, %v3416_v16  ;;  %v7715_v28 = vld [vmem:[#allocation2 + $0xc8] sm:$0xff] }
 0x352   : > { %7642 = vpow2.f32 %v6597_v19 }
 0x353   : > { %7644 = vtanh.f32 %v3446_v3 }
 0x35d   : > { %v7641_v17 = vpop.eup %7640 }
 0x35e   : > { %v3440_v42 = vadd.f32 1.0, %v7641_v17 }
 0x35f   : > { %v7643_v43 = vpop.eup %7642 }
 0x360   : > { %7646 = vrcp.f32 %v3440_v42  ;;  %v3441_v45 = vadd.f32 1.0, %v7643_v43  ;;  %v7645_v23 = vpop.eup %7644 }
 0x361   : > { %7648 = vtanh.f32 %v3447_v8 }
 0x362   : > { %7650 = vrcp.f32 %v3441_v45 }
 0x36d   : > { %v7647_v49 = vpop.eup %7646 }
 0x36e   : > { %v7649_v36 = vpop.eup %7648  ;;  %v3450_v54 = vmul.f32 %v7647_v49, %v7645_v23 }
 0x36f   : > { %v7651_v21 = vpop.eup %7650 }
 0x370   : > { %v3451_v51 = vmul.f32 %v7651_v21, %v7649_v36  ;;  %v7717_v36 = vld [vmem:[#allocation2 + $0x88] sm:$0xff] }
 0x372   : > { %v3454_v55 = vcombine.low %v3450_v54, %v3451_v51  ;;  %v3455_v58 = vcombine.high %v3450_v54, %v3451_v51  ;;  %v8769_v54 = vld [vmem:[#allocation2 + $0x50] sm:$0xff] }
 0x374   : > { %v3462_v59 = vrot.slane %v3454_v55, %v8751_v50  ;;  %v3469_v60 = vrot.slane %v3455_v58, %v8751_v50  ;;  %v8772_v55 = vld [vmem:[#allocation2 + $0x68] sm:$0xff] }
 0x376   : > { %v3478_v63 = vrot.slane %v3462_v59, %v8751_v50  ;;  %v3485_v31 = vrot.slane %v3469_v60, %v8751_v50  ;;  %v3470_v0 = vcombine.high %v3462_v59, %v3462_v59  ;;  %v3471_v32 = vcombine.high %v3469_v60, %v3469_v60 }
 0x378   : > { %v3507_v1 = vrot.slane %v3478_v63, %v8608_v41  ;;  %v3511_v15 = vrot.slane %v3478_v63, %v8605_v40  ;;  %v3539_v35 = vrot.slane %v3485_v31, %v8608_v41  ;;  %v3543_v34 = vrot.slane %v3485_v31, %v8605_v40 }
 0x379   : > { %v3500_v53 = vcombine.high %v3478_v63, %v3478_v63  ;;  %v3492_v4 = vrot.slane %v3470_v0, %v8751_v50  ;;  %v8763_v5 = vrot.slane %v3471_v32, %v8751_v50  ;;  %v3501_v39 = vcombine.high %v3485_v31, %v3485_v31  ;;  %v8779_v63 = vld [vmem:[#allocation2 + $0x30] sm:$0xff]  ;;  %v8782_v32 = vld [vmem:[#allocation2 + $0x48] sm:$0xff] }
 0x37a   : > { %v3586_v3 = vmul.f32 %v7708_v7, %v3507_v1  ;;  %v3587_v8 = vmul.f32 %v7709_v9, %v3511_v15  ;;  %v3584_v13 = vmul.f32 %v7710_v12, %v3507_v1  ;;  %v3585_v18 = vmul.f32 %v7711_v20, %v3511_v15  ;;  %v8787_v12 = vld [vmem:[#allocation2 + $0xe8] sm:$0xff] }
 0x37b   : > { %v3600_v22 = vmul.f32 %v7712_v14, %v3539_v35  ;;  %v3601_v24 = vmul.f32 %v7713_v30, %v3543_v34  ;;  %v3602_v26 = vmul.f32 %v7714_v25, %v3539_v35  ;;  %v3603_v16 = vmul.f32 %v7715_v28, %v3543_v34 }
 0x37c   : > { %v3619_v38 = vadd.f32 %v3587_v8, %v3586_v3  ;;  %v3616_v19 = vadd.f32 %v3585_v18, %v3584_v13  ;;  %v3523_v17 = vrot.slane %v3500_v53, %v8608_v41  ;;  %v3527_v42 = vrot.slane %v3500_v53, %v8605_v40  ;;  %v7722_v53 = vld [vmem:[#allocation2 + $0xe0] sm:$0xff]  ;;  %v7723_v3 = vld [vmem:[#allocation2 + $0x90] sm:$0xff]  ;;  %v7725_v18 = vld [vmem:[#allocation2 + $0xa8] sm:$0xff] }
 0x37d   : > { %v3515_v43 = vrot.slane %v3492_v4, %v8608_v41  ;;  %v3519_v45 = vrot.slane %v3492_v4, %v8605_v40  ;;  %v3640_v46 = vadd.f32 %v3601_v24, %v3600_v22  ;;  %v3643_v23 = vadd.f32 %v3603_v16, %v3602_v26  ;;  %v7726_v22 = vld [vmem:[#allocation2 + $0xd0] sm:$0xff]  ;;  %v8790_v24 = vld [vmem:[#allocation2 + $0xb8] sm:$0xff] }
 0x37e   : > { %3620 = vadd.xlane.f32.xlu1 %v3619_v38  ;;  %3617 = vadd.xlane.f32.xlu0 %v3616_v19  ;;  %v3592_v49 = vmul.f32 %v7716_v47, %v3523_v17  ;;  %v3593_v21 = vmul.f32 %v7717_v36, %v3527_v42  ;;  %v3547_v59 = vrot.slane %v8763_v5, %v8608_v41  ;;  %v7728_v38 = vld [vmem:[#allocation2 + $0x70] sm:$0xff] }
 0x37f   : > { %v3588_v51 = vmul.f32 %v8769_v54, %v3515_v43  ;;  %v3589_v58 = vmul.f32 %v8772_v55, %v3519_v45  ;;  %v3551_v60 = vrot.slane %v8763_v5, %v8605_v40  ;;  %v3590_v31 = vmul.f32 %v8779_v63, %v3515_v43  ;;  %v8800_v47 = vld [vmem:[#allocation2 + $0xf0] sm:$0xff] }
 0x380   : > { %v3628_v0 = vadd.f32 %v3593_v21, %v3592_v49  ;;  %v3591_v1 = vmul.f32 %v8782_v32, %v3519_v45  ;;  %v3555_v15 = vrot.slane %v3501_v39, %v8608_v41  ;;  %v3559_v35 = vrot.slane %v3501_v39, %v8605_v40  ;;  %v7729_v45 = vld [vmem:[#allocation2 + $0xc0] sm:$0xff]  ;;  %v7732_v21 = vld [vmem:[#allocation2 + $0x10] sm:$0xff] }
 0x381   : > { %v3622_v34 = vadd.f32 %v3589_v58, %v3588_v51  ;;  %v3604_v7 = vmul.f32 %v7722_v53, %v3547_v59  ;;  %v3605_v9 = vmul.f32 %v7723_v3, %v3551_v60  ;;  %v3502_v8 = vcombine.high %v3492_v4, %v3492_v4  ;;  %v7733_v58 = vld [vmem:[#allocation2 + $0x28] sm:$0xff] }
 0x382   : > { %3641 = vadd.xlane.f32.xlu1 %v3640_v46  ;;  %3644 = vadd.xlane.f32.xlu0 %v3643_v23  ;;  %v3594_v13 = vmul.f32 %v8787_v12, %v3523_v17  ;;  %v3625_v20 = vadd.f32 %v3591_v1, %v3590_v31  ;;  %v3608_v14 = vmul.f32 %v7725_v18, %v3555_v15  ;;  %v8189_v46 = vmov 0  }
 0x383   : > { %v3609_v30 = vmul.f32 %v7726_v22, %v3559_v35  ;;  %v3595_v25 = vmul.f32 %v8790_v24, %v3527_v42  ;;  %v3646_v26 = vadd.f32 %v3605_v9, %v3604_v7  ;;  %v3531_v28 = vrot.slane %v3502_v8, %v8608_v41  ;;  %7003 = vset.pattern.permute.xlu1 %v8189_v46  ;;  %v8797_v42 = vld [vmem:[#allocation2 + $0x60] sm:$0xff]  ;;  %v8805_v9 = vld [vmem:[#allocation2 + $0x8] sm:$0xff] }
 0x384   : > { %v3535_v4 = vrot.slane %v3502_v8, %v8605_v40  ;;  %v3503_v16 = vcombine.high %v8763_v5, %v8763_v5  ;;  %v3606_v19 = vmul.f32 %v7728_v38, %v3547_v59  ;;  %v3607_v39 = vmul.f32 %v7729_v45, %v3551_v60  ;;  %7002 = vset.pattern.permute.xlu0 %v8189_v46 }
 0x385   : > { %v3652_v17 = vadd.f32 %v3609_v30, %v3608_v14  ;;  %v3631_v43 = vadd.f32 %v3595_v25, %v3594_v13  ;;  %v3596_v23 = vmul.f32 %v8797_v42, %v3531_v28  ;;  %v3610_v51 = vmul.f32 %v7732_v21, %v3555_v15  ;;  %v8808_v13 = vld [vmem:[#allocation2 + $0x78] sm:$0xff] }
 0x386   : > { %3629 = vadd.xlane.f32.xlu1 %v3628_v0  ;;  %3623 = vadd.xlane.f32.xlu0 %v3622_v34  ;;  %v3597_v49 = vmul.f32 %v8800_v47, %v3535_v4  ;;  %v3563_v5 = vrot.slane %v3503_v16, %v8608_v41  ;;  %v3567_v36 = vrot.slane %v3503_v16, %v8605_v40  ;;  %v7734_v0 = vld [vmem:[#allocation2 + $0xa0] sm:$0xff]  ;;  %v7735_v34 = vld [vmem:[#allocation2 + $0xf8] sm:$0xff]  ;;  %v3675_v16 = vpop.permute.xlu0 %3674 }
 0x387   : > { %v3611_v59 = vmul.f32 %v7733_v58, %v3559_v35  ;;  %v3649_v60 = vadd.f32 %v3607_v39, %v3606_v19  ;;  %v3598_v8 = vmul.f32 %v8805_v9, %v3531_v28  ;;  %v3599_v15 = vmul.f32 %v8808_v13, %v3535_v4  ;;  %v7739_v14 = vld [vmem:[#allocation2 + $0x98] sm:$0xff] }
 0x388   : > { %v3634_v31 = vadd.f32 %v3597_v49, %v3596_v23  ;;  %v3612_v1 = vmul.f32 %v7734_v0, %v3563_v5  ;;  %v3613_v53 = vmul.f32 %v7735_v34, %v3567_v36  ;;  %v3615_v22 = vmul.f32 %v7739_v14, %v3567_v36 }
 0x389   : > { %v3655_v7 = vadd.f32 %v3611_v59, %v3610_v51  ;;  %v3637_v35 = vadd.f32 %v3599_v15, %v3598_v8  ;;  %v3745_v25 = vrot.slane %v8721_v44, %v8639_v6 }
 0x38a   : > { %3647 = vadd.xlane.f32.xlu1 %v3646_v26  ;;  %3626 = vadd.xlane.f32.xlu0 %v3625_v20  ;;  %v3658_v3 = vadd.f32 %v3613_v53, %v3612_v1  ;;  %v7738_v20 = vld [vmem:[#allocation2 + $0x20] sm:$0xff]  ;;  %v3671_v26 = vpop.permute.xlu1 %3670  ;;  %v3693_v4 = vpop.permute.xlu0 %3692 }
 0x38b   : > { %v3614_v18 = vmul.f32 %v7738_v20, %v3563_v5 }
 0x38d   : > { %v3661_v30 = vadd.f32 %v3615_v22, %v3614_v18 }
 0x38e   : > { %3653 = vadd.xlane.f32.xlu1 %v3652_v17  ;;  %3632 = vadd.xlane.f32.xlu0 %v3631_v43  ;;  %v3682_v28 = vpop.permute.xlu1 %3681  ;;  %v3704_v17 = vpop.permute.xlu0 %3703 }
 0x392   : > { %3650 = vadd.xlane.f32.xlu0 %v3649_v60  ;;  %3635 = vadd.xlane.f32.xlu1 %v3634_v31  ;;  %v3686_v38 = vpop.permute.xlu1 %3685  ;;  %v3715_v45 = vpop.permute.xlu0 %3714 }
 0x396   : > { %3656 = vadd.xlane.f32.xlu0 %v3655_v7  ;;  %3659 = vadd.xlane.f32.xlu1 %v3658_v3  ;;  %v3697_v19 = vpop.permute.xlu1 %3696  ;;  %v3726_v46 = vpop.permute.xlu0 %3725 }
 0x39a   : > { %3638 = vadd.xlane.f32.xlu0 %v3637_v35  ;;  %v3708_v43 = vpop.permute.xlu1 %3707  ;;  %v3737_v49 = vpop.permute.xlu0 %3736 }
 0x39e   : > { %3662 = vadd.xlane.f32.xlu0 %v3661_v30  ;;  %v3719_v39 = vpop.permute.xlu1 %3718 }
 0x3a2   : > { %v3730_v23 = vpop.permute.xlu1 %3729 }
 0x3a6   : > { %v3741_v5 = vpop.permute.xlu1 %3740 }
 0x3a7   : > { %3751 = vbcast.lane.b32.xlu1 %v3745_v25, 264 }
 0x3b4   : > { %3747 = vbcast.lane.b32.xlu0 %v3745_v25, 256 }
 0x407   : > { %v3621_v36 = vpop.xlane.xlu1 %3620  ;;  %v3618_v21 = vpop.xlane.xlu0 %3617 }
 0x408   : > { %v8813_v51 = vadd.f32 %v3675_v16, %v3621_v36  ;;  %v8815_v44 = vadd.f32 %v3671_v26, %v3618_v21 }
 0x40a   : > { %3802 = vperm.xlu0 %7002, %v8815_v44   ;;  %3805 = vperm.xlu1 %7003, %v8813_v51  }
 0x40b   : > { %v3642_v58 = vpop.xlane.xlu1 %3641  ;;  %v3645_v59 = vpop.xlane.xlu0 %3644 }
 0x40c   : > { %v8819_v60 = vadd.f32 %v3715_v45, %v3642_v58  ;;  %v8821_v31 = vadd.f32 %v3719_v39, %v3645_v59 }
 0x40e   : > { %3829 = vperm.xlu0 %7002, %v8821_v31   ;;  %3826 = vperm.xlu1 %7003, %v8819_v60  }
 0x40f   : > { %v3630_v0 = vpop.xlane.xlu1 %3629  ;;  %v3624_v1 = vpop.xlane.xlu0 %3623 }
 0x410   : > { %v8825_v34 = vadd.f32 %v3682_v28, %v3624_v1  ;;  %v8828_v3 = vadd.f32 %v3693_v4, %v3630_v0  ;;  %v3850_v0 = vand.u32 127, %v850_v33 }
 0x412   : > { %3808 = vperm.xlu1 %7003, %v8825_v34  }
 0x413   : > { %v3648_v53 = vpop.xlane.xlu1 %3647  ;;  %v3627_v7 = vpop.xlane.xlu0 %3626 }
 0x414   : > { %v8830_v8 = vadd.f32 %v3686_v38, %v3627_v7  ;;  %v8834_v20 = vadd.f32 %v3726_v46, %v3648_v53  ;;  %v3855_v7 = vadd.s32 4294967288, %v3850_v0 }
 0x416   : > { %3811 = vperm.xlu0 %7002, %v8830_v8   ;;  %3814 = vperm.xlu1 %7003, %v8828_v3  }
 0x417   : > { %v3654_v15 = vpop.xlane.xlu1 %3653  ;;  %v3633_v35 = vpop.xlane.xlu0 %3632 }
 0x418   : > { %v8836_v18 = vadd.f32 %v3697_v19, %v3633_v35  ;;  %v8840_v30 = vadd.f32 %v3737_v49, %v3654_v15 }
 0x41a   : > { %3817 = vperm.xlu0 %7002, %v8836_v18   ;;  %3832 = vperm.xlu1 %7003, %v8834_v20  }
 0x41b   : > { %v3651_v14 = vpop.xlane.xlu0 %3650  ;;  %v3636_v22 = vpop.xlane.xlu1 %3635 }
 0x41c   : > { %v8842_v25 = vadd.f32 %v3730_v23, %v3651_v14  ;;  %v8846_v28 = vadd.f32 %v3704_v17, %v3636_v22  ;;  %v8863_v14 = vsub.s32 %v3850_v0, %v8602_v37  ;;  %v8866_v22 = vsub.s32 %v3855_v7, %v8602_v37 }
 0x41e   : > { %3835 = vperm.xlu0 %7002, %v8842_v25   ;;  %3838 = vperm.xlu1 %7003, %v8840_v30  }
 0x41f   : > { %v3657_v26 = vpop.xlane.xlu0 %3656  ;;  %v3660_v38 = vpop.xlane.xlu1 %3659 }
 0x420   : > { %v8848_v16 = vadd.f32 %v3741_v5, %v3657_v26 }
 0x422   : > { %3841 = vperm.xlu0 %7002, %v8848_v16   ;;  %3820 = vperm.xlu1 %7003, %v8846_v28  }
 0x423   : > { %v3639_v4 = vpop.xlane.xlu0 %3638  ;;  %v3752_v45 = vpop.permute.xlu1 %3751 }
 0x424   : > { %v8852_v19 = vadd.f32 %v3708_v43, %v3639_v4 }
 0x426   : > { %3823 = vperm.xlu0 %7002, %v8852_v19  }
 0x427   : > { %v3663_v39 = vpop.xlane.xlu0 %3662 }
 0x428   : > { %v8855_v46 = vadd.f32 %v3752_v45, %v3663_v39 }
 0x42a   : > { %3847 = vperm.xlu0 %7002, %v8855_v46  }
 0x42b   : > { %v3748_v17 = vpop.permute.xlu0 %3747 }
 0x42c   : > { %v8858_v23 = vadd.f32 %v3748_v17, %v3660_v38 }
 0x42e   : > { %3844 = vperm.xlu1 %7003, %v8858_v23  }
 0x485   : > { %v3806_v49 = vpop.permute.xlu1 %3805  ;;  %v3803_v5 = vpop.permute.xlu0 %3802 }
 0x486   : > { %v3854_v45 = vrot.slane %v3803_v5, %v8863_v14  ;;  %v3859_v33 = vrot.slane %v3806_v49, %v8866_v22 }
 0x488   : > { %v3861_v57 = vsel %vm3860_vm7, %v3859_v33, %v3854_v45 }
 0x489   : > { %v3827_v36 = vpop.permute.xlu1 %3826  ;;  %v3830_v21 = vpop.permute.xlu0 %3829 }
 0x48a   : > { %v3896_v37 = vrot.slane %v3830_v21, %v8866_v22  ;;  %v3892_v7 = vrot.slane %v3827_v36, %v8863_v14 }
 0x48c   : > { %v3897_v21 = vsel %vm3860_vm7, %v3896_v37, %v3892_v7 }
 0x48d   : > { %v3809_v58 = vpop.permute.xlu1 %3808 }
 0x48e   : > { %v3865_v39 = vrot.slane %v3809_v58, %v8863_v14 }
 0x491   : > { %v3812_v43 = vpop.permute.xlu0 %3811  ;;  %v3815_v59 = vpop.permute.xlu1 %3814 }
 0x492   : > { %v3869_v26 = vrot.slane %v3812_v43, %v8866_v22  ;;  %v3874_v17 = vrot.slane %v3815_v59, %v8863_v14 }
 0x494   : > { %v3870_v0 = vsel %vm3860_vm7, %v3869_v26, %v3865_v39 }
 0x495   : > { %v3818_v1 = vpop.permute.xlu0 %3817  ;;  %v3833_v53 = vpop.permute.xlu1 %3832  ;;  %v3925_v58 = vsel %vm1963_vm0, %v3870_v0, %v3861_v57 }
 0x496   : > { %v3878_v38 = vrot.slane %v3818_v1, %v8866_v22 }
 0x498   : > { %v3879_v43 = vsel %vm3860_vm7, %v3878_v38, %v3874_v17  ;;  %v3901_v38 = vrot.slane %v3833_v53, %v8863_v14 }
 0x499   : > { %v3836_v15 = vpop.permute.xlu0 %3835  ;;  %v3839_v35 = vpop.permute.xlu1 %3838  ;;  %v3926_v59 = vsel %vm1965_vm1, %v3879_v43, %v3925_v58 }
 0x49a   : > { %v3905_v27 = vrot.slane %v3836_v15, %v8866_v22  ;;  %v3910_v57 = vrot.slane %v3839_v35, %v8863_v14 }
 0x49c   : > { %v3906_v39 = vsel %vm3860_vm7, %v3905_v27, %v3901_v38 }
 0x49d   : > { %v3842_v4 = vpop.permute.xlu0 %3841  ;;  %v3821_v50 = vpop.permute.xlu1 %3820 }
 0x49e   : > { %v3883_v5 = vrot.slane %v3821_v50, %v8863_v14  ;;  %v3914_v50 = vrot.slane %v3842_v4, %v8866_v22 }
 0x4a0   : > { %v3915_v7 = vsel %vm3860_vm7, %v3914_v50, %v3910_v57 }
 0x4a1   : > { %v3824_v1 = vpop.permute.xlu0 %3823 }
 0x4a2   : > { %v3887_v49 = vrot.slane %v3824_v1, %v8866_v22 }
 0x4a4   : > { %v3888_v26 = vsel %vm3860_vm7, %v3887_v49, %v3883_v5 }
 0x4a5   : > { %v3927_v36 = vsel %vm1967_vm2, %v3888_v26, %v3926_v59  ;;  %v3848_v33 = vpop.permute.xlu0 %3847 }
 0x4a6   : > { %v3928_v45 = vsel %vm1969_vm3, %v3897_v21, %v3927_v36  ;;  %v3923_v0 = vrot.slane %v3848_v33, %v8866_v22 }
 0x4a7   : > { %v3929_v15 = vsel %vm1971_vm4, %v3906_v39, %v3928_v45 }
 0x4a8   : > { %v3930_v43 = vsel %vm1973_vm5, %v3915_v7, %v3929_v15 }
 0x4a9   : > { %v3845_v17 = vpop.permute.xlu1 %3844 }
 0x4aa   : > { %v3919_v37 = vrot.slane %v3845_v17, %v8863_v14 }
 0x4ac   : > { %v3924_v53 = vsel %vm3860_vm7, %v3923_v0, %v3919_v37 }
 0x4ad   : > { %v3931_v4 = vsel %vm1975_vm6, %v3924_v53, %v3930_v43 }
 0x4ae   : > { %v3934_v27 = vsel %vm3933_vm8, %v3931_v4, -inf }
 0x4af   : > { %3935 = vmax.xlane.f32.xlu1 %v3934_v27 }
 0x538   : > { %v3936_v35 = vpop.xlane.xlu1 %3935 }
 0x539   : > { %v3941_v1 = vrot.slane %v3936_v35, %v8608_v41  ;;  %v3945_v49 = vrot.slane %v3936_v35, %v8605_v40  ;;  %v3957_v59 = vrot.slane %v3936_v35, %v8622_v56  ;;  %v8908_v45 = vrot.slane %v3936_v35, %v8639_v6 }
 0x53a   : > { %v3949_v50 = vrot.slane %v3936_v35, %v8614_v48 }
 0x53b   : > { %v3978_v5 = vsub.f32 %v8815_v44, %v3941_v1  ;;  %v3979_v58 = vsub.f32 %v8813_v51, %v3941_v1  ;;  %v3980_v21 = vsub.f32 %v8825_v34, %v3945_v49  ;;  %v3987_v38 = vsub.f32 %v8821_v31, %v3957_v59 }
 0x53c   : > { %v3981_v44 = vsub.f32 %v8830_v8, %v3945_v49  ;;  %v3992_v51 = vsub.f32 %v8858_v23, %v8908_v45  ;;  %v3982_v57 = vsub.f32 %v8828_v3, %v3949_v50  ;;  %v3953_v31 = vrot.slane %v3936_v35, %v8618_v52 }
 0x53d   : > { %v3994_v26 = vmul.f32 1.442695, %v3978_v5  ;;  %v3996_v36 = vmul.f32 1.442695, %v3979_v58  ;;  %v3998_v33 = vmul.f32 1.442695, %v3980_v21  ;;  %v3983_v15 = vsub.f32 %v8836_v18, %v3949_v50 }
 0x53e   : > { %v4012_v39 = vmul.f32 1.442695, %v3987_v38  ;;  %v4000_v34 = vmul.f32 1.442695, %v3981_v44  ;;  %v4022_v17 = vmul.f32 1.442695, %v3992_v51  ;;  %v3984_v8 = vsub.f32 %v8846_v28, %v3953_v31 }
 0x53f   : > { %7652 = vpow2.f32 %v3994_v26  ;;  %v4002_v0 = vmul.f32 1.442695, %v3982_v57  ;;  %v4004_v23 = vmul.f32 1.442695, %v3983_v15  ;;  %v3985_v7 = vsub.f32 %v8852_v19, %v3953_v31 }
 0x540   : > { %7654 = vpow2.f32 %v3996_v36  ;;  %v4006_v53 = vmul.f32 1.442695, %v3984_v8  ;;  %v3961_v28 = vrot.slane %v3936_v35, %v8630_v62  ;;  %v3986_v4 = vsub.f32 %v8819_v60, %v3957_v59 }
 0x541   : > { %7656 = vpow2.f32 %v3998_v33  ;;  %v4008_v27 = vmul.f32 1.442695, %v3985_v7  ;;  %v3965_v60 = vrot.slane %v3936_v35, %v8635_v2 }
 0x542   : > { %7658 = vpow2.f32 %v4012_v39  ;;  %v3988_v5 = vsub.f32 %v8834_v20, %v3961_v28  ;;  %v4010_v49 = vmul.f32 1.442695, %v3986_v4  ;;  %v3989_v59 = vsub.f32 %v8842_v25, %v3961_v28 }
 0x543   : > { %7660 = vpow2.f32 %v4000_v34  ;;  %v3990_v20 = vsub.f32 %v8840_v30, %v3965_v60  ;;  %v3991_v50 = vsub.f32 %v8848_v16, %v3965_v60  ;;  %v3993_v25 = vsub.f32 %v8855_v46, %v8908_v45 }
 0x544   : > { %7662 = vpow2.f32 %v4022_v17  ;;  %v4014_v26 = vmul.f32 1.442695, %v3988_v5  ;;  %v4016_v36 = vmul.f32 1.442695, %v3989_v59 }
 0x545   : > { %7664 = vpow2.f32 %v4002_v0  ;;  %v4018_v35 = vmul.f32 1.442695, %v3990_v20  ;;  %v4020_v33 = vmul.f32 1.442695, %v3991_v50  ;;  %v4024_v39 = vmul.f32 1.442695, %v3993_v25 }
 0x546   : > { %7666 = vpow2.f32 %v4004_v23 }
 0x547   : > { %7668 = vpow2.f32 %v4006_v53 }
 0x548   : > { %7670 = vpow2.f32 %v4008_v27 }
 0x549   : > { %7672 = vpow2.f32 %v4010_v49 }
 0x54a   : > { %7674 = vpow2.f32 %v4014_v26 }
 0x54b   : > { %7676 = vpow2.f32 %v4016_v36 }
 0x54c   : > { %v8917_v37 = vpop.eup %7652  ;;  %7678 = vpow2.f32 %v4018_v35 }
 0x54d   : > { %4043 = vperm.xlu0 %7002, %v8917_v37   ;;  %v8921_v3 = vpop.eup %7654  ;;  %7680 = vpow2.f32 %v4020_v33 }
 0x54e   : > { %v8925_v18 = vpop.eup %7656  ;;  %7682 = vpow2.f32 %v4024_v39 }
 0x54f   : > { %v8927_v43 = vpop.eup %7658 }
 0x550   : > { %4070 = vperm.xlu1 %7003, %v8927_v43   ;;  %v8933_v1 = vpop.eup %7660 }
 0x551   : > { %4046 = vperm.xlu0 %7002, %v8921_v3   ;;  %v8936_v19 = vpop.eup %7662 }
 0x552   : > { %v8940_v58 = vpop.eup %7664 }
 0x553   : > { %v8945_v21 = vpop.eup %7666 }
 0x554   : > { %4085 = vperm.xlu1 %7003, %v8936_v19   ;;  %v8949_v38 = vpop.eup %7668 }
 0x555   : > { %4049 = vperm.xlu0 %7002, %v8925_v18   ;;  %v8953_v44 = vpop.eup %7670 }
 0x556   : > { %v8958_v30 = vpop.eup %7672 }
 0x557   : > { %v8961_v51 = vpop.eup %7674 }
 0x558   : > { %v8964_v16 = vpop.eup %7676 }
 0x559   : > { %4052 = vperm.xlu0 %7002, %v8933_v1   ;;  %v8967_v57 = vpop.eup %7678 }
 0x55a   : > { %v8970_v46 = vpop.eup %7680 }
 0x55b   : > { %v8973_v45 = vpop.eup %7682 }
 0x55d   : > { %4055 = vperm.xlu0 %7002, %v8940_v58  }
 0x561   : > { %4058 = vperm.xlu0 %7002, %v8945_v21  }
 0x565   : > { %4061 = vperm.xlu0 %7002, %v8949_v38  }
 0x569   : > { %4064 = vperm.xlu0 %7002, %v8953_v44  }
 0x56d   : > { %4067 = vperm.xlu0 %7002, %v8958_v30  }
 0x571   : > { %4073 = vperm.xlu0 %7002, %v8961_v51  }
 0x575   : > { %4076 = vperm.xlu0 %7002, %v8964_v16  }
 0x579   : > { %4079 = vperm.xlu0 %7002, %v8967_v57  }
 0x57d   : > { %4082 = vperm.xlu0 %7002, %v8970_v46  }
 0x581   : > { %4088 = vperm.xlu0 %7002, %v8973_v45  }
 0x5c8   : > { %v4044_v34 = vpop.permute.xlu0 %4043 }
 0x5c9   : > { %v4093_v35 = vrot.slane %v4044_v34, %v8863_v14 }
 0x5cb   : > { %v4071_v5 = vpop.permute.xlu1 %4070 }
 0x5cc   : > { %v4047_v17 = vpop.permute.xlu0 %4046 }
 0x5cd   : > { %v4097_v59 = vrot.slane %v4047_v17, %v8866_v22 }
 0x5cf   : > { %v4086_v34 = vpop.permute.xlu1 %4085 }
 0x5d0   : > { %v4050_v31 = vpop.permute.xlu0 %4049 }
 0x5d1   : > { %v4102_v26 = vrot.slane %v4050_v31, %v8863_v14  ;;  %v4098_v31 = vsel %vm3860_vm7, %v4097_v59, %v4093_v35 }
 0x5d4   : > { %v4053_v15 = vpop.permute.xlu0 %4052 }
 0x5d5   : > { %v4106_v27 = vrot.slane %v4053_v15, %v8866_v22  ;;  %v4133_v15 = vrot.slane %v4071_v5, %v8866_v22 }
 0x5d7   : > { %v4107_v25 = vsel %vm3860_vm7, %v4106_v27, %v4102_v26 }
 0x5d8   : > { %v4056_v0 = vpop.permute.xlu0 %4055  ;;  %v4162_v27 = vsel %vm1963_vm0, %v4107_v25, %v4098_v31 }
 0x5d9   : > { %v4111_v36 = vrot.slane %v4056_v0, %v8863_v14 }
 0x5dc   : > { %v4059_v8 = vpop.permute.xlu0 %4058 }
 0x5dd   : > { %v4115_v49 = vrot.slane %v4059_v8, %v8866_v22 }
 0x5df   : > { %v4116_v17 = vsel %vm3860_vm7, %v4115_v49, %v4111_v36 }
 0x5e0   : > { %v4062_v23 = vpop.permute.xlu0 %4061  ;;  %v4163_v5 = vsel %vm1965_vm1, %v4116_v17, %v4162_v27 }
 0x5e1   : > { %v4120_v33 = vrot.slane %v4062_v23, %v8863_v14 }
 0x5e4   : > { %v4065_v7 = vpop.permute.xlu0 %4064 }
 0x5e5   : > { %v4124_v20 = vrot.slane %v4065_v7, %v8866_v22 }
 0x5e7   : > { %v4125_v7 = vsel %vm3860_vm7, %v4124_v20, %v4120_v33 }
 0x5e8   : > { %v4068_v53 = vpop.permute.xlu0 %4067  ;;  %v4164_v26 = vsel %vm1967_vm2, %v4125_v7, %v4163_v5 }
 0x5e9   : > { %v4129_v50 = vrot.slane %v4068_v53, %v8863_v14 }
 0x5eb   : > { %v4134_v23 = vsel %vm3860_vm7, %v4133_v15, %v4129_v50 }
 0x5ec   : > { %v4074_v28 = vpop.permute.xlu0 %4073  ;;  %v4165_v36 = vsel %vm1969_vm3, %v4134_v23, %v4164_v26 }
 0x5ed   : > { %v4138_v0 = vrot.slane %v4074_v28, %v8863_v14  ;;  %v4156_v28 = vrot.slane %v4086_v34, %v8863_v14 }
 0x5f0   : > { %v4077_v4 = vpop.permute.xlu0 %4076 }
 0x5f1   : > { %v4142_v39 = vrot.slane %v4077_v4, %v8866_v22 }
 0x5f3   : > { %v4143_v49 = vsel %vm3860_vm7, %v4142_v39, %v4138_v0 }
 0x5f4   : > { %v4080_v60 = vpop.permute.xlu0 %4079  ;;  %v4166_v25 = vsel %vm1971_vm4, %v4143_v49, %v4165_v36  ;;  %v7487_v36 = vld [vmem:[#allocation15 + $0x60] ss:$8 sps:$4 sm:$0xff]  }
 0x5f5   : > { %v4147_v4 = vrot.slane %v4080_v60, %v8863_v14 }
 0x5f8   : > { %v4083_v8 = vpop.permute.xlu0 %4082 }
 0x5f9   : > { %v4151_v53 = vrot.slane %v4083_v8, %v8866_v22 }
 0x5fb   : > { %v4152_v59 = vsel %vm3860_vm7, %v4151_v53, %v4147_v4 }
 0x5fc   : > { %v4089_v20 = vpop.permute.xlu0 %4088  ;;  %v4167_v60 = vsel %vm1973_vm5, %v4152_v59, %v4166_v25  ;;  %v7490_v25 = vld [vmem:[#allocation15 + $0x50] ss:$8 sps:$4 sm:$0xff]  }
 0x5fd   : > { %v4160_v35 = vrot.slane %v4089_v20, %v8866_v22  ;;  %v7484_v20 = vld [vmem:[#allocation15 + $0x70] ss:$8 sps:$4 sm:$0xff]  }
 0x5ff   : > { %v4161_v50 = vsel %vm3860_vm7, %v4160_v35, %v4156_v28 }
 0x600   : > { %v4168_v33 = vsel %vm1975_vm6, %v4161_v50, %v4167_v60 }
 0x601   : > { %v4170_v39 = vsel %vm3933_vm8, %v4168_v33, 0.0  ;;  %v7493_v33 = vld [vmem:[#allocation15 + $0x40] ss:$8 sps:$4 sm:$0xff]  }
 0x602   : > { %4171 = vadd.xlane.f32.xlu1 %v4170_v39 }
 0x68b   : > { %v4172_v15 = vpop.xlane.xlu1 %4171 }
 0x68c   : > { %v4193_v17 = vrot.slane %v4172_v15, %v8622_v56  ;;  %v4177_v14 = vrot.slane %v4172_v15, %v8608_v41  ;;  %v4205_v8 = vrot.slane %v4172_v15, %v8639_v6  ;;  %v4181_v22 = vrot.slane %v4172_v15, %v8605_v40 }
 0x68d   : > { %v4185_v31 = vrot.slane %v4172_v15, %v8614_v48  ;;  %v4189_v4 = vrot.slane %v4172_v15, %v8618_v52  ;;  %v4197_v28 = vrot.slane %v4172_v15, %v8630_v62  ;;  %v4201_v50 = vrot.slane %v4172_v15, %v8635_v2  ;;  %v7499_v15 = vld [vmem:[#allocation15 + $0x20] ss:$8 sps:$4 sm:$0xff]  }
 0x68e   : > { %7684 = vrcp.f32 %v4193_v17  ;;  %v7496_v17 = vld [vmem:[#allocation15 + $0x30] ss:$8 sps:$4 sm:$0xff]  }
 0x68f   : > { %7686 = vrcp.f32 %v4177_v14 }
 0x690   : > { %7688 = vrcp.f32 %v4205_v8 }
 0x691   : > { %7690 = vrcp.f32 %v4181_v22 }
 0x692   : > { %7692 = vrcp.f32 %v4185_v31  ;;  %v7504_v31 = vld [vmem:[#allocation15 + $0x14] ss:$8 sps:$4 sm:$0xff]  }
 0x693   : > { %7694 = vrcp.f32 %v4189_v4 }
 0x694   : > { %7696 = vrcp.f32 %v4197_v28  ;;  %v7523_v28 = vld [vmem:[#allocation15 + $0xa0] ss:$8 sps:$4 sm:$0xff]  }
 0x695   : > { %7698 = vrcp.f32 %v4201_v50 }
 0x69b   : > { %v7685_v7 = vpop.eup %7684 }
 0x69c   : > { %v7687_v0 = vpop.eup %7686  ;;  %v4228_v53 = vmul.f32 %v7685_v7, %v8927_v43  ;;  %v4227_v14 = vmul.f32 %v7685_v7, %v8958_v30  ;;  %v7507_v30 = vld [vmem:[#allocation15 + $0x4] ss:$8 sps:$4 sm:$0xff]   ;;  %v7505_v7 = vld [vmem:[#allocation15] ss:$8 sps:$4 sm:$0xff]  }
 0x69d   : > { %v9014_v34 = vpop.eup %7688  ;;  %v4215_v27 = vmul.f32 %v7687_v0, %v8917_v37  ;;  %v4216_v5 = vmul.f32 %v7687_v0, %v8921_v3  ;;  %v7486_v37 = vld [vmem:[#allocation15 + $0x74] ss:$8 sps:$4 sm:$0xff]   ;;  %v7489_v3 = vld [vmem:[#allocation15 + $0x64] ss:$8 sps:$4 sm:$0xff]  }
 0x69e   : > { %4285 = vperm.xlu1 %7003, %v4228_v53   ;;  %v4236_v23 = vmul.f32 %v9014_v34, %v8936_v19  ;;  %v7691_v49 = vpop.eup %7690  ;;  %4892 = vmatprep.subr.bf16.mxu1 %v7486_v37  ;;  %v7520_v37 = vld [vmem:[#allocation15 + $0xb0] ss:$8 sps:$4 sm:$0xff]  }
 0x69f   : > { %4240 = vperm.xlu0 %7002, %v4215_v27   ;;  %v4218_v43 = vmul.f32 %v7691_v49, %v8925_v18  ;;  %v4219_v26 = vmul.f32 %v7691_v49, %v8933_v1  ;;  %v7693_v59 = vpop.eup %7692  ;;  %4893 = vmatpush1.bf16.msra.mxu1 %v7484_v20  ;;  %v7492_v1 = vld [vmem:[#allocation15 + $0x54] ss:$8 sps:$4 sm:$0xff]   ;;  %v4237_v49 = vmul.f32 %v9014_v34, %v8973_v45  ;;  %v7525_v20 = vld [vmem:[#allocation15 + $0xa4] ss:$8 sps:$4 sm:$0xff]   ;;  %v7526_v34 = vld [vmem:[#allocation15 + $0x90] ss:$8 sps:$4 sm:$0xff]  }
 0x6a0   : > { %v4221_v19 = vmul.f32 %v7693_v59, %v8940_v58  ;;  %v4222_v35 = vmul.f32 %v7693_v59, %v8945_v21  ;;  %4894 = vmatprep.subr.bf16.mxu1 %v7489_v3  ;;  %v7695_v18 = vpop.eup %7694  ;;  %v7495_v58 = vld [vmem:[#allocation15 + $0x44] ss:$8 sps:$4 sm:$0xff]   ;;  %v7498_v21 = vld [vmem:[#allocation15 + $0x34] ss:$8 sps:$4 sm:$0xff]   ;;  %v7517_v59 = vld [vmem:[#allocation15 + $0xc0] ss:$8 sps:$4 sm:$0xff]  }
 0x6a1   : > { %v4224_v60 = vmul.f32 %v7695_v18, %v8949_v38  ;;  %v4225_v39 = vmul.f32 %v7695_v18, %v8953_v44  ;;  %v7697_v8 = vpop.eup %7696  ;;  %v7501_v38 = vld [vmem:[#allocation15 + $0x24] ss:$8 sps:$4 sm:$0xff]   ;;  %v7502_v44 = vld [vmem:[#allocation15 + $0x10] ss:$8 sps:$4 sm:$0xff]   ;;  %v7528_v45 = vld [vmem:[#allocation15 + $0x94] ss:$8 sps:$4 sm:$0xff]  }
 0x6a2   : > { %4310 = vperm.xlu1 %7003, %v4236_v23   ;;  %v4230_v22 = vmul.f32 %v7697_v8, %v8961_v51  ;;  %v4231_v0 = vmul.f32 %v7697_v8, %v8964_v16  ;;  %v7699_v53 = vpop.eup %7698  ;;  %v7510_v23 = vld [vmem:[#allocation15 + $0xf4] ss:$8 sps:$4 sm:$0xff]   ;;  %v7508_v51 = vld [vmem:[#allocation15 + $0xf0] ss:$8 sps:$4 sm:$0xff]   ;;  %v7511_v16 = vld [vmem:[#allocation15 + $0xe0] ss:$8 sps:$4 sm:$0xff]  }
 0x6a3   : > { %4245 = vperm.xlu0 %7002, %v4216_v5   ;;  %4895 = vmatpush1.bf16.msra.mxu1 %v7487_v36  ;;  %v4233_v27 = vmul.f32 %v7699_v53, %v8967_v57  ;;  %v4234_v4 = vmul.f32 %v7699_v53, %v8970_v46  ;;  %v7513_v5 = vld [vmem:[#allocation15 + $0xe4] ss:$8 sps:$4 sm:$0xff]   ;;  %v7514_v57 = vld [vmem:[#allocation15 + $0xd0] ss:$8 sps:$4 sm:$0xff]   ;;  %v7522_v46 = vld [vmem:[#allocation15 + $0xb4] ss:$8 sps:$4 sm:$0xff]  }
 0x6a4   : > { %4896 = vmatprep.subr.bf16.mxu1 %v7492_v1  ;;  %v6304_v3 = vld [vmem:[%s8540_s5 + $0x8] sm:$0xff]  ;;  %s9783_s5 = sld [smem:[#allocation76_spill]] }
 0x6a5   : > { %v1718_v36 = vrot.slane %v6304_v3, %v8608_v41  ;;  %v1729_v18 = vrot.slane %v6304_v3, %v8605_v40  ;;  %v1740_v1 = vrot.slane %v6304_v3, %v8614_v48  ;;  %v1762_v50 = vrot.slane %v6304_v3, %v8622_v56  ;;  %v7565_v8 = vld [vmem:[#allocation17 + $0x30] sm:$0xff]   ;;  %v9108_v48 = vld [vmem:[#allocation2 + $0x10] sm:$0xff] }
 0x6a6   : > { %9719 = vst [vmem:[#allocation53_spill] sm:$0xff] %v9108_v48 }
 0x6a7   : > { %4250 = vperm.xlu0 %7002, %v4218_v43   ;;  %4897 = vmatpush1.bf16.msra.mxu1 %v7490_v25  ;;  %v7516_v43 = vld [vmem:[#allocation15 + $0xd4] ss:$8 sps:$4 sm:$0xff]   ;;  %v1751_v25 = vrot.slane %v6304_v3, %v8618_v52 }
 0x6a8   : > { %4898 = vmatprep.subr.bf16.mxu1 %v7495_v58  ;;  %1720 = vbcast.lane.b32.xlu1 %v1718_v36, 256  ;;  %v1784_v58 = vrot.slane %v6304_v3, %v8635_v2  ;;  %v7574_v2 = vld [vmem:[#allocation17 + $0x60] sm:$0xff]  }
 0x6ab   : > { %4255 = vperm.xlu0 %7002, %v4219_v26   ;;  %4899 = vmatpush1.bf16.msra.mxu1 %v7493_v33  ;;  %v7519_v26 = vld [vmem:[#allocation15 + $0xc4] ss:$8 sps:$4 sm:$0xff]   ;;  %v7534_v33 = vld [vmem:[#allocation11 + $0x74] ss:$8 sps:$4 sm:$0xff]  }
 0x6ac   : > { %4900 = vmatprep.subr.bf16.mxu1 %v7498_v21  ;;  %1731 = vbcast.lane.b32.xlu1 %v1729_v18, 256  ;;  %v7559_v21 = vld [vmem:[#allocation17 + $0x78] sm:$0xff]  }
 0x6ad   : > { %6750 = vmatprep.subr.bf16.mxu0 %v7559_v21  ;;  %v9064_v21 = vld [vmem:[#allocation2 + $0x40] sm:$0xff] }
 0x6af   : > { %4260 = vperm.xlu0 %7002, %v4221_v19   ;;  %4901 = vmatpush1.bf16.msra.mxu1 %v7496_v17  ;;  %v7531_v19 = vld [vmem:[#allocation15 + $0x84] ss:$8 sps:$4 sm:$0xff]   ;;  %v7560_v17 = vld [vmem:[#allocation17 + $0x38] sm:$0xff]  }
 0x6b0   : > { %4902 = vmatprep.subr.bf16.mxu1 %v7501_v38  ;;  %1742 = vbcast.lane.b32.xlu1 %v1740_v1, 256  ;;  %v7569_v38 = vld [vmem:[#allocation17 + $0x68] sm:$0xff]  }
 0x6b1   : > { %6751 = vmatpush3.bf16.msra.mxu0 %v7560_v17 }
 0x6b3   : > { %4265 = vperm.xlu0 %7002, %v4222_v35   ;;  %4903 = vmatpush1.bf16.msra.mxu1 %v7499_v15  ;;  %v7529_v35 = vld [vmem:[#allocation15 + $0x80] ss:$8 sps:$4 sm:$0xff]  }
 0x6b4   : > { %4904 = vmatprep.subr.bf16.mxu1 %v7504_v31  ;;  %1753 = vbcast.lane.b32.xlu1 %v1751_v25, 256  ;;  %v7570_v15 = vld [vmem:[#allocation17 + $0x28] sm:$0xff]   ;;  %v7579_v31 = vld [vmem:[#allocation17 + $0x58] sm:$0xff]  }
 0x6b7   : > { %4270 = vperm.xlu0 %7002, %v4224_v60   ;;  %4905 = vmatpush1.bf16.msra.mxu1 %v7502_v44  ;;  %v1773_v60 = vrot.slane %v6304_v3, %v8630_v62  ;;  %v7580_v44 = vld [vmem:[#allocation17 + $0x18] sm:$0xff]  }
 0x6b8   : > { %4906 = vmatprep.subr.bf16.mxu1 %v7507_v30  ;;  %1764 = vbcast.lane.b32.xlu1 %v1762_v50, 256 }
 0x6bb   : > { %4275 = vperm.xlu0 %7002, %v4225_v39   ;;  %4907 = vmatpush1.bf16.msra.mxu1 %v7505_v7  ;;  %v1795_v39 = vrot.slane %v6304_v3, %v8639_v6 }
 0x6bc   : > { %4908 = vmatprep.subr.bf16.mxu1 %v7510_v23  ;;  %1775 = vbcast.lane.b32.xlu1 %v1773_v60, 256  ;;  %v9045_v23 = vld [vmem:[#allocation2 + $0xd8] sm:$0xff] }
 0x6bf   : > { %4280 = vperm.xlu0 %7002, %v4227_v14   ;;  %4909 = vmatpush2.bf16.msra.mxu1 %v7508_v51  ;;  %v7564_v14 = vld [vmem:[#allocation17 + $0x70] sm:$0xff]  }
 0x6c0   : > { %4910 = vmatprep.subr.bf16.mxu1 %v7513_v5  ;;  %1786 = vbcast.lane.b32.xlu1 %v1784_v58, 256 }
 0x6c1   : > { %6752 = vmatprep.subr.bf16.mxu0 %v7564_v14  ;;  %v9067_v14 = vld [vmem:[#allocation2 + $0x80] sm:$0xff] }
 0x6c2   : > { %6753 = vmatpush3.bf16.msra.mxu0 %v7565_v8 }
 0x6c3   : > { %4290 = vperm.xlu0 %7002, %v4230_v22   ;;  %4911 = vmatpush2.bf16.msra.mxu1 %v7511_v16  ;;  %v7575_v22 = vld [vmem:[#allocation17 + $0x20] sm:$0xff]  }
 0x6c4   : > { %4912 = vmatprep.subr.bf16.mxu1 %v7516_v43  ;;  %1797 = vbcast.lane.b32.xlu1 %v1795_v39, 256  ;;  %v9051_v16 = vld [vmem:[#allocation2 + $0x18] sm:$0xff] }
 0x6c5   : > { %6754 = vmatprep.subr.bf16.mxu0 %v7569_v38  ;;  %v9070_v38 = vld [vmem:[#allocation2 + $0x88] sm:$0xff] }
 0x6c6   : > { %6755 = vmatpush3.bf16.msra.mxu0 %v7570_v15 }
 0x6c7   : > { %4295 = vperm.xlu0 %7002, %v4231_v0   ;;  %4913 = vmatpush2.bf16.msra.mxu1 %v7514_v57  ;;  %v7584_v0 = vld [vmem:[#allocation17 + $0x50] sm:$0xff]  }
 0x6c8   : > { %4914 = vmatprep.subr.bf16.mxu1 %v7519_v26  ;;  %6756 = vmatprep.subr.bf16.mxu0 %v7574_v2  ;;  %v9055_v26 = vld [vmem:[#allocation2] sm:$0xff]  ;;  %v9075_v2 = vld [vmem:[#allocation2 + $0x38] sm:$0xff] }
 0x6ca   : > { %6757 = vmatpush3.bf16.msra.mxu0 %v7575_v22 }
 0x6cb   : > { %4300 = vperm.xlu0 %7002, %v4233_v27   ;;  %4915 = vmatpush2.bf16.msra.mxu1 %v7517_v59 }
 0x6cc   : > { %4916 = vmatprep.subr.bf16.mxu1 %v7522_v46  ;;  %6758 = vmatprep.subr.bf16.mxu0 %v7579_v31 }
 0x6ce   : > { %6759 = vmatpush3.bf16.msra.mxu0 %v7580_v44  ;;  %v9078_v44 = vld [vmem:[#allocation2 + $0x58] sm:$0xff] }
 0x6cf   : > { %4305 = vperm.xlu0 %7002, %v4234_v4   ;;  %4917 = vmatpush2.bf16.msra.mxu1 %v7520_v37  ;;  %v9048_v4 = vld [vmem:[#allocation2 + $0xb0] sm:$0xff] }
 0x6d0   : > { %4918 = vmatprep.subr.bf16.mxu1 %v7525_v20  ;;  %6760 = vmatprep.subr.bf16.mxu0 %v7584_v0 }
 0x6d3   : > { %4315 = vperm.xlu0 %7002, %v4237_v49   ;;  %4919 = vmatpush2.bf16.msra.mxu1 %v7523_v28 }
 0x6d4   : > { %4920 = vmatprep.subr.bf16.mxu1 %v7528_v45 }
 0x6d7   : > { %4921 = vmatpush2.bf16.msra.mxu1 %v7526_v34  ;;  %1724 = vbcast.lane.b32.xlu0 %v1718_v36, 264 }
 0x6d8   : > { %4922 = vmatprep.subr.bf16.mxu1 %v7531_v19 }
 0x6db   : > { %4923 = vmatpush2.bf16.msra.mxu1 %v7529_v35  ;;  %1735 = vbcast.lane.b32.xlu0 %v1729_v18, 264 }
 0x6dc   : > { %5214 = vmatprep.subr.bf16.mxu1 %v7534_v33 }
 0x6df   : > { %1746 = vbcast.lane.b32.xlu0 %v1740_v1, 264 }
 0x6e3   : > { %1757 = vbcast.lane.b32.xlu0 %v1751_v25, 264 }
 0x6e7   : > { %1768 = vbcast.lane.b32.xlu0 %v1762_v50, 264 }
 0x6eb   : > { %1779 = vbcast.lane.b32.xlu0 %v1773_v60, 264 }
 0x6ef   : > { %1790 = vbcast.lane.b32.xlu0 %v1784_v58, 264 }
 0x6f3   : > { %1801 = vbcast.lane.b32.xlu0 %v1795_v39, 264 }
 0x719   : > { %v4286_v25 = vpop.permute.xlu1 %4285 }
 0x71a   : > { %v4241_v6 = vpop.permute.xlu0 %4240 }
 0x71b   : > { %v4318_v5 = vmul.f32 %v9048_v4, %v4241_v6  ;;  %v4319_v59 = vmul.f32 %v9055_v26, %v4241_v6 }
 0x71e   : > { %v4246_v53 = vpop.permute.xlu0 %4245 }
 0x71f   : > { %v4320_v51 = vmul.f32 %v9045_v23, %v4246_v53  ;;  %v4321_v49 = vmul.f32 %v9051_v16, %v4246_v53 }
 0x721   : > { %v4350_v46 = vadd.f32 %v4320_v51, %v4318_v5  ;;  %v4357_v20 = vadd.f32 %v4321_v49, %v4319_v59 }
 0x722   : > { %v4251_v30 = vpop.permute.xlu0 %4250 }
 0x723   : > { %v4322_v37 = vmul.f32 %v8769_v54, %v4251_v30  ;;  %v4351_v19 = vrot.slane %v4350_v46, 4  ;;  %v4323_v3 = vmul.f32 %v8772_v55, %v4251_v30  ;;  %v4358_v36 = vrot.slane %v4357_v20, 4 }
 0x724   : > { %v4336_v55 = vmul.f32 %v9064_v21, %v4286_v25 }
 0x725   : > { %v4352_v1 = vadd.f32 %v4351_v19, %v4350_v46  ;;  %v4359_v50 = vadd.f32 %v4358_v36, %v4357_v20 }
 0x726   : > { %v4256_v7 = vpop.permute.xlu0 %4255 }
 0x727   : > { %v4324_v43 = vmul.f32 %v8779_v63, %v4256_v7  ;;  %v4325_v28 = vmul.f32 %v8782_v32, %v4256_v7  ;;  %v4353_v17 = vrot.slane %v4352_v1, 2  ;;  %v4360_v22 = vrot.slane %v4359_v50, 2 }
 0x729   : > { %v4364_v45 = vadd.f32 %v4324_v43, %v4322_v37  ;;  %v4371_v18 = vadd.f32 %v4325_v28, %v4323_v3  ;;  %v4354_v5 = vadd.f32 %v4353_v17, %v4352_v1  ;;  %v9085_v3 = vld [vmem:[#allocation2 + $0xe0] sm:$0xff] }
 0x72a   : > { %v4261_v27 = vpop.permute.xlu0 %4260 }
 0x72b   : > { %v4365_v35 = vrot.slane %v4364_v45, 4  ;;  %v4372_v58 = vrot.slane %v4371_v18, 4  ;;  %v4326_v8 = vmul.f32 %v9067_v14, %v4261_v27  ;;  %v4327_v15 = vmul.f32 %v9070_v38, %v4261_v27 }
 0x72d   : > { %v4366_v60 = vadd.f32 %v4365_v35, %v4364_v45  ;;  %v4373_v6 = vadd.f32 %v4372_v58, %v4371_v18  ;;  %v9091_v35 = vld [vmem:[#allocation2 + $0x70] sm:$0xff]  ;;  %v4311_v58 = vpop.permute.xlu1 %4310 }
 0x72e   : > { %v4266_v57 = vpop.permute.xlu0 %4265 }
 0x72f   : > { %v4328_v33 = vmul.f32 %v8787_v12, %v4266_v57  ;;  %v4329_v54 = vmul.f32 %v8790_v24, %v4266_v57  ;;  %v4367_v31 = vrot.slane %v4366_v60, 2  ;;  %v4361_v57 = vadd.f32 %v4360_v22, %v4359_v50 }
 0x730   : > { %v4374_v59 = vrot.slane %v4373_v6, 2 }
 0x731   : > { %v4378_v53 = vadd.f32 %v4328_v33, %v4326_v8  ;;  %v4385_v30 = vadd.f32 %v4329_v54, %v4327_v15  ;;  %v4368_v37 = vadd.f32 %v4367_v31, %v4366_v60  ;;  %v9097_v31 = vld [vmem:[#allocation2 + $0xa0] sm:$0xff] }
 0x732   : > { %v4271_v34 = vpop.permute.xlu0 %4270  ;;  %v4375_v33 = vadd.f32 %v4374_v59, %v4373_v6 }
 0x733   : > { %v4330_v12 = vmul.f32 %v8797_v42, %v4271_v34  ;;  %v4331_v7 = vmul.f32 %v8800_v47, %v4271_v34  ;;  %v9082_v42 = vld [vmem:[#allocation2 + $0xc8] sm:$0xff]  ;;  %v4379_v20 = vrot.slane %v4378_v53, 4  ;;  %v4386_v28 = vrot.slane %v4385_v30, 4  ;;  %v9088_v34 = vld [vmem:[#allocation2 + $0x90] sm:$0xff] }
 0x734   : > { %v4369_v17 = vrot.slane %v4368_v37, 1 }
 0x735   : > { %v4380_v8 = vadd.f32 %v4379_v20, %v4378_v53 }
 0x736   : > { %v4276_v63 = vpop.permute.xlu0 %4275 }
 0x737   : > { %v4332_v32 = vmul.f32 %v8805_v9, %v4276_v63  ;;  %v4333_v24 = vmul.f32 %v8808_v13, %v4276_v63  ;;  %v4337_v13 = vmul.f32 %v9082_v42, %v4286_v25  ;;  %v9094_v63 = vld [vmem:[#allocation2 + $0xc0] sm:$0xff]  ;;  %v4355_v25 = vrot.slane %v4354_v5, 1 }
 0x739   : > { %v4392_v27 = vadd.f32 %v4332_v32, %v4330_v12  ;;  %v4399_v49 = vadd.f32 %v4333_v24, %v4331_v7  ;;  %v4387_v12 = vadd.f32 %v4386_v28, %v4385_v30  ;;  %v9100_v7 = vld [vmem:[#allocation2 + $0xf8] sm:$0xff]  ;;  %v4356_v59 = vadd.f32 %v4355_v25, %v4354_v5 }
 0x73a   : > { %v4281_v39 = vpop.permute.xlu0 %4280  ;;  %9717 = vst [vmem:[#allocation51_spill] sm:$0xff] %v9100_v7  ;;  %v4370_v30 = vadd.f32 %v4369_v17, %v4368_v37  ;;  %v9114_v37 = vld [vmem:[#allocation2 + $0x28] sm:$0xff] }
 0x73b   : > { %v4334_v9 = vmul.f32 %v9075_v2, %v4281_v39  ;;  %v4335_v0 = vmul.f32 %v9078_v44, %v4281_v39  ;;  %v4393_v45 = vrot.slane %v4392_v27, 4  ;;  %v4400_v50 = vrot.slane %v4399_v49, 4  ;;  %9721 = vst [vmem:[#allocation55_spill] sm:$0xff] %v9114_v37 }
 0x73d   : > { %v4406_v43 = vadd.f32 %v4336_v55, %v4334_v9  ;;  %v4413_v46 = vadd.f32 %v4337_v13, %v4335_v0  ;;  %v4362_v55 = vrot.slane %v4361_v57, 1  ;;  %v4394_v24 = vadd.f32 %v4393_v45, %v4392_v27 }
 0x73e   : > { %v4291_v51 = vpop.permute.xlu0 %4290  ;;  %v4346_v0 = vmul.f32 %v9097_v31, %v4311_v58  ;;  %v4401_v6 = vadd.f32 %v4400_v50, %v4399_v49  ;;  %v4381_v27 = vrot.slane %v4380_v8, 2  ;;  %v4388_v45 = vrot.slane %v4387_v12, 2 }
 0x73f   : > { %v4338_v47 = vmul.f32 %v9085_v3, %v4291_v51  ;;  %v4339_v36 = vmul.f32 %v9088_v34, %v4291_v51  ;;  %v4407_v60 = vrot.slane %v4406_v43, 4  ;;  %v4414_v54 = vrot.slane %v4413_v46, 4 }
 0x740   : > { %v4347_v51 = vmul.f32 %v9100_v7, %v4311_v58  ;;  %v9103_v53 = vadd.f32 %v4362_v55, %v4361_v57  ;;  %v4402_v5 = vrot.slane %v4401_v6, 2 }
 0x741   : > { %v4408_v13 = vadd.f32 %v4407_v60, %v4406_v43 }
 0x742   : > { %v4296_v19 = vpop.permute.xlu0 %4295  ;;  %v4403_v10 = vadd.f32 %v4402_v5, %v4401_v6 }
 0x743   : > { %v4340_v18 = vmul.f32 %v9091_v35, %v4296_v19  ;;  %v4341_v1 = vmul.f32 %v9094_v63, %v4296_v19  ;;  %v4376_v19 = vrot.slane %v4375_v33, 1  ;;  %v4409_v43 = vrot.slane %v4408_v13, 2 }
 0x744   : > { %v4404_v52 = vrot.slane %v4403_v10, 1 }
 0x745   : > { %v4420_v32 = vadd.f32 %v4340_v18, %v4338_v47  ;;  %v4427_v39 = vadd.f32 %v4341_v1, %v4339_v36  ;;  %v4415_v47 = vadd.f32 %v4414_v54, %v4413_v46  ;;  %v4395_v18 = vrot.slane %v4394_v24, 2  ;;  %v9105_v1 = vld [vmem:[#allocation2 + $0xa8] sm:$0xff]  ;;  %v9111_v46 = vld [vmem:[#allocation2 + $0xd0] sm:$0xff] }
 0x746   : > { %v4301_v15 = vpop.permute.xlu0 %4300  ;;  %9718 = vst [vmem:[#allocation52_spill] sm:$0xff] %v9105_v1  ;;  %9720 = vst [vmem:[#allocation54_spill] sm:$0xff] %v9111_v46  ;;  %v4377_v50 = vadd.f32 %v4376_v19, %v4375_v33  ;;  %v4410_v62 = vadd.f32 %v4409_v43, %v4408_v13  ;;  %v9121_v33 = vld [vmem:[#allocation2 + $0x98] sm:$0xff] }
 0x747   : > { %v4421_v9 = vrot.slane %v4420_v32, 4  ;;  %v4428_v22 = vrot.slane %v4427_v39, 4  ;;  %v4342_v56 = vmul.f32 %v9105_v1, %v4301_v15  ;;  %v4343_v57 = vmul.f32 %v9111_v46, %v4301_v15  ;;  %9723 = vst [vmem:[#allocation57_spill] sm:$0xff] %v9121_v33 }
 0x748   : > { %v4416_v60 = vrot.slane %v4415_v47, 2  ;;  %v4396_v11 = vadd.f32 %v4395_v18, %v4394_v24  ;;  %v4411_v6 = vrot.slane %v4410_v62, 1 }
 0x749   : > { %v4422_v36 = vadd.f32 %v4421_v9, %v4420_v32  ;;  %v4429_v20 = vadd.f32 %v4428_v22, %v4427_v39  ;;  %v4478_v32 = vsel %vm1963_vm0, %v4370_v30, %v4356_v59  ;;  %v4382_v39 = vadd.f32 %v4381_v27, %v4380_v8 }
 0x74a   : > { %v4306_v28 = vpop.permute.xlu0 %4305  ;;  %v4389_v22 = vadd.f32 %v4388_v45, %v4387_v12  ;;  %v4417_v19 = vadd.f32 %v4416_v60, %v4415_v47  ;;  %v4397_v18 = vrot.slane %v4396_v11, 1 }
 0x74b   : > { %v4344_v49 = vmul.f32 %v9108_v48, %v4306_v28  ;;  %v4345_v25 = vmul.f32 %v9114_v37, %v4306_v28  ;;  %v4423_v58 = vrot.slane %v4422_v36, 2  ;;  %v4430_v55 = vrot.slane %v4429_v20, 2 }
 0x74c   : > { %v4383_v27 = vrot.slane %v4382_v39, 1  ;;  %v4390_v45 = vrot.slane %v4389_v22, 1  ;;  %v4418_v43 = vrot.slane %v4417_v19, 1 }
 0x74d   : > { %v4434_v54 = vadd.f32 %v4344_v49, %v4342_v56  ;;  %v4441_v17 = vadd.f32 %v4345_v25, %v4343_v57  ;;  %v4424_v59 = vadd.f32 %v4423_v58, %v4422_v36  ;;  %v4431_v49 = vadd.f32 %v4430_v55, %v4429_v20 }
 0x74e   : > { %v4316_v9 = vpop.permute.xlu0 %4315  ;;  %v4384_v47 = vadd.f32 %v4383_v27, %v4382_v39  ;;  %v4391_v60 = vadd.f32 %v4390_v45, %v4389_v22  ;;  %v4398_v20 = vadd.f32 %v4397_v18, %v4396_v11  ;;  %v4412_v55 = vadd.f32 %v4411_v6, %v4410_v62  ;;  %v7537_v6 = vld [vmem:[#allocation11 + $0x64] ss:$8 sps:$4 sm:$0xff]  }
 0x74f   : > { %v4435_v61 = vrot.slane %v4434_v54, 4  ;;  %v4348_v15 = vmul.f32 %v9118_v29, %v4316_v9  ;;  %v4442_v28 = vrot.slane %v4441_v17, 4  ;;  %v4349_v56 = vmul.f32 %v9121_v33, %v4316_v9 }
 0x750   : > { %v4425_v40 = vrot.slane %v4424_v59, 1  ;;  %v4432_v36 = vrot.slane %v4431_v49, 1 }
 0x751   : > { %v4436_v8 = vadd.f32 %v4435_v61, %v4434_v54  ;;  %v4448_v30 = vadd.f32 %v4348_v15, %v4346_v0  ;;  %v4443_v12 = vadd.f32 %v4442_v28, %v4441_v17  ;;  %v4455_v24 = vadd.f32 %v4349_v56, %v4347_v51 }
 0x752   : > { %v4405_v54 = vadd.f32 %v4404_v52, %v4403_v10  ;;  %v4485_v28 = vsel %vm1963_vm0, %v4377_v50, %v9103_v53  ;;  %v4419_v56 = vadd.f32 %v4418_v43, %v4417_v19  ;;  %v4426_v33 = vadd.f32 %v4425_v40, %v4424_v59  ;;  %v7541_v43 = vld [vmem:[#allocation11 + $0x40] ss:$8 sps:$4 sm:$0xff]  }
 0x753   : > { %v4437_v57 = vrot.slane %v4436_v8, 2  ;;  %v4449_v25 = vrot.slane %v4448_v30, 4  ;;  %v4444_v13 = vrot.slane %v4443_v12, 2  ;;  %v4456_v5 = vrot.slane %v4455_v24, 4 }
 0x754   : > { %v4433_v39 = vadd.f32 %v4432_v36, %v4431_v49  ;;  %v4486_v22 = vsel %vm1965_vm1, %v4391_v60, %v4485_v28  ;;  %v7549_v36 = vld [vmem:[#allocation11 + $0x24] ss:$8 sps:$4 sm:$0xff]   ;;  %v7550_v60 = vld [vmem:[#allocation11 + $0x10] ss:$8 sps:$4 sm:$0xff]  }
 0x755   : > { %v4438_v41 = vadd.f32 %v4437_v57, %v4436_v8  ;;  %v4450_v9 = vadd.f32 %v4449_v25, %v4448_v30  ;;  %v4445_v61 = vadd.f32 %v4444_v13, %v4443_v12  ;;  %v4457_v0 = vadd.f32 %v4456_v5, %v4455_v24  ;;  %v7532_v25 = vld [vmem:[#allocation11 + $0x70] ss:$8 sps:$4 sm:$0xff]   ;;  %v7543_v5 = vld [vmem:[#allocation11 + $0x44] ss:$8 sps:$4 sm:$0xff]  }
 0x756   : > { %v4479_v8 = vsel %vm1965_vm1, %v4384_v47, %v4478_v32  ;;  %v4487_v24 = vsel %vm1967_vm2, %v4405_v54, %v4486_v22  ;;  %v7538_v13 = vld [vmem:[#allocation11 + $0x50] ss:$8 sps:$4 sm:$0xff]   ;;  %v7581_v22 = vld [vmem:[#allocation11 + $0xa0] ss:$8 sps:$4 sm:$0xff]  }
 0x757   : > { %v4439_v58 = vrot.slane %v4438_v41, 1  ;;  %v4451_v51 = vrot.slane %v4450_v9, 2  ;;  %v4446_v17 = vrot.slane %v4445_v61, 1  ;;  %v4458_v15 = vrot.slane %v4457_v0, 2  ;;  %v7544_v47 = vld [vmem:[#allocation11 + $0x30] ss:$8 sps:$4 sm:$0xff]  }
 0x758   : > { %v4480_v11 = vsel %vm1967_vm2, %v4398_v20, %v4479_v8  ;;  %v4488_v40 = vsel %vm1969_vm3, %v4419_v56, %v4487_v24  ;;  %v7555_v20 = vld [vmem:[#allocation11 + $0x4] ss:$8 sps:$4 sm:$0xff]   ;;  %v7556_v54 = vld [vmem:[#allocation11 + $0xf0] ss:$8 sps:$4 sm:$0xff]   ;;  %v7571_v8 = vld [vmem:[#allocation11 + $0xc0] ss:$8 sps:$4 sm:$0xff]  }
 0x759   : > { %v4452_v7 = vadd.f32 %v4451_v51, %v4450_v9  ;;  %v4440_v30 = vadd.f32 %v4439_v58, %v4438_v41  ;;  %v4459_v27 = vadd.f32 %v4458_v15, %v4457_v0  ;;  %v4447_v12 = vadd.f32 %v4446_v17, %v4445_v61  ;;  %v7546_v9 = vld [vmem:[#allocation11 + $0x34] ss:$8 sps:$4 sm:$0xff]   ;;  %v7547_v61 = vld [vmem:[#allocation11 + $0x20] ss:$8 sps:$4 sm:$0xff]   ;;  %v7566_v28 = vld [vmem:[#allocation11 + $0xd0] ss:$8 sps:$4 sm:$0xff]  }
 0x75a   : > { %v4481_v62 = vsel %vm1969_vm3, %v4412_v55, %v4480_v11  ;;  %v4489_v41 = vsel %vm1971_vm4, %v4433_v39, %v4488_v40  ;;  %v7552_v0 = vld [vmem:[#allocation11 + $0x14] ss:$8 sps:$4 sm:$0xff]   ;;  %v7553_v58 = vld [vmem:[#allocation11] ss:$8 sps:$4 sm:$0xff]   ;;  %v7563_v55 = vld [vmem:[#allocation11 + $0xe4] ss:$8 sps:$4 sm:$0xff]  }
 0x75b   : > { %v4453_v52 = vrot.slane %v4452_v7, 1  ;;  %v4460_v10 = vrot.slane %v4459_v27, 1  ;;  %v4482_v50 = vsel %vm1971_vm4, %v4426_v33, %v4481_v62  ;;  %v4490_v59 = vsel %vm1973_vm5, %v4447_v12, %v4489_v41  ;;  %v7540_v33 = vld [vmem:[#allocation11 + $0x54] ss:$8 sps:$4 sm:$0xff]   ;;  %v7561_v17 = vld [vmem:[#allocation11 + $0xe0] ss:$8 sps:$4 sm:$0xff]  }
 0x75c   : > { %v4483_v19 = vsel %vm1973_vm5, %v4440_v30, %v4482_v50  ;;  %v7558_v51 = vld [vmem:[#allocation11 + $0xf4] ss:$8 sps:$4 sm:$0xff]   ;;  %v7573_v56 = vld [vmem:[#allocation11 + $0xc4] ss:$8 sps:$4 sm:$0xff]   ;;  %v7576_v30 = vld [vmem:[#allocation11 + $0xb0] ss:$8 sps:$4 sm:$0xff]  }
 0x75d   : > { %v4454_v53 = vadd.f32 %v4453_v52, %v4452_v7  ;;  %v4461_v32 = vadd.f32 %v4460_v10, %v4459_v27  ;;  %v7535_v7 = vld [vmem:[#allocation11 + $0x60] ss:$8 sps:$4 sm:$0xff]   ;;  %v7568_v15 = vld [vmem:[#allocation11 + $0xd4] ss:$8 sps:$4 sm:$0xff]   ;;  %v7583_v27 = vld [vmem:[#allocation11 + $0xa4] ss:$8 sps:$4 sm:$0xff]  }
 0x75e   : > { %v7578_v39 = vld [vmem:[#allocation11 + $0xb4] ss:$8 sps:$4 sm:$0xff]   ;;  %v7586_v12 = vld [vmem:[#allocation11 + $0x90] ss:$8 sps:$4 sm:$0xff]   ;;  %v7593_v24 = vld [vmem:[#allocation11 + $0x84] ss:$8 sps:$4 sm:$0xff]  }
 0x75f   : > { %v4484_v49 = vsel %vm1975_vm6, %v4454_v53, %v4483_v19  ;;  %v4491_v45 = vsel %vm1975_vm6, %v4461_v32, %v4490_v59  ;;  %v7585_v11 = vld [vmem:[#allocation17 + $0x10] sm:$0xff]   ;;  %v7589_v62 = vld [vmem:[#allocation17 + $0x48] sm:$0xff]   ;;  %v7594_v40 = vld [vmem:[#allocation17 + $0x40] sm:$0xff]   ;;  %v9138_v19 = vpop.permute.xlu1 %1720  ;;  %v9140_v59 = vpop.permute.xlu0 %1724 }
 0x760   : > { %v4494_v18 = vpack.c.bf16 %v4484_v49, %v4484_v49  ;;  %v4495_v57 = vpack.c.bf16 %v4491_v45, %v4491_v45  ;;  %v7588_v52 = vld [vmem:[#allocation11 + $0x94] ss:$8 sps:$4 sm:$0xff]   ;;  %6761 = vmatpush3.bf16.msra.mxu0 %v7585_v11  ;;  %v7590_v10 = vld [vmem:[#allocation17 + $0x8] sm:$0xff]   ;;  %v7595_v32 = vld [vmem:[#allocation17] sm:$0xff]  }
 0x761   : > { %6762 = vmatprep.subr.bf16.mxu0 %v7589_v62  ;;  %v7591_v53 = vld [vmem:[#allocation11 + $0x80] ss:$8 sps:$4 sm:$0xff]   ;;  %v9198_v11 = vld [vmem:[#allocation2 + $0x60] sm:$0xff] }
 0x762   : > { %4924 = vmatprep.mubr.bf16.mxu1 %v4495_v57  ;;  %v7596_v50 = vld [vmem:[#allocation17 + $0xf8] sm:$0xff]  }
 0x763   : > { %4925 = vmatmul.mubr.bf16.vlgmr.msra.gmra.mxu1 %v4494_v18  ;;  %v7597_v41 = vld [vmem:[#allocation17 + $0x178] sm:$0xff]   ;;  %v9142_v49 = vpop.permute.xlu1 %1731  ;;  %v9144_v45 = vpop.permute.xlu0 %1735 }
 0x764   : > { %5215 = vmatpush1.bf16.msra.mxu1 %v7532_v25  ;;  %6763 = vmatpush3.bf16.msra.mxu0 %v7590_v10 }
 0x765   : > { %5216 = vmatprep.subr.bf16.mxu1 %v7537_v6  ;;  %6764 = vmatprep.subr.bf16.mxu0 %v7594_v40 }
 0x767   : > { %v9146_v18 = vpop.permute.xlu1 %1742  ;;  %v9148_v57 = vpop.permute.xlu0 %1746 }
 0x768   : > { %5217 = vmatpush1.bf16.msra.mxu1 %v7535_v7  ;;  %6765 = vmatpush3.bf16.msra.mxu0 %v7595_v32  ;;  %v1803_v7 = vmul.f32 %v9048_v4, %v9138_v19  ;;  %v9170_v4 = vld [vmem:[#allocation2 + $0x30] sm:$0xff] }
 0x769   : > { %5218 = vmatprep.subr.bf16.mxu1 %v7540_v33  ;;  %6794 = vmatprep.subr.bf16.mxu0 %v7597_v41  ;;  %v1805_v33 = vmul.f32 %v9045_v23, %v9140_v59  ;;  %v1809_v23 = vmul.f32 %v9170_v4, %v9144_v45 }
 0x76b   : > { %v9150_v25 = vpop.permute.xlu1 %1753  ;;  %v9152_v6 = vpop.permute.xlu0 %1757 }
 0x76c   : > { %5219 = vmatpush1.bf16.msra.mxu1 %v7538_v13  ;;  %v1804_v13 = vmul.f32 %v9055_v26, %v9138_v19  ;;  %v9178_v26 = vld [vmem:[#allocation2 + $0x48] sm:$0xff] }
 0x76d   : > { %5220 = vmatprep.subr.bf16.mxu1 %v7543_v5  ;;  %v1806_v5 = vmul.f32 %v9051_v16, %v9140_v59 }
 0x770   : > { %5221 = vmatpush1.bf16.msra.mxu1 %v7541_v43  ;;  %v9162_v43 = vpop.permute.xlu1 %1764 }
 0x771   : > { %5222 = vmatprep.subr.bf16.mxu1 %v7546_v9  ;;  %v9164_v9 = vpop.permute.xlu0 %1768 }
 0x774   : > { %5223 = vmatpush1.bf16.msra.mxu1 %v7544_v47  ;;  %v1835_v47 = vadd.f32 %v1805_v33, %v1803_v7  ;;  %v1819_v33 = vmul.f32 %v9075_v2, %v9162_v43 }
 0x775   : > { %5224 = vmatprep.subr.bf16.mxu1 %v7549_v36  ;;  %v9166_v36 = vld [vmem:[#allocation2 + $0x50] sm:$0xff] }
 0x778   : > { %5225 = vmatpush1.bf16.msra.mxu1 %v7547_v61  ;;  %v1807_v61 = vmul.f32 %v9166_v36, %v9142_v49 }
 0x779   : > { %5226 = vmatprep.subr.bf16.mxu1 %v7552_v0  ;;  %v9174_v0 = vld [vmem:[#allocation2 + $0x68] sm:$0xff] }
 0x77a   : > { %v1808_v16 = vmul.f32 %v9174_v0, %v9142_v49 }
 0x77c   : > { %5227 = vmatpush1.bf16.msra.mxu1 %v7550_v60  ;;  %v1810_v60 = vmul.f32 %v9178_v26, %v9144_v45 }
 0x77d   : > { %5228 = vmatprep.subr.bf16.mxu1 %v7555_v20  ;;  %v1842_v20 = vadd.f32 %v1806_v5, %v1804_v13  ;;  %v1821_v13 = vmul.f32 %v9064_v21, %v9164_v9 }
 0x780   : > { %5229 = vmatpush1.bf16.msra.mxu1 %v7553_v58  ;;  %v1811_v58 = vmul.f32 %v9067_v14, %v9146_v18 }
 0x781   : > { %5230 = vmatprep.subr.bf16.mxu1 %v7558_v51  ;;  %v9184_v51 = vld [vmem:[#allocation2 + $0xe8] sm:$0xff] }
 0x784   : > { %5231 = vmatpush2.bf16.msra.mxu1 %v7556_v54  ;;  %v1813_v54 = vmul.f32 %v9184_v51, %v9148_v57 }
 0x785   : > { %5232 = vmatprep.subr.bf16.mxu1 %v7563_v55  ;;  %v1836_v55 = vrot.slane %v1835_v47, 4 }
 0x788   : > { %5233 = vmatpush2.bf16.msra.mxu1 %v7561_v17  ;;  %v1849_v17 = vadd.f32 %v1809_v23, %v1807_v61 }
 0x789   : > { %5234 = vmatprep.subr.bf16.mxu1 %v7568_v15  ;;  %v9188_v15 = vpop.permute.xlu1 %1775 }
 0x78a   : > { %9724 = vst [vmem:[#allocation58_spill] sm:$0xff] %v9188_v15  ;;  %v1850_v10 = vrot.slane %v1849_v17, 4  ;;  %v1823_v2 = vmul.f32 %v9085_v3, %v9188_v15 }
 0x78c   : > { %5235 = vmatpush2.bf16.msra.mxu1 %v7566_v28  ;;  %v9190_v28 = vpop.permute.xlu0 %1779 }
 0x78d   : > { %5236 = vmatprep.subr.bf16.mxu1 %v7573_v56  ;;  %9725 = vst [vmem:[#allocation59_spill] sm:$0xff] %v9190_v28  ;;  %v1856_v56 = vadd.f32 %v1810_v60, %v1808_v16  ;;  %v9218_v5 = vpop.permute.xlu1 %1786  ;;  %v1820_v16 = vmul.f32 %v9078_v44, %v9162_v43  ;;  %v1822_v60 = vmul.f32 %v9082_v42, %v9164_v9 }
 0x78e   : > { %9728 = vst [vmem:[#allocation62_spill] sm:$0xff] %v9218_v5  ;;  %v1825_v21 = vmul.f32 %v9091_v35, %v9190_v28  ;;  %v1826_v44 = vmul.f32 %v9094_v63, %v9190_v28  ;;  %v1827_v3 = vmul.f32 %v9105_v1, %v9218_v5  ;;  %v1828_v63 = vmul.f32 %v9111_v46, %v9218_v5  ;;  %v9733_v46 = vld [vmem:[#allocation57_spill] sm:$0xff] }
 0x790   : > { %5237 = vmatpush2.bf16.msra.mxu1 %v7571_v8  ;;  %v1812_v8 = vmul.f32 %v9070_v38, %v9146_v18  ;;  %v9206_v38 = vld [vmem:[#allocation2 + $0xf0] sm:$0xff] }
 0x791   : > { %5238 = vmatprep.subr.bf16.mxu1 %v7578_v39  ;;  %v9194_v39 = vld [vmem:[#allocation2 + $0xb8] sm:$0xff] }
 0x792   : > { %v1814_v14 = vmul.f32 %v9194_v39, %v9148_v57 }
 0x794   : > { %5239 = vmatpush2.bf16.msra.mxu1 %v7576_v30  ;;  %v1843_v30 = vrot.slane %v1842_v20, 4  ;;  %v1870_v32 = vadd.f32 %v1814_v14, %v1812_v8  ;;  %v1891_v14 = vadd.f32 %v1821_v13, %v1819_v33 }
 0x795   : > { %5240 = vmatprep.subr.bf16.mxu1 %v7583_v27  ;;  %v1863_v27 = vadd.f32 %v1813_v54, %v1811_v58 }
 0x796   : > { %v1844_v41 = vadd.f32 %v1843_v30, %v1842_v20  ;;  %v1851_v20 = vadd.f32 %v1850_v10, %v1849_v17  ;;  %v1824_v30 = vmul.f32 %v9088_v34, %v9188_v15  ;;  %v1892_v33 = vrot.slane %v1891_v14, 4 }
 0x797   : > { %v1864_v7 = vrot.slane %v1863_v27, 4 }
 0x798   : > { %5241 = vmatpush2.bf16.msra.mxu1 %v7581_v22  ;;  %v1837_v22 = vadd.f32 %v1836_v55, %v1835_v47  ;;  %v9220_v47 = vpop.permute.xlu0 %1790  ;;  %v1871_v55 = vrot.slane %v1870_v32, 4  ;;  %v1845_v42 = vrot.slane %v1844_v41, 2  ;;  %v1912_v13 = vadd.f32 %v1826_v44, %v1824_v30 }
 0x799   : > { %5242 = vmatprep.subr.bf16.mxu1 %v7588_v52  ;;  %v9202_v52 = vld [vmem:[#allocation2 + $0x8] sm:$0xff]  ;;  %9729 = vst [vmem:[#allocation63_spill] sm:$0xff] %v9220_v47  ;;  %v1865_v8 = vadd.f32 %v1864_v7, %v1863_v27  ;;  %v1829_v35 = vmul.f32 %v9108_v48, %v9220_v47  ;;  %v9238_v27 = vpop.permute.xlu1 %1797 }
 0x79a   : > { %9726 = vst [vmem:[#allocation60_spill] sm:$0xff] %v9202_v52  ;;  %v1817_v62 = vmul.f32 %v9202_v52, %v9152_v6  ;;  %v1838_v61 = vrot.slane %v1837_v22, 2  ;;  %9730 = vst [vmem:[#allocation64_spill] sm:$0xff] %v9238_v27  ;;  %v1872_v34 = vadd.f32 %v1871_v55, %v1870_v32 }
 0x79b   : > { %v1866_v7 = vrot.slane %v1865_v8, 2  ;;  %v1919_v55 = vadd.f32 %v1829_v35, %v1827_v3 }
 0x79c   : > { %5243 = vmatpush2.bf16.msra.mxu1 %v7586_v12  ;;  %v1815_v12 = vmul.f32 %v9198_v11, %v9150_v25 }
 0x79d   : > { %5244 = vmatprep.subr.bf16.mxu1 %v7593_v24  ;;  %v1816_v24 = vmul.f32 %v9206_v38, %v9150_v25  ;;  %v1920_v3 = vrot.slane %v1919_v55, 4 }
 0x79e   : > { %v1877_v23 = vadd.f32 %v1817_v62, %v1815_v12  ;;  %v1839_v12 = vadd.f32 %v1838_v61, %v1837_v22  ;;  %v1898_v62 = vadd.f32 %v1822_v60, %v1820_v16  ;;  %v1830_v22 = vmul.f32 %v9114_v37, %v9220_v47 }
 0x79f   : > { %v1831_v60 = vmul.f32 %v9097_v31, %v9238_v27  ;;  %v1873_v47 = vrot.slane %v1872_v34, 2 }
 0x7a0   : > { %5245 = vmatpush2.bf16.msra.mxu1 %v7591_v53  ;;  %v9210_v53 = vld [vmem:[#allocation2 + $0x78] sm:$0xff]  ;;  %v1878_v17 = vrot.slane %v1877_v23, 4  ;;  %v1899_v16 = vrot.slane %v1898_v62, 4  ;;  %v1926_v30 = vadd.f32 %v1830_v22, %v1828_v63  ;;  %v1840_v31 = vrot.slane %v1839_v12, 1 }
 0x7a1   : > { %6772 = vmatprep.subr.bf16.mxu1 %v7596_v50  ;;  %9727 = vst [vmem:[#allocation61_spill] sm:$0xff] %v9210_v53  ;;  %v1818_v40 = vmul.f32 %v9210_v53, %v9152_v6  ;;  %v1857_v50 = vrot.slane %v1856_v56, 4  ;;  %v1913_v53 = vrot.slane %v1912_v13, 4 }
 0x7a2   : > { %v1879_v61 = vadd.f32 %v1878_v17, %v1877_v23  ;;  %v1846_v23 = vadd.f32 %v1845_v42, %v1844_v41  ;;  %v1893_v17 = vadd.f32 %v1892_v33, %v1891_v14  ;;  %v1900_v15 = vadd.f32 %v1899_v16, %v1898_v62 }
 0x7a3   : > { %v1884_v58 = vadd.f32 %v1818_v40, %v1816_v24  ;;  %v1858_v54 = vadd.f32 %v1857_v50, %v1856_v56  ;;  %v1852_v56 = vrot.slane %v1851_v20, 2  ;;  %v9240_v24 = vpop.permute.xlu0 %1801  ;;  %v1905_v40 = vadd.f32 %v1825_v21, %v1823_v2  ;;  %v9732_v2 = vld [vmem:[#allocation51_spill] sm:$0xff] }
 0x7a4   : > { %9731 = vst [vmem:[#allocation65_spill] sm:$0xff] %v9240_v24  ;;  %v1833_v48 = vmul.f32 %v9118_v29, %v9240_v24  ;;  %v1832_v21 = vmul.f32 %v9732_v2, %v9238_v27  ;;  %v1834_v37 = vmul.f32 %v9733_v46, %v9240_v24  ;;  %v1880_v28 = vrot.slane %v1879_v61, 2 }
 0x7a5   : > { %v1885_v10 = vrot.slane %v1884_v58, 4  ;;  %v1859_v50 = vrot.slane %v1858_v54, 2  ;;  %v1853_v1 = vadd.f32 %v1852_v56, %v1851_v20  ;;  %v1906_v5 = vrot.slane %v1905_v40, 4 }
 0x7a6   : > { %v1933_v29 = vadd.f32 %v1833_v48, %v1831_v60  ;;  %v1940_v35 = vadd.f32 %v1834_v37, %v1832_v21  ;;  %v1874_v27 = vadd.f32 %v1873_v47, %v1872_v34  ;;  %v1927_v46 = vrot.slane %v1926_v30, 4 }
 0x7a7   : > { %v1886_v32 = vadd.f32 %v1885_v10, %v1884_v58  ;;  %v1860_v44 = vadd.f32 %v1859_v50, %v1858_v54  ;;  %v1867_v58 = vadd.f32 %v1866_v7, %v1865_v8  ;;  %v1854_v2 = vrot.slane %v1853_v1, 1 }
 0x7a8   : > { %v1907_v52 = vadd.f32 %v1906_v5, %v1905_v40  ;;  %v1847_v20 = vrot.slane %v1846_v23, 1  ;;  %v1894_v24 = vrot.slane %v1893_v17, 2  ;;  %v1914_v63 = vadd.f32 %v1913_v53, %v1912_v13 }
 0x7a9   : > { %v1887_v10 = vrot.slane %v1886_v32, 2  ;;  %v1861_v56 = vrot.slane %v1860_v44, 1  ;;  %v1841_v41 = vadd.f32 %v1840_v31, %v1839_v12  ;;  %v1881_v54 = vadd.f32 %v1880_v28, %v1879_v61 }
 0x7aa   : > { %v1901_v14 = vrot.slane %v1900_v15, 2  ;;  %v1934_v42 = vrot.slane %v1933_v29, 4  ;;  %v1868_v22 = vrot.slane %v1867_v58, 1  ;;  %v1921_v62 = vadd.f32 %v1920_v3, %v1919_v55 }
 0x7ab   : > { %v1888_v50 = vadd.f32 %v1887_v10, %v1886_v32  ;;  %v1941_v48 = vrot.slane %v1940_v35, 4  ;;  %v1855_v8 = vadd.f32 %v1854_v2, %v1853_v1  ;;  %v1875_v7 = vrot.slane %v1874_v27, 1 }
 0x7ac   : > { %v1908_v33 = vrot.slane %v1907_v52, 2  ;;  %v1928_v37 = vadd.f32 %v1927_v46, %v1926_v30  ;;  %v1848_v16 = vadd.f32 %v1847_v20, %v1846_v23  ;;  %v1862_v47 = vadd.f32 %v1861_v56, %v1860_v44 }
 0x7ad   : > { %v1895_v5 = vadd.f32 %v1894_v24, %v1893_v17  ;;  %v1915_v34 = vrot.slane %v1914_v63, 2  ;;  %v1882_v40 = vrot.slane %v1881_v54, 1  ;;  %v1902_v60 = vadd.f32 %v1901_v14, %v1900_v15 }
 0x7ae   : > { %v1935_v21 = vadd.f32 %v1934_v42, %v1933_v29  ;;  %v1869_v53 = vadd.f32 %v1868_v22, %v1867_v58  ;;  %v1889_v12 = vrot.slane %v1888_v50, 1  ;;  %v1922_v28 = vrot.slane %v1921_v62, 2 }
 0x7af   : > { %v1942_v13 = vadd.f32 %v1941_v48, %v1940_v35  ;;  %v1876_v61 = vadd.f32 %v1875_v7, %v1874_v27  ;;  %v1909_v31 = vadd.f32 %v1908_v33, %v1907_v52  ;;  %v1929_v32 = vrot.slane %v1928_v37, 2 }
 0x7b0   : > { %v4990_v55 = vsel %vm1963_vm0, %v1855_v8, %v1841_v41  ;;  %v1896_v1 = vrot.slane %v1895_v5, 1  ;;  %v1916_v10 = vadd.f32 %v1915_v34, %v1914_v63  ;;  %v4997_v46 = vsel %vm1963_vm0, %v1862_v47, %v1848_v16  ;;  %v4560_v41 = vld [vmem:[%s9734_s21] sm:$0x3]  ;;  %v9735_v8 = vld [vmem:[#allocation39_spill] sm:$0xff]  ;;  %s8029_s21 = scalar_lea.vmem %s6087_s28, 128 }
 0x7b1   : > { %v1883_v30 = vadd.f32 %v1882_v40, %v1881_v54  ;;  %v1903_v23 = vrot.slane %v1902_v60, 1  ;;  %v1936_v24 = vrot.slane %v1935_v21, 2  ;;  %v1890_v44 = vadd.f32 %v1889_v12, %v1888_v50  ;;  %v9738_v12 = vld [vmem:[#allocation43_spill] sm:$0xff]  ;;  %p8030_p13 = scmp.ne.s32.totalorder %s6087_s28, %s8029_s21  ;;  %p8037_p10 = scmp.lt.s32.totalorder %s8035_s12, %s8029_s21 }
 0x7b2   : > { %v1923_v17 = vadd.f32 %v1922_v28, %v1921_v62  ;;  %v4991_v29 = vsel %vm1965_vm1, %v1869_v53, %v4990_v55  ;;  %v1943_v15 = vrot.slane %v1942_v13, 2  ;;  %v1910_v58 = vrot.slane %v1909_v31, 1 }
 0x7b3   : > { %v1930_v3 = vadd.f32 %v1929_v32, %v1928_v37  ;;  %v4998_v27 = vsel %vm1965_vm1, %v1876_v61, %v4997_v46  ;;  %v1897_v52 = vadd.f32 %v1896_v1, %v1895_v5  ;;  %v1917_v35 = vrot.slane %v1916_v10, 1  ;;  %v9736_v5 = vld [vmem:[#allocation38_spill] sm:$0xff]  ;;  %v9739_v46 = vld [vmem:[#allocation48_spill] sm:$0xff]  ;;  %p8031_p9 = pnand %p8030_p13, %p9803_p0  ;;  %p8038_p6 = por %p8037_p10, %p8036_p11 }
 0x7b4   : > { %v1904_v2 = vadd.f32 %v1903_v23, %v1902_v60  ;;  %v1937_v20 = vadd.f32 %v1936_v24, %v1935_v21  ;;  %v4992_v56 = vsel %vm1967_vm2, %v1883_v30, %v4991_v29  ;;  %v1924_v63 = vrot.slane %v1923_v17, 1  ;;  %v9271_v60 = vld [vmem:[%s9708_s22] sm:$0x3f]  ;;  %v9741_v29 = vld [vmem:[#allocation47_spill] sm:$0xff] }
 0x7b5   : > { %v1944_v54 = vadd.f32 %v1943_v15, %v1942_v13  ;;  %v4999_v14 = vsel %vm1967_vm2, %v1890_v44, %v4998_v27  ;;  %v1911_v42 = vadd.f32 %v1910_v58, %v1909_v31  ;;  %v1931_v22 = vrot.slane %v1930_v3, 1  ;;  %v9737_v21 = vld [vmem:[#allocation41_spill] sm:$0xff]  ;;  %p8032_p2 = pneg %p8031_p9 }
 0x7b6   : > { %v4993_v50 = vsel %vm1969_vm3, %v1897_v52, %v4992_v56  ;;  %v1918_v62 = vadd.f32 %v1917_v35, %v1916_v10  ;;  %v1938_v48 = vrot.slane %v1937_v20, 1  ;;  %v4565_v7 = vrot.slane %v4560_v41, %v9735_v8  ;;  %v9740_v44 = vld [vmem:[#allocation45_spill] sm:$0xff] }
 0x7b7   : > { %v5000_v33 = vsel %vm1969_vm3, %v1904_v2, %v4999_v14  ;;  %v1925_v37 = vadd.f32 %v1924_v63, %v1923_v17  ;;  %v1945_v16 = vrot.slane %v1944_v54, 1  ;;  %v4994_v47 = vsel %vm1971_vm4, %v1911_v42, %v4993_v50  ;;  %v9742_v27 = vld [vmem:[#allocation49_spill] sm:$0xff]  ;;  %v7598_v50 = vld [vmem:[#allocation17 + $0xb8] sm:$0xff]   ;;  %p8039_p3 = pnand %p8038_p6, %p8032_p2 }
 0x7b8   : > { %v4569_v34 = vrot.slane %v4560_v41, %v9736_v5  ;;  %v1932_v40 = vadd.f32 %v1931_v22, %v1930_v3  ;;  %v865_v53 = vrot.slane %v9271_v60, %v9737_v21  ;;  %v873_v28 = vrot.slane %v9271_v60, %v9738_v12  ;;  %v7604_v21 = vld [vmem:[#allocation17 + $0xe8] sm:$0xff]  }
 0x7b9   : > { %v5001_v61 = vsel %vm1971_vm4, %v1918_v62, %v5000_v33  ;;  %v1939_v31 = vadd.f32 %v1938_v48, %v1937_v20  ;;  %v4995_v55 = vsel %vm1973_vm5, %v1925_v37, %v4994_v47  ;;  %v1946_v10 = vadd.f32 %v1945_v16, %v1944_v54  ;;  %v7599_v62 = vld [vmem:[#allocation17 + $0x138] sm:$0xff]   ;;  %v7600_v33 = vld [vmem:[#allocation17 + $0xf0] sm:$0xff]   ;;  %v7606_v12 = vld [vmem:[#allocation17 + $0xa8] sm:$0xff]  }
 0x7ba   : > { %v5002_v24 = vsel %vm1973_vm5, %v1932_v40, %v5001_v61  ;;  %v1438_v17 = vadd.f32 %v9740_v44, %v865_v53  ;;  %v1479_v15 = vadd.f32 %v9741_v29, %v873_v28  ;;  %v7601_v37 = vld [vmem:[#allocation17 + $0x170] sm:$0xff]   ;;  %v7605_v53 = vld [vmem:[#allocation17 + $0x168] sm:$0xff]   ;;  %v7609_v61 = vld [vmem:[#allocation17 + $0x160] sm:$0xff]  }
 0x7bb   : > { %v9284_v3 = vsel %vm1975_vm6, %v1939_v31, %v4995_v55  ;;  %v9289_v56 = vsel %vm1975_vm6, %v1946_v10, %v5002_v24  ;;  %v7603_v40 = vld [vmem:[#allocation17 + $0x130] sm:$0xff]   ;;  %v7607_v28 = vld [vmem:[#allocation17 + $0x128] sm:$0xff]   ;;  %v7610_v31 = vld [vmem:[#allocation17 + $0xa0] sm:$0xff]  }
 0x7bc   : > { %v5538_v54 = vmax.f32 %v1438_v17, 0.0  ;;  %v5540_v14 = vmax.f32 %v1479_v15, 0.0  ;;  %v7612_v55 = vld [vmem:[#allocation17 + $0xd8] sm:$0xff]   ;;  %v7618_v24 = vld [vmem:[#allocation17 + $0x90] sm:$0xff]   ;;  %v9743_v17 = vld [vmem:[#allocation40_spill] sm:$0xff] }
 0x7bd   : > { %v7614_v10 = vld [vmem:[#allocation17 + $0x98] sm:$0xff]   ;;  %v7619_v44 = vld [vmem:[#allocation17 + $0x110] sm:$0xff]   ;;  %v861_v29 = vrot.slane %v9271_v60, %v9743_v17 }
 0x7be   : > { %v5544_v16 = vpack.c.bf16 %v5538_v54, %v5538_v54  ;;  %v5546_v47 = vpack.c.bf16 %v5540_v14, %v5540_v14  ;;  %v9744_v15 = vld [vmem:[#allocation42_spill] sm:$0xff]  ;;  %v7624_v14 = vld [vmem:[#allocation17 + $0xc0] sm:$0xff]  }
 0x7bf   : > { %v7774_v17 = vld [vmem:[#allocation2] sm:$0xff] }
 0x823   : > { %v4926_v13 = vpop.f32.mrf.mxu1 }
 0x824   : > { %v4927_v32 = vadd.f32 %v4926_v13, %v4565_v7  ;;  %v7608_v13 = vld [vmem:[#allocation17 + $0xe0] sm:$0xff]  }
 0x825   : > { %v4928_v1 = vpop.f32.mrf.mxu1 }
 0x826   : > { %v4968_v30 = vadd.f32 %v9739_v46, %v4927_v32  ;;  %v4929_v23 = vadd.f32 %v4928_v1, %v4569_v34  ;;  %v7602_v34 = vld [vmem:[#allocation17 + $0xb0] sm:$0xff]   ;;  %v7611_v32 = vld [vmem:[#allocation17 + $0x120] sm:$0xff]   ;;  %v7613_v1 = vld [vmem:[#allocation17 + $0x158] sm:$0xff]  }
 0x827   : > { %v4930_v58 = vpop.f32.mrf.mxu1  ;;  %v7615_v46 = vld [vmem:[#allocation17 + $0x118] sm:$0xff]  }
 0x828   : > { %v4970_v52 = vadd.f32 %v9742_v27, %v4929_v23  ;;  %v5006_v35 = vadd.f32 %v9284_v3, %v4968_v30  ;;  %v5535_v2 = vmax.f32 %v4968_v30, 0.0  ;;  %v7616_v30 = vld [vmem:[#allocation17 + $0xd0] sm:$0xff]   ;;  %v869_v58 = vrot.slane %v9271_v60, %v9744_v15  ;;  %v7620_v27 = vld [vmem:[#allocation17 + $0xc8] sm:$0xff]   ;;  %v7627_v60 = vld [vmem:[#allocation17 + $0x100] sm:$0xff]  }
 0x829   : > { %v4931_v20 = vpop.f32.mrf.mxu1  ;;  %v7617_v23 = vld [vmem:[#allocation17 + $0x150] sm:$0xff]   ;;  %v7775_v15 = vld [vmem:[#allocation2 + $0xd8] sm:$0xff] }
 0x82a   : > { %v5007_v63 = vadd.f32 %v9289_v56, %v4970_v52  ;;  %v5536_v41 = vmax.f32 %v4970_v52, 0.0  ;;  %v5008_v48 = vpack.c.bf16 %v5006_v35, %v5006_v35  ;;  %v5541_v7 = vpack.c.bf16 %v5535_v2, %v5535_v2  ;;  %v7621_v52 = vld [vmem:[#allocation17 + $0x148] sm:$0xff]   ;;  %v9745_v20 = vld [vmem:[#allocation44_spill] sm:$0xff] }
 0x82b   : > { %v7622_v35 = vld [vmem:[#allocation17 + $0x88] sm:$0xff]  }
 0x82c   : > { %v5009_v42 = vpack.c.bf16 %v5007_v63, %v5007_v63  ;;  %v5542_v22 = vpack.c.bf16 %v5536_v41, %v5536_v41  ;;  %v7623_v2 = vld [vmem:[#allocation17 + $0x108] sm:$0xff]   ;;  %v1436_v63 = vadd.f32 %v9745_v20, %v861_v29  ;;  %v9746_v41 = vld [vmem:[#allocation46_spill] sm:$0xff] }
 0x82d   : > { %v1477_v54 = vadd.f32 %v9746_v41, %v869_v58 }
 0x82e   : > { %5246 = vmatprep.mubr.bf16.mxu1 %v5009_v42  ;;  %5970 = vmatprep.mubr.bf16.mxu0 %v5542_v22  ;;  %v7625_v42 = vld [vmem:[#allocation17 + $0x140] sm:$0xff]  }
 0x82f   : > { %5247 = vmatmul.mubr.bf16.vlgmr.msra.gmra.mxu1 %v5008_v48  ;;  %5971 = vmatmul.mubr.bf16.vlgmr.msra.gmra.mxu0 %v5541_v7  ;;  %v7626_v22 = vld [vmem:[#allocation17 + $0x80] sm:$0xff]  }
 0x830   : > { %6773 = vmatpush3.bf16.msra.mxu1 %v7598_v50  ;;  %6795 = vmatpush3.bf16.msra.mxu0 %v7599_v62  ;;  %v5537_v50 = vmax.f32 %v1436_v63, 0.0  ;;  %v5539_v62 = vmax.f32 %v1477_v54, 0.0 }
 0x831   : > { %6010 = vmatprep.mubr.bf16.mxu1 %v5544_v16  ;;  %6050 = vmatprep.mubr.bf16.mxu0 %v5546_v47 }
 0x832   : > { %6774 = vmatprep.subr.bf16.mxu1 %v7600_v33  ;;  %6796 = vmatprep.subr.bf16.mxu0 %v7601_v37  ;;  %v5543_v48 = vpack.c.bf16 %v5537_v50, %v5537_v50  ;;  %v5545_v7 = vpack.c.bf16 %v5539_v62, %v5539_v62  ;;  %v5042_v33 = vld [vmem:[#allocation12] sm:$0x3]  ;;  %v5267_v50 = vsub.f32 1.0, %v9162_v43 }
 0x833   : > { %v5047_v37 = vrot.slane %v5042_v33, %v9735_v8  ;;  %v5051_v16 = vrot.slane %v5042_v33, %v9736_v5 }
 0x834   : > { %6775 = vmatpush3.bf16.msra.mxu1 %v7602_v34  ;;  %6797 = vmatpush3.bf16.msra.mxu0 %v7603_v40 }
 0x835   : > { %6776 = vmatprep.subr.bf16.mxu1 %v7604_v21  ;;  %6798 = vmatprep.subr.bf16.mxu0 %v7605_v53 }
 0x838   : > { %6777 = vmatpush3.bf16.msra.mxu1 %v7606_v12  ;;  %6799 = vmatpush3.bf16.msra.mxu0 %v7607_v28 }
 0x839   : > { %6778 = vmatprep.subr.bf16.mxu1 %v7608_v13  ;;  %6800 = vmatprep.subr.bf16.mxu0 %v7609_v61 }
 0x83c   : > { %6779 = vmatpush3.bf16.msra.mxu1 %v7610_v31  ;;  %6801 = vmatpush3.bf16.msra.mxu0 %v7611_v32  ;;  %v5259_v32 = vsub.f32 1.0, %v9138_v19 }
 0x83d   : > { %6780 = vmatprep.subr.bf16.mxu1 %v7612_v55  ;;  %6802 = vmatprep.subr.bf16.mxu0 %v7613_v1  ;;  %v5260_v55 = vsub.f32 1.0, %v9140_v59  ;;  %v5261_v1 = vsub.f32 1.0, %v9142_v49 }
 0x83e   : > { %v9313_v29 = vmul.f32 %v7774_v17, %v5259_v32 }
 0x83f   : > { %v9315_v58 = vmul.f32 %v7775_v15, %v5260_v55  ;;  %v9324_v20 = vmul.f32 %v9174_v0, %v5261_v1  ;;  %v7783_v15 = vld [vmem:[#allocation2 + $0xe0] sm:$0xff] }
 0x840   : > { %6781 = vmatpush3.bf16.msra.mxu1 %v7614_v10  ;;  %6803 = vmatpush3.bf16.msra.mxu0 %v7615_v46  ;;  %v5262_v10 = vsub.f32 1.0, %v9144_v45  ;;  %v5263_v46 = vsub.f32 1.0, %v9146_v18 }
 0x841   : > { %6782 = vmatprep.subr.bf16.mxu1 %v7616_v30  ;;  %6804 = vmatprep.subr.bf16.mxu0 %v7617_v23  ;;  %v5264_v30 = vsub.f32 1.0, %v9148_v57  ;;  %v5265_v23 = vsub.f32 1.0, %v9150_v25 }
 0x842   : > { %v9327_v63 = vmul.f32 %v9170_v4, %v5262_v10  ;;  %v9330_v54 = vmul.f32 %v9178_v26, %v5262_v10  ;;  %v5268_v26 = vsub.f32 1.0, %v9164_v9 }
 0x843   : > { %v9341_v0 = vmul.f32 %v9194_v39, %v5264_v30  ;;  %v9344_v4 = vmul.f32 %v9198_v11, %v5265_v23  ;;  %v9751_v39 = vld [vmem:[#allocation62_spill] sm:$0xff] }
 0x844   : > { %6783 = vmatpush3.bf16.msra.mxu1 %v7618_v24  ;;  %6805 = vmatpush3.bf16.msra.mxu0 %v7619_v44  ;;  %v7773_v24 = vld [vmem:[#allocation2 + $0xb0] sm:$0xff] }
 0x845   : > { %6784 = vmatprep.subr.bf16.mxu1 %v7620_v27  ;;  %6806 = vmatprep.subr.bf16.mxu0 %v7621_v52  ;;  %v9311_v44 = vmul.f32 %v7773_v24, %v5259_v32  ;;  %v5266_v27 = vsub.f32 1.0, %v9152_v6  ;;  %v7776_v52 = vld [vmem:[#allocation2 + $0x18] sm:$0xff]  ;;  %v9752_v32 = vld [vmem:[#allocation63_spill] sm:$0xff] }
 0x848   : > { %6785 = vmatpush3.bf16.msra.mxu1 %v7622_v35  ;;  %6807 = vmatpush3.bf16.msra.mxu0 %v7623_v2  ;;  %v9318_v35 = vmul.f32 %v7776_v52, %v5260_v55  ;;  %v9321_v2 = vmul.f32 %v9166_v36, %v5261_v1  ;;  %v9338_v36 = vmul.f32 %v9184_v51, %v5264_v30  ;;  %v5272_v55 = vsub.f32 1.0, %v9752_v32  ;;  %v9753_v1 = vld [vmem:[#allocation64_spill] sm:$0xff] }
 0x849   : > { %6786 = vmatprep.subr.bf16.mxu1 %v7624_v14  ;;  %6808 = vmatprep.subr.bf16.mxu0 %v7625_v42  ;;  %v7777_v14 = vld [vmem:[#allocation2 + $0x80] sm:$0xff]  ;;  %v5273_v10 = vsub.f32 1.0, %v9753_v1 }
 0x84a   : > { %v9332_v42 = vmul.f32 %v7777_v14, %v5263_v46 }
 0x84c   : > { %6787 = vmatpush3.bf16.msra.mxu1 %v7626_v22  ;;  %6809 = vmatpush3.bf16.msra.mxu0 %v7627_v60  ;;  %v7778_v22 = vld [vmem:[#allocation2 + $0x88] sm:$0xff] }
 0x84d   : > { %v9334_v60 = vmul.f32 %v7778_v22, %v5263_v46  ;;  %v7781_v46 = vld [vmem:[#allocation2 + $0x40] sm:$0xff] }
 0x84e   : > { %v9367_v30 = vmul.f32 %v7781_v46, %v5268_v26  ;;  %v9758_v22 = vld [vmem:[#allocation65_spill] sm:$0xff] }
 0x84f   : > { %6011 = vmatmul.mubr.bf16.vlgmr.msra.gmra.mxu1 %v5543_v48  ;;  %6051 = vmatmul.mubr.bf16.vlgmr.msra.gmra.mxu0 %v5545_v7  ;;  %v9348_v48 = vmul.f32 %v9206_v38, %v5265_v23  ;;  %v9747_v7 = vld [vmem:[#allocation60_spill] sm:$0xff]  ;;  %v7782_v23 = vld [vmem:[#allocation2 + $0xc8] sm:$0xff] }
 0x850   : > { %v9351_v33 = vmul.f32 %v9747_v7, %v5266_v27  ;;  %v7780_v38 = vld [vmem:[#allocation2 + $0x58] sm:$0xff]  ;;  %v9369_v24 = vmul.f32 %v7782_v23, %v5268_v26  ;;  %v9762_v26 = vld [vmem:[#allocation50_spill] sm:$0xff] }
 0x852   : > { %9754 = vst [vmem:[#allocation51_spill] sm:$0xff] %v9369_v24 }
 0x8ef   : > { %v5248_v47 = vpop.f32.mrf.mxu1  ;;  %v9300_v34 = vpop.f32.mrf.mxu0 }
 0x8f0   : > { %v5249_v40 = vadd.f32 %v5248_v47, %v5047_v37  ;;  %v9748_v37 = vld [vmem:[#allocation58_spill] sm:$0xff]  ;;  %v9749_v47 = vld [vmem:[#allocation59_spill] sm:$0xff] }
 0x8f1   : > { %v5250_v21 = vpop.f32.mrf.mxu1  ;;  %v9302_v53 = vpop.f32.mrf.mxu0  ;;  %v5270_v51 = vsub.f32 1.0, %v9749_v47 }
 0x8f2   : > { %7700 = vtanh.f32 %v5249_v40  ;;  %v5251_v12 = vadd.f32 %v5250_v21, %v5051_v16  ;;  %v5269_v16 = vsub.f32 1.0, %v9748_v37  ;;  %v9750_v40 = vld [vmem:[#allocation61_spill] sm:$0xff] }
 0x8f3   : > { %v5252_v28 = vpop.f32.mrf.mxu1  ;;  %v6769_v13 = vpop.f32.mrf.mxu0  ;;  %v9356_v21 = vmul.f32 %v9750_v40, %v5266_v27  ;;  %v7784_v27 = vld [vmem:[#allocation2 + $0x90] sm:$0xff] }
 0x8f4   : > { %7702 = vtanh.f32 %v5251_v12  ;;  %v5271_v12 = vsub.f32 1.0, %v9751_v39  ;;  %v7779_v13 = vld [vmem:[#allocation2 + $0x38] sm:$0xff]  ;;  %v9373_v52 = vmul.f32 %v7784_v27, %v5269_v16 }
 0x8f5   : > { %v5253_v61 = vpop.f32.mrf.mxu1  ;;  %v6770_v31 = vpop.f32.mrf.mxu0  ;;  %v9760_v40 = vld [vmem:[#allocation52_spill] sm:$0xff] }
 0x8f6   : > { %v9361_v61 = vmul.f32 %v7779_v13, %v5267_v50  ;;  %v9363_v31 = vmul.f32 %v7780_v38, %v5267_v50  ;;  %9756 = vst [vmem:[#allocation38_spill] sm:$0xff] %v9373_v52  ;;  %v5274_v50 = vsub.f32 1.0, %v9758_v22  ;;  %v9381_v13 = vmul.f32 %v9760_v40, %v5271_v12 }
 0x8f8   : > { %9761 = vst [vmem:[#allocation48_spill] sm:$0xff] %v9381_v13  ;;  %v7788_v13 = vld [vmem:[#allocation2 + $0xf8] sm:$0xff] }
 0x8ff   : > { %v7701_v41 = vpop.eup %7700 }
 0x900   : > { %v5257_v11 = vmul.f32 %v7701_v41, %v9284_v3  ;;  %v7785_v41 = vld [vmem:[#allocation2 + $0x70] sm:$0xff] }
 0x901   : > { %v7703_v62 = vpop.eup %7702  ;;  %v9375_v14 = vmul.f32 %v7785_v41, %v5270_v51  ;;  %v7787_v41 = vld [vmem:[#allocation2 + $0xa0] sm:$0xff] }
 0x902   : > { %v5258_v28 = vmul.f32 %v7703_v62, %v9289_v56  ;;  %v9371_v56 = vmul.f32 %v7783_v15, %v5269_v16  ;;  %v7786_v62 = vld [vmem:[#allocation2 + $0xc0] sm:$0xff]  ;;  %v9767_v15 = vld [vmem:[#allocation55_spill] sm:$0xff] }
 0x903   : > { %9757 = vst [vmem:[#allocation41_spill] sm:$0xff] %v9375_v14  ;;  %v9378_v7 = vmul.f32 %v7786_v62, %v5270_v51  ;;  %v9765_v16 = vld [vmem:[#allocation53_spill] sm:$0xff]  ;;  %v9392_v27 = vmul.f32 %v9767_v15, %v5272_v55  ;;  %v9394_v14 = vmul.f32 %v7787_v41, %v5273_v10 }
 0x904   : > { %v5309_v17 = vcombine.low %v5257_v11, %v5258_v28  ;;  %v5310_v3 = vcombine.high %v5257_v11, %v5258_v28  ;;  %9755 = vst [vmem:[#allocation39_spill] sm:$0xff] %v9371_v56  ;;  %v9763_v28 = vld [vmem:[#allocation54_spill] sm:$0xff]  ;;  %v9389_v23 = vmul.f32 %v9765_v16, %v5272_v55  ;;  %v9773_v16 = vld [vmem:[#allocation57_spill] sm:$0xff]  ;;  %v9408_v55 = vadd.f32 %v9302_v53, %v9300_v34 }
 0x905   : > { %9759 = vst [vmem:[#allocation43_spill] sm:$0xff] %v9378_v7  ;;  %v9386_v46 = vmul.f32 %v9763_v28, %v5271_v12  ;;  %9768 = vst [vmem:[#allocation49_spill] sm:$0xff] %v9392_v27  ;;  %v9771_v12 = vld [vmem:[#allocation56_spill] sm:$0xff] }
 0x906   : > { %v5317_v38 = vrot.slane %v5309_v17, %v9762_v26  ;;  %v5324_v11 = vrot.slane %v5310_v3, %v9762_v26  ;;  %9766 = vst [vmem:[#allocation47_spill] sm:$0xff] %v9389_v23  ;;  %9769 = vst [vmem:[#allocation40_spill] sm:$0xff] %v9394_v14  ;;  %v9398_v3 = vmul.f32 %v7788_v13, %v5273_v10 }
 0x907   : > { %9764 = vst [vmem:[#allocation45_spill] sm:$0xff] %v9386_v46  ;;  %v9401_v28 = vmul.f32 %v9771_v12, %v5274_v50  ;;  %v9404_v23 = vmul.f32 %v9773_v16, %v5274_v50  ;;  %9775 = vst [vmem:[#allocation60_spill] sm:$0xff] %v9408_v55 }
 0x908   : > { %v5325_v51 = vcombine.high %v5317_v38, %v5317_v38  ;;  %v5326_v62 = vcombine.high %v5324_v11, %v5324_v11  ;;  %v5333_v40 = vrot.slane %v5317_v38, %v9762_v26  ;;  %v5340_v17 = vrot.slane %v5324_v11, %v9762_v26  ;;  %9770 = vst [vmem:[#allocation42_spill] sm:$0xff] %v9398_v3 }
 0x909   : > { %9772 = vst [vmem:[#allocation44_spill] sm:$0xff] %v9401_v28  ;;  %9774 = vst [vmem:[#allocation46_spill] sm:$0xff] %v9404_v23 }
 0x90a   : > { %v5347_v15 = vrot.slane %v5325_v51, %v9762_v26  ;;  %v5354_v41 = vrot.slane %v5326_v62, %v9762_v26  ;;  %v5355_v38 = vcombine.high %v5333_v40, %v5333_v40  ;;  %v5356_v14 = vcombine.high %v5340_v17, %v5340_v17 }
 0x90b   : > { %v5362_v11 = vrot.slane %v5333_v40, %v9735_v8  ;;  %v5366_v10 = vrot.slane %v5333_v40, %v9736_v5  ;;  %v5394_v13 = vrot.slane %v5340_v17, %v9735_v8  ;;  %v5398_v12 = vrot.slane %v5340_v17, %v9736_v5 }
 0x90c   : > { %v5357_v50 = vcombine.high %v5347_v15, %v5347_v15  ;;  %v5358_v16 = vcombine.high %v5354_v41, %v5354_v41  ;;  %v5370_v23 = vrot.slane %v5347_v15, %v9735_v8  ;;  %v5374_v34 = vrot.slane %v5347_v15, %v9736_v5 }
 0x90d   : > { %v5378_v53 = vrot.slane %v5355_v38, %v9735_v8  ;;  %v5382_v26 = vrot.slane %v5355_v38, %v9736_v5  ;;  %v5402_v51 = vrot.slane %v5354_v41, %v9735_v8  ;;  %v5406_v62 = vrot.slane %v5354_v41, %v9736_v5 }
 0x90e   : > { %v5386_v40 = vrot.slane %v5357_v50, %v9735_v8  ;;  %v5390_v55 = vrot.slane %v5357_v50, %v9736_v5  ;;  %v5410_v17 = vrot.slane %v5356_v14, %v9735_v8  ;;  %v5414_v28 = vrot.slane %v5356_v14, %v9736_v5 }
 0x90f   : > { %v5418_v3 = vrot.slane %v5358_v16, %v9735_v8  ;;  %v5422_v15 = vrot.slane %v5358_v16, %v9736_v5  ;;  %v5439_v27 = vmul.f32 %v5362_v11, %v9138_v19  ;;  %v5440_v38 = vmul.f32 %v5366_v10, %v9138_v19  ;;  %v9430_v46 = vpop.f32.mrf.mxu1  ;;  %v9432_v7 = vpop.f32.mrf.mxu0 }
 0x910   : > { %9776 = vst [vmem:[#allocation58_spill] sm:$0xff] %v9430_v46  ;;  %9777 = vst [vmem:[#allocation59_spill] sm:$0xff] %v9432_v7  ;;  %v5441_v41 = vmul.f32 %v5362_v11, %v9140_v59  ;;  %v5442_v50 = vmul.f32 %v5366_v10, %v9140_v59  ;;  %v5443_v52 = vmul.f32 %v5370_v23, %v9142_v49 }
 0x911   : > { %v5444_v14 = vmul.f32 %v5374_v34, %v9142_v49  ;;  %v5445_v8 = vmul.f32 %v5370_v23, %v9144_v45  ;;  %v5446_v5 = vmul.f32 %v5374_v34, %v9144_v45  ;;  %v5447_v16 = vmul.f32 %v5378_v53, %v9146_v18  ;;  %v9442_v56 = vpop.f32.mrf.mxu1  ;;  %v9444_v46 = vpop.f32.mrf.mxu0 }
 0x912   : > { %v5448_v19 = vmul.f32 %v5382_v26, %v9146_v18  ;;  %9778 = vst [vmem:[#allocation61_spill] sm:$0xff] %v9442_v56  ;;  %9779 = vst [vmem:[#allocation62_spill] sm:$0xff] %v9444_v46  ;;  %v5449_v11 = vmul.f32 %v5378_v53, %v9148_v57  ;;  %v5450_v59 = vmul.f32 %v5382_v26, %v9148_v57 }
 0x913   : > { %v5451_v10 = vmul.f32 %v5386_v40, %v9150_v25  ;;  %v5452_v49 = vmul.f32 %v5390_v55, %v9150_v25  ;;  %v5453_v23 = vmul.f32 %v5386_v40, %v9152_v6  ;;  %v5454_v45 = vmul.f32 %v5390_v55, %v9152_v6  ;;  %v6791_v7 = vpop.f32.mrf.mxu1  ;;  %v6813_v56 = vpop.f32.mrf.mxu0 }
 0x914   : > { %v5455_v34 = vmul.f32 %v5394_v13, %v9162_v43  ;;  %v5456_v18 = vmul.f32 %v5398_v12, %v9162_v43  ;;  %v5457_v46 = vmul.f32 %v5394_v13, %v9164_v9  ;;  %v5458_v53 = vmul.f32 %v5398_v12, %v9164_v9 }
 0x915   : > { %v5459_v57 = vmul.f32 %v5402_v51, %v9748_v37  ;;  %v5460_v26 = vmul.f32 %v5406_v62, %v9748_v37  ;;  %v5461_v25 = vmul.f32 %v5402_v51, %v9749_v47  ;;  %v5462_v40 = vmul.f32 %v5406_v62, %v9749_v47  ;;  %v6792_v24 = vpop.f32.mrf.mxu1  ;;  %v6814_v43 = vpop.f32.mrf.mxu0 }
 0x916   : > { %v5463_v6 = vmul.f32 %v5410_v17, %v9751_v39  ;;  %v5464_v55 = vmul.f32 %v5414_v28, %v9751_v39  ;;  %v5465_v56 = vmul.f32 %v5410_v17, %v9752_v32  ;;  %v5466_v7 = vmul.f32 %v5414_v28, %v9752_v32  ;;  %v9786_v17 = vld [vmem:[#allocation48_spill] sm:$0xff] }
 0x917   : > { %v5467_v9 = vmul.f32 %v5418_v3, %v9753_v1  ;;  %v5468_v13 = vmul.f32 %v5422_v15, %v9753_v1  ;;  %v5469_v37 = vmul.f32 %v5418_v3, %v9758_v22  ;;  %v5470_v12 = vmul.f32 %v5422_v15, %v9758_v22 }
 0x918   : > { %v5471_v47 = vadd.f32 %v5439_v27, %v9311_v44  ;;  %v5472_v51 = vadd.f32 %v5440_v38, %v9313_v29  ;;  %v5473_v39 = vadd.f32 %v5441_v41, %v9315_v58  ;;  %v5474_v24 = vadd.f32 %v5442_v50, %v9318_v35  ;;  %v9788_v38 = vld [vmem:[#allocation47_spill] sm:$0xff]  ;;  %v9789_v50 = vld [vmem:[#allocation49_spill] sm:$0xff] }
 0x919   : > { %v5475_v62 = vadd.f32 %v5443_v52, %v9321_v2  ;;  %v5476_v32 = vadd.f32 %v5444_v14, %v9324_v20  ;;  %v5477_v28 = vadd.f32 %v5445_v8, %v9327_v63  ;;  %v5478_v1 = vadd.f32 %v5446_v5, %v9330_v54  ;;  %v9790_v8 = vld [vmem:[#allocation40_spill] sm:$0xff] }
 0x91a   : > { %v5479_v3 = vadd.f32 %v5447_v16, %v9332_v42  ;;  %v5480_v22 = vadd.f32 %v5448_v19, %v9334_v60  ;;  %5503 = vst [vmem:[#allocation2 + $0xb0] sm:$0xff] %v5471_v47  ;;  %5504 = vst [vmem:[#allocation2] sm:$0xff] %v5472_v51  ;;  %v5481_v44 = vadd.f32 %v5449_v11, %v9338_v36  ;;  %v9780_v60 = vld [vmem:[#allocation51_spill] sm:$0xff]  ;;  %v9791_v16 = vld [vmem:[#allocation42_spill] sm:$0xff] }
 0x91b   : > { %v5482_v29 = vadd.f32 %v5450_v59, %v9341_v0  ;;  %v5483_v58 = vadd.f32 %v5451_v10, %v9344_v4  ;;  %v5484_v35 = vadd.f32 %v5452_v49, %v9348_v48  ;;  %5505 = vst [vmem:[#allocation2 + $0xd8] sm:$0xff] %v5473_v39  ;;  %5506 = vst [vmem:[#allocation2 + $0x18] sm:$0xff] %v5474_v24  ;;  %v9781_v0 = vld [vmem:[#allocation39_spill] sm:$0xff]  ;;  %v9782_v48 = vld [vmem:[#allocation38_spill] sm:$0xff] }
 0x91c   : > { %5507 = vst [vmem:[#allocation2 + $0x50] sm:$0xff] %v5475_v62  ;;  %5508 = vst [vmem:[#allocation2 + $0x68] sm:$0xff] %v5476_v32  ;;  %v5485_v2 = vadd.f32 %v5453_v23, %v9351_v33  ;;  %v5486_v20 = vadd.f32 %v5454_v45, %v9356_v21  ;;  %v5487_v63 = vadd.f32 %v5455_v34, %v9361_v61  ;;  %v6694_v33 = vld [vmem:[%s9783_s5] ss:$0 sm:$0xff]  ;;  %v9792_v11 = vld [vmem:[#allocation44_spill] sm:$0xff] }
 0x91d   : > { %v5488_v54 = vadd.f32 %v5456_v18, %v9363_v31  ;;  %5509 = vst [vmem:[#allocation2 + $0x30] sm:$0xff] %v5477_v28  ;;  %5510 = vst [vmem:[#allocation2 + $0x48] sm:$0xff] %v5478_v1  ;;  %v5489_v42 = vadd.f32 %v5457_v46, %v9367_v30  ;;  %v5490_v36 = vadd.f32 %v5458_v53, %v9780_v60  ;;  %v9784_v21 = vld [vmem:[#allocation41_spill] sm:$0xff]  ;;  %v9785_v31 = vld [vmem:[#allocation43_spill] sm:$0xff] }
 0x91e   : > { %5511 = vst [vmem:[#allocation2 + $0x80] sm:$0xff] %v5479_v3  ;;  %5512 = vst [vmem:[#allocation2 + $0x88] sm:$0xff] %v5480_v22  ;;  %v5491_v4 = vadd.f32 %v5459_v57, %v9781_v0  ;;  %v5492_v52 = vadd.f32 %v5460_v26, %v9782_v48  ;;  %v5493_v61 = vadd.f32 %v5461_v25, %v9784_v21  ;;  %v9787_v46 = vld [vmem:[#allocation45_spill] sm:$0xff]  ;;  %v9793_v10 = vld [vmem:[#allocation46_spill] sm:$0xff] }
 0x91f   : > { %5513 = vst [vmem:[#allocation2 + $0xe8] sm:$0xff] %v5481_v44  ;;  %5514 = vst [vmem:[#allocation2 + $0xb8] sm:$0xff] %v5482_v29  ;;  %v5494_v27 = vadd.f32 %v5462_v40, %v9785_v31  ;;  %v5495_v30 = vadd.f32 %v5463_v6, %v9786_v17  ;;  %v5496_v15 = vadd.f32 %v5464_v55, %v9787_v46  ;;  %v9794_v23 = vld [vmem:[#allocation60_spill] sm:$0xff]  ;;  %v9795_v34 = vld [vmem:[#allocation58_spill] sm:$0xff] }
 0x920   : > { %5515 = vst [vmem:[#allocation2 + $0x60] sm:$0xff] %v5483_v58  ;;  %5516 = vst [vmem:[#allocation2 + $0xf0] sm:$0xff] %v5484_v35  ;;  %v5497_v41 = vadd.f32 %v5465_v56, %v9788_v38  ;;  %v5498_v14 = vadd.f32 %v5466_v7, %v9789_v50  ;;  %v5499_v5 = vadd.f32 %v5467_v9, %v9790_v8  ;;  %v9796_v18 = vld [vmem:[#allocation61_spill] sm:$0xff]  ;;  %v9799_v26 = vld [vmem:[#allocation59_spill] sm:$0xff] }
 0x921   : > { %5517 = vst [vmem:[#allocation2 + $0x8] sm:$0xff] %v5485_v2  ;;  %5518 = vst [vmem:[#allocation2 + $0x78] sm:$0xff] %v5486_v20  ;;  %v5500_v19 = vadd.f32 %v5468_v13, %v9791_v16  ;;  %v5501_v59 = vadd.f32 %v5469_v37, %v9792_v11  ;;  %v5502_v49 = vadd.f32 %v5470_v12, %v9793_v10  ;;  %v9800_v25 = vld [vmem:[#allocation62_spill] sm:$0xff] }
 0x922   : > { %5519 = vst [vmem:[#allocation2 + $0x38] sm:$0xff] %v5487_v63  ;;  %5520 = vst [vmem:[#allocation2 + $0x58] sm:$0xff] %v5488_v54  ;;  %v5973_v45 = vadd.f32 %v9794_v23, %v6694_v33  ;;  %v6790_v53 = vadd.f32 %v9796_v18, %v9795_v34  ;;  %v6812_v40 = vadd.f32 %v9800_v25, %v9799_v26 }
 0x923   : > { %5521 = vst [vmem:[#allocation2 + $0x40] sm:$0xff] %v5489_v42  ;;  %5522 = vst [vmem:[#allocation2 + $0xc8] sm:$0xff] %v5490_v36 }
 0x924   : > { %5523 = vst [vmem:[#allocation2 + $0xe0] sm:$0xff] %v5491_v4  ;;  %5524 = vst [vmem:[#allocation2 + $0x90] sm:$0xff] %v5492_v52  ;;  %v6013_v57 = vadd.f32 %v6790_v53, %v5973_v45 }
 0x925   : > { %5525 = vst [vmem:[#allocation2 + $0x70] sm:$0xff] %v5493_v61  ;;  %5526 = vst [vmem:[#allocation2 + $0xc0] sm:$0xff] %v5494_v27 }
 0x926   : > { %5527 = vst [vmem:[#allocation2 + $0xa8] sm:$0xff] %v5495_v30  ;;  %5528 = vst [vmem:[#allocation2 + $0xd0] sm:$0xff] %v5496_v15  ;;  %v6053_v6 = vadd.f32 %v6812_v40, %v6013_v57 }
 0x927   : > { %5529 = vst [vmem:[#allocation2 + $0x10] sm:$0xff] %v5497_v41  ;;  %5530 = vst [vmem:[#allocation2 + $0x28] sm:$0xff] %v5498_v14 }
 0x928   : > { %5531 = vst [vmem:[#allocation2 + $0xa0] sm:$0xff] %v5499_v5  ;;  %5532 = vst [vmem:[#allocation2 + $0xf8] sm:$0xff] %v5500_v19  ;;  %6058 = vmax.xlane.f32.xlu1 %v6053_v6 }
 0x929   : > { %5533 = vst [vmem:[#allocation2 + $0x20] sm:$0xff] %v5501_v59  ;;  %5534 = vst [vmem:[#allocation2 + $0x98] sm:$0xff] %v5502_v49 }
 0x9b1   : > { %v6059_v55 = vpop.xlane.xlu1 %6058 }
 0x9b2   : > { %v6060_v43 = vsub.f32 %v6053_v6, %v6059_v55 }
 0x9b4   : > { %v6061_v56 = vmul.f32 1.442695, %v6060_v43 }
 0x9b6   : > { %7704 = vpow2.f32 %v6061_v56 }
 0x9c3   : > { %v7705_v7 = vpop.eup %7704 }
 0x9c4   : > { %6063 = vadd.xlane.f32.xlu0 %v7705_v7 }
 0xa4d   : > { %v6064_v9 = vpop.xlane.xlu0 %6063 }
 0xa4e   : > { %7706 = vlog2.f32 %v6064_v9 }
 0xa5b   : > { %v7707_v13 = vpop.eup %7706 }
 0xa5c   : > { %v6066_v37 = vmul.f32 0.6931472, %v7707_v13 }
 0xa5e   : > { %v6067_v12 = vadd.f32 %v6066_v37, %v6059_v55 }
 0xa60   : > { %v6068_v47 = vsub.f32 %v6053_v6, %v6067_v12 }
 0xa62   : > { %6069 = vst [vmem:[%s8566_s29] sm:$0xff] %v6068_v47 }
 0xa63   : > { %8042 = shalt.err (!%p8039_p3)
}
 0xa64   : > { %s8043_s1 = scalar_lea.hbm %s6084_s14, 128  ;;  %s8047_s5 = scalar_lea.hbm %s9802_s7, 1024 }
 0xa65   : > { %p8044_p7 = scmp.ne.s32.totalorder %s6084_s14, %s8043_s1  ;;  %p8048_p5 = scmp.lt.s32.totalorder %s6084_s14, %s9802_s7 }
 0xa66   : > { %p8049_p8 = scmp.lt.s32.totalorder %s8047_s5, %s8043_s1 }
 0xa67   : > { %p8045_p1 = pnand %p8044_p7, %p9803_p0 }
 0xa68   : > { %p8050_p4 = por %p8049_p8, %p8048_p5 }
 0xa69   : > { %p8046_p12 = pneg %p8045_p1 }
 0xa6b   : > { %p8051_p13 = pnand %p8050_p4, %p8046_p12 }
 0xa6d   : > { %8054 = shalt.err (!%p8051_p13)
}
 0xa6e   : > { %6849 = dma.vmem_to_hbm [thread:$0]  (%p9803_p0), %s6087_s28, 128, %s6084_s14, %s6071_s15  }
 0xa6f PF: > { %s9804_s6 = sld [smem:[#allocation27_spill]]  ;;  %p6897_p9 = scmp.ge.s32.totalorder %s8169_s18, 2 }
 0xa70   : > { %s9805_s20 = sld [smem:[#allocation37_spill]] }
 0xa75   : > { %s6098_s23 = sand.u32 1, %s9804_s6  }
 0xa76   : > { %p9806_p2 = scmp.ne.s32.totalorder %s9805_s20, 0  ;;  %s6099_s3 = scalar_lea.sflag [#allocation5], %s6098_s23 }
 0xa78   : > { %p6881_p11 = pnand %p6897_p9, %p9806_p2 }
 0xa7a   : > { %p6882_p10 = pneg %p6881_p11 }
 0xa7c   : > { %8124 = dma.done.wait (%p6882_p10), %s6099_s3, 128  }
 0xa7d   : > { %8126 = vsyncadd (%p6882_p10), %s6099_s3, 4294967168  ;;  %s35_s18 = sadd.s32 1, %s8169_s18   ;;  %s9807_s28 = sld [smem:[#allocation28_spill]] }
 0xa7e   : > { %p32_p6 = scmp.ge.s32.totalorder %s35_s18, 10   ;;  %s9808_s9 = sld [smem:[#allocation33_spill]] }
 0xa7f   : > { %s9809_s2 = sld [smem:[#allocation34_spill]]  ;;  %s9810_s25 = smov %s8133_s26 }
 0xa80   : > { %s9811_s26 = smov %s8137_s27  ;;  %s9812_s27 = smov %s8497_s8 }
 0xa81   : > { %s9813_s29 = smov %s8149_s30  ;;  %s9814_s30 = smov %s8423_s10 }
 0xa82   : > { %s9815_s14 = smov %s8161_s16  ;;  %s9816_s15 = smov %s8165_s17 }
 0xa83   :  { %34 = sbr.rel (!%p32_p6) target bundleno = 27 (0x1b), region = 171 }
 0xa84   : > { %s9817_s16 = smov %s9808_s9 }
 0xa85   : > { %s9818_s17 = smov %s9809_s2 }
 0xa88   :  { %6104 = vsyncpa [#allocation4], 1 }
 0xa89   :  { %6106 = vsyncpa [#allocation4 + $0x1], 1 }
 0xa8a   :  { %6107 = vsyncpa [#allocation7], 1 }
 0xa8b   :  { %6109 = vsyncpa [#allocation7 + $0x1], 1 }
 0xa8c   :  { %6110 = vsyncpa [#allocation10], 1 }
 0xa8d   :  { %6111 = vsyncpa [#allocation13], 1 }
 0xa8e   :  { %6112 = vsyncpa [#allocation16], 1 }
 0xa8f   :  { %6113 = vsyncpa [#allocation5], 1 }
 0xa90   :  { %6115 = vsyncpa [#allocation5 + $0x1], 1 }

</bundles_post_ra>
